<compile_context>
chip_gen: v7x
topology: tpu7x:2x2x1
jax: 0.10.0
libtpu: 0.0.40
codegen_flags: <defaults>
</compile_context>

<pallas_src>
import functools
import math

import jax
import jax.numpy as jnp
from jax import lax
from jax.experimental import pallas as pl
from jax.experimental.pallas import tpu as pltpu


# ---------------------------------------------------------------------------
# Fused LatentAttn forward kernel
# ---------------------------------------------------------------------------

def _latent_attn_kernel(
    # ---- inputs -----------------------------------------------------------
    xt_ref,      # (C, L)     this batch's latent sequence, channel-first
    mt_ref,      # (C, 1)     mask token
    enc_w_ref,   # (3C, C)    encoder_attn 1x1-conv weight (out, in)
    enc_b_ref,   # (3C, 1)    encoder_attn bias
    dec_w_ref,   # (C, C)     decoder_attn 1x1-conv weight (out, in)
    dec_b_ref,   # (C, 1)     decoder_attn bias
    bw_ref,      # (2K, C, 1) spectral weights; row k = sin weight, K+k = cos
    fc1_w_ref,   # (C, C)     fc conv1 weight, stored (in, out)
    bn1_g_ref,   # (1, C)
    bn1_b_ref,   # (1, C)
    fc2_w_ref,   # (C, 3)     fc conv2 weight, stored (in, out)
    bn2_g_ref,   # (1, 3)
    bn2_b_ref,   # (1, 3)
    # ---- outputs ----------------------------------------------------------
    xn_pre_ref,  # (C, N)     per-batch block of xn_pre
    pred_ref,    # (B, N, 3)  resident block, written on the last grid step
    # ---- scratch ----------------------------------------------------------
    rows_ref,    # (B, N, C)  channel-last copy of xn_pre for the fused fc head
    *, head, num_basis, depth, eps, slope):
  b = pl.program_id(0)
  C, L = xt_ref.shape
  N = xn_pre_ref.shape[1]
  B = pred_ref.shape[0]
  c = C // head
  K = num_basis
  scale = float(c) ** 0.5      # reference: softmax(scores * dim ** 0.5)

  # 0/1 row masks selecting each head's channel block; built once, reused by
  # both attentions and every depth iteration.
  row_ids = lax.broadcasted_iota(jnp.int32, (C, 1), 0)
  head_masks = [
      ((row_ids >= h * c) & (row_ids < (h + 1) * c)).astype(jnp.float32)
      for h in range(head)
  ]

  def mh_attn_cf(q_cf, k_cf, v_cf):
    """Multi-head attention, channel-first in, channel-first out.

    q_cf: (C, Lq);  k_cf, v_cf: (C, Lk)  ->  (C, Lq).
    Head selection via 0/1 row masks keeps every matmul a plain full-width
    dot_general (no unaligned slicing / concatenation required).
    """
    lq = q_cf.shape[1]
    out = jnp.zeros((C, lq), jnp.float32)
    for h in range(head):
      # scores[l, s] = sum_{ch in head h} q[ch, l] * k[ch, s]
      s = lax.dot_general(q_cf * head_masks[h], k_cf,
                          (((0,), (0,)), ((), ())),
                          preferred_element_type=jnp.float32) * scale
      s = s - jnp.max(s, axis=-1, keepdims=True)
      p = jnp.exp(s)
      p = p * pl.reciprocal(jnp.sum(p, axis=-1, keepdims=True), approx=True)
      # out[ch, l] += sum_s v[ch, s] * p[l, s]  (rows outside head h stay 0)
      out = out + lax.dot_general(v_cf * head_masks[h], p,
                                  (((1,), (1,)), ((), ())),
                                  preferred_element_type=jnp.float32)
    return out

  enc_w = enc_w_ref[...]
  enc_b = enc_b_ref[...]
  dec_w = dec_w_ref[...]
  dec_b = dec_b_ref[...]

  x = xt_ref[...]                                   # (C, L)
  xm = jnp.broadcast_to(mt_ref[...], (C, N))        # _mask() with ratio == 1.0

  for _ in range(depth):
    # ------------------------------ encoder -------------------------------
    qkv = jnp.dot(enc_w, x, preferred_element_type=jnp.float32) + enc_b   # (3C, L)
    att = mh_attn_cf(qkv[0:C, :], qkv[C:2 * C, :], qkv[2 * C:3 * C, :])   # (C, L)

    # get_basis + compl_mul2d with angle_k = pi*(k/K)*att = k*theta:
    # sin/cos angle-addition recurrence -> 2 transcendentals per element.
    theta = att * (math.pi / K)
    st = jnp.sin(theta)
    ct = jnp.cos(theta)
    acc = jnp.broadcast_to(bw_ref[K], (C, L))       # k = 0 term: sin=0, cos=1
    s_k, c_k = st, ct                               # sin/cos of 1 * theta
    for k in range(1, K):
      acc = acc + s_k * bw_ref[k] + c_k * bw_ref[K + k]
      if k + 1 < K:
        s_k, c_k = s_k * ct + c_k * st, c_k * ct - s_k * st
    x = acc + x                                     # residual

    # ------------------------------ decoder -------------------------------
    qd = jnp.dot(dec_w, xm, preferred_element_type=jnp.float32) + dec_b   # (C, N)
    xm = mh_attn_cf(qd, x, x) + xm                  # (C, N)

  # Per-batch outputs: xn_pre block + channel-last rows for the fc head.
  xn_pre_ref[...] = xm
  rows_ref[b] = xm.T                                # (N, C)

  # -------------- fused fc = Conv1D([C, C, 3]), last grid step ------------
  # Runs once over ALL batches' rows so BatchNorm uses the true per-channel
  # batch statistics over (B*N) rows (training-mode nn.BatchNorm1d semantics).
  @pl.when(b == B - 1)
  def _():
    xr = jnp.concatenate([rows_ref[i] for i in range(B)], axis=0)   # (B*N, C)

    h1 = jnp.dot(xr, fc1_w_ref[...], preferred_element_type=jnp.float32)
    mu1 = jnp.mean(h1, axis=0, keepdims=True)
    var1 = jnp.mean(jnp.square(h1 - mu1), axis=0, keepdims=True)    # biased var
    h1 = (h1 - mu1) * lax.rsqrt(var1 + eps) * bn1_g_ref[...] + bn1_b_ref[...]
    h1 = jnp.where(h1 > 0, h1, slope * h1)

    h2 = jnp.dot(h1, fc2_w_ref[...], preferred_element_type=jnp.float32)
    mu2 = jnp.mean(h2, axis=0, keepdims=True)
    var2 = jnp.mean(jnp.square(h2 - mu2), axis=0, keepdims=True)
    h2 = (h2 - mu2) * lax.rsqrt(var2 + eps) * bn2_g_ref[...] + bn2_b_ref[...]
    h2 = jnp.where(h2 > 0, h2, slope * h2)                          # (B*N, 3)

    for i in range(B):
      pred_ref[i] = h2[i * N:(i + 1) * N, :]


# ---------------------------------------------------------------------------
# Wrapper: one pallas_call for the whole LatentAttn forward
# ---------------------------------------------------------------------------

def latent_attn_forward(params, xt, xn, *, head=8, num_basis=12, depth=1,
                        ratio=1.0):
  """LatentAttn.forward.  Returns (xn_pre (B,C,N) f32, pred (B,N,3) f32)."""
  xt = xt.astype(jnp.float32)
  B, C, L = xt.shape
  N = xn.shape[2]
  K = num_basis

  # _mask(): with ratio == 1.0, len_keep == 0 -> x_masked is the mask_token
  # broadcast to (B, C, N); xn itself is never read.
  # TODO(synk): the ratio < 1.0 random keep/restore branch (argsort + gather)
  #             is not implemented; it is unreachable for the default ratio.
  assert int(N * (1.0 - ratio)) == 0, "only ratio == 1.0 is implemented"

  kern = functools.partial(_latent_attn_kernel, head=head, num_basis=K,
                           depth=depth, eps=1e-5, slope=0.2)

  def fixed(shape):
    zero = (0,) * len(shape)
    return pl.BlockSpec(shape, lambda b: zero)

  in_specs = [
      pl.BlockSpec((None, C, L), lambda b: (b, 0, 0)),  # xt: one batch / step
      fixed((C, 1)),                                    # mask_token
      fixed((3 * C, C)), fixed((3 * C, 1)),             # encoder_attn w, b
      fixed((C, C)), fixed((C, 1)),                     # decoder_attn w, b
      fixed((2 * K, C, 1)),                             # spectral weights
      fixed((C, C)), fixed((1, C)), fixed((1, C)),      # fc1 w, bn1 gamma/beta
      fixed((C, 3)), fixed((1, 3)), fixed((1, 3)),      # fc2 w, bn2 gamma/beta
  ]
  out_specs = (
      pl.BlockSpec((None, C, N), lambda b: (b, 0, 0)),  # xn_pre
      pl.BlockSpec((B, N, 3), lambda b: (0, 0, 0)),     # pred (last-step write)
  )

  xn_pre, pred = pl.pallas_call(
      kern,
      grid=(B,),
      out_shape=(jax.ShapeDtypeStruct((B, C, N), jnp.float32),
                 jax.ShapeDtypeStruct((B, N, 3), jnp.float32)),
      in_specs=in_specs,
      out_specs=out_specs,
      scratch_shapes=[pltpu.VMEM((B, N, C), jnp.float32)],
      # "arbitrary": the last grid step reads every batch's rows from the VMEM
      # scratch for the fused fc/BatchNorm, so steps must run in order on one
      # core.  If B / L / N are ever scaled up, split the per-batch part into a
      # "parallel" grid + a separate fc call (v7x second TensorCore) and tile
      # the attention flash-style to bound VMEM.
      compiler_params=pltpu.CompilerParams(dimension_semantics=("arbitrary",)),
  )(xt, params["mask_token"], params["enc_w"], params["enc_b"],
    params["dec_w"], params["dec_b"], params["weights"],
    params["fc1_w"], params["bn1_g"], params["bn1_b"],
    params["fc2_w"], params["bn2_g"], params["bn2_b"])
  return xn_pre, pred


# ---------------------------------------------------------------------------
# Parameter construction (kernel-ready layouts)
# ---------------------------------------------------------------------------

def init_params(key, width, num_basis):
  """Parameters in kernel-ready layouts.

  Conv weights are stored as dense matrices:
    enc_w / dec_w : (out, in)  == PyTorch conv weight[:, :, 0]
    fc1_w / fc2_w : (in, out)  == PyTorch conv weight[:, :, 0].T
  Spectral weights are stored transposed as (2K, C, 1) (== weights.T[:, :, None])
  so the kernel reads one (C, 1) mode-column per recurrence step via a cheap
  leading-axis index.
  """
  C = width
  K = num_basis
  ks = jax.random.split(key, 8)
  w_c2k = (1.0 / C) * jax.random.uniform(ks[0], (C, 2 * K), jnp.float32)
  return {
      "weights": jnp.transpose(w_c2k)[:, :, None],                    # (2K, C, 1)
      "mask_token": 0.02 * jax.random.truncated_normal(
          ks[1], -2.0, 2.0, (C, 1), jnp.float32),
      "enc_w": jax.random.normal(ks[2], (3 * C, C), jnp.float32) / math.sqrt(C),
      "enc_b": 0.01 * jax.random.normal(ks[3], (3 * C, 1), jnp.float32),
      "dec_w": jax.random.normal(ks[4], (C, C), jnp.float32) / math.sqrt(C),
      "dec_b": 0.01 * jax.random.normal(ks[5], (C, 1), jnp.float32),
      "fc1_w": jax.random.normal(ks[6], (C, C), jnp.float32) / math.sqrt(C),
      "fc2_w": jax.random.normal(ks[7], (C, 3), jnp.float32) / math.sqrt(C),
      "bn1_g": jnp.ones((1, C), jnp.float32),
      "bn1_b": jnp.zeros((1, C), jnp.float32),
      "bn2_g": jnp.ones((1, 3), jnp.float32),
      "bn2_b": jnp.zeros((1, 3), jnp.float32),
  }


# ---------------------------------------------------------------------------

if __name__ == "__main__":
  B, C, L, N = 2, 32, 16, 16          # width=32, length=16
  head, num_basis, depth = 8, 12, 1

  key = jax.random.PRNGKey(0)
  kp, kxt, kxn = jax.random.split(key, 3)
  params = init_params(kp, C, num_basis)
  xt = jax.random.normal(kxt, (B, C, L), jnp.float32)
  xn = jax.random.normal(kxn, (B, C, N), jnp.float32)

  fwd = jax.jit(functools.partial(latent_attn_forward,
                                  head=head, num_basis=num_basis, depth=depth))
  xn_pre, pred = fwd(params, xt, xn)
  jax.block_until_ready((xn_pre, pred))

  assert xn_pre.shape == (B, C, N) and xn_pre.dtype == jnp.float32
  assert pred.shape == (B, N, 3) and pred.dtype == jnp.float32
  assert bool(jnp.all(jnp.isfinite(xn_pre))) and bool(jnp.all(jnp.isfinite(pred)))
  print("KERNEL_OK")
</pallas_src>

<mosaic_0001>
module attributes {stable_mosaic.version = 11 : i64} {
  func.func @_latent_attn_kernel(%arg0: i32, %arg1: memref<1x32x16xf32, #tpu.memory_space<vmem>>, %arg2: memref<32x1xf32, #tpu.memory_space<vmem>>, %arg3: memref<96x32xf32, #tpu.memory_space<vmem>>, %arg4: memref<96x1xf32, #tpu.memory_space<vmem>>, %arg5: memref<32x32xf32, #tpu.memory_space<vmem>>, %arg6: memref<32x1xf32, #tpu.memory_space<vmem>>, %arg7: memref<24x32x1xf32, #tpu.memory_space<vmem>>, %arg8: memref<32x32xf32, #tpu.memory_space<vmem>>, %arg9: memref<1x32xf32, #tpu.memory_space<vmem>>, %arg10: memref<1x32xf32, #tpu.memory_space<vmem>>, %arg11: memref<32x3xf32, #tpu.memory_space<vmem>>, %arg12: memref<1x3xf32, #tpu.memory_space<vmem>>, %arg13: memref<1x3xf32, #tpu.memory_space<vmem>>, %arg14: memref<1x32x16xf32, #tpu.memory_space<vmem>>, %arg15: memref<2x16x3xf32, #tpu.memory_space<vmem>>, %arg16: memref<2x16x32xf32, #tpu.memory_space<vmem>>) attributes {dimension_semantics = [#tpu.dimension_semantics<arbitrary>], iteration_bounds = array<i64: 2>, scalar_prefetch = 0 : i64, scratch_operands = 1 : i64, tpu.core_type = #tpu.core_type<tc>, window_params = [{transform_indices = @transform_0, window_bounds = array<i64: 1, 32, 16>}, {pipeline_mode = #tpu.pipeline_mode<synchronous>, transform_indices = @transform_1, window_bounds = array<i64: 32, 1>}, {pipeline_mode = #tpu.pipeline_mode<synchronous>, transform_indices = @transform_2, window_bounds = array<i64: 96, 32>}, {pipeline_mode = #tpu.pipeline_mode<synchronous>, transform_indices = @transform_3, window_bounds = array<i64: 96, 1>}, {pipeline_mode = #tpu.pipeline_mode<synchronous>, transform_indices = @transform_4, window_bounds = array<i64: 32, 32>}, {pipeline_mode = #tpu.pipeline_mode<synchronous>, transform_indices = @transform_5, window_bounds = array<i64: 32, 1>}, {pipeline_mode = #tpu.pipeline_mode<synchronous>, transform_indices = @transform_6, window_bounds = array<i64: 24, 32, 1>}, {pipeline_mode = #tpu.pipeline_mode<synchronous>, transform_indices = @transform_7, window_bounds = array<i64: 32, 32>}, {pipeline_mode = #tpu.pipeline_mode<synchronous>, transform_indices = @transform_8, window_bounds = array<i64: 1, 32>}, {pipeline_mode = #tpu.pipeline_mode<synchronous>, transform_indices = @transform_9, window_bounds = array<i64: 1, 32>}, {pipeline_mode = #tpu.pipeline_mode<synchronous>, transform_indices = @transform_10, window_bounds = array<i64: 32, 3>}, {pipeline_mode = #tpu.pipeline_mode<synchronous>, transform_indices = @transform_11, window_bounds = array<i64: 1, 3>}, {pipeline_mode = #tpu.pipeline_mode<synchronous>, transform_indices = @transform_12, window_bounds = array<i64: 1, 3>}, {transform_indices = @transform_13, window_bounds = array<i64: 1, 32, 16>}, {pipeline_mode = #tpu.pipeline_mode<synchronous>, transform_indices = @transform_14, window_bounds = array<i64: 2, 16, 3>}]} {
    %0 = tpu.iota {dimensions = array<i32: 0>} : vector<32x1xi32>
    %c0_i32 = arith.constant 0 : i32
    %1 = vector.broadcast %c0_i32 : i32 to vector<32x1xi32>
    %2 = arith.cmpi sge, %0, %1 : vector<32x1xi32>
    %c4_i32 = arith.constant 4 : i32
    %3 = vector.broadcast %c4_i32 : i32 to vector<32x1xi32>
    %4 = arith.cmpi slt, %0, %3 : vector<32x1xi32>
    %5 = arith.andi %2, %4 : vector<32x1xi1>
    %6 = arith.extui %5 : vector<32x1xi1> to vector<32x1xi32>
    %7 = arith.sitofp %6 : vector<32x1xi32> to vector<32x1xf32>
    %c4_i32_0 = arith.constant 4 : i32
    %8 = vector.broadcast %c4_i32_0 : i32 to vector<32x1xi32>
    %9 = arith.cmpi sge, %0, %8 : vector<32x1xi32>
    %c8_i32 = arith.constant 8 : i32
    %10 = vector.broadcast %c8_i32 : i32 to vector<32x1xi32>
    %11 = arith.cmpi slt, %0, %10 : vector<32x1xi32>
    %12 = arith.andi %9, %11 : vector<32x1xi1>
    %13 = arith.extui %12 : vector<32x1xi1> to vector<32x1xi32>
    %14 = arith.sitofp %13 : vector<32x1xi32> to vector<32x1xf32>
    %c8_i32_1 = arith.constant 8 : i32
    %15 = vector.broadcast %c8_i32_1 : i32 to vector<32x1xi32>
    %16 = arith.cmpi sge, %0, %15 : vector<32x1xi32>
    %c12_i32 = arith.constant 12 : i32
    %17 = vector.broadcast %c12_i32 : i32 to vector<32x1xi32>
    %18 = arith.cmpi slt, %0, %17 : vector<32x1xi32>
    %19 = arith.andi %16, %18 : vector<32x1xi1>
    %20 = arith.extui %19 : vector<32x1xi1> to vector<32x1xi32>
    %21 = arith.sitofp %20 : vector<32x1xi32> to vector<32x1xf32>
    %c12_i32_2 = arith.constant 12 : i32
    %22 = vector.broadcast %c12_i32_2 : i32 to vector<32x1xi32>
    %23 = arith.cmpi sge, %0, %22 : vector<32x1xi32>
    %c16_i32 = arith.constant 16 : i32
    %24 = vector.broadcast %c16_i32 : i32 to vector<32x1xi32>
    %25 = arith.cmpi slt, %0, %24 : vector<32x1xi32>
    %26 = arith.andi %23, %25 : vector<32x1xi1>
    %27 = arith.extui %26 : vector<32x1xi1> to vector<32x1xi32>
    %28 = arith.sitofp %27 : vector<32x1xi32> to vector<32x1xf32>
    %c16_i32_3 = arith.constant 16 : i32
    %29 = vector.broadcast %c16_i32_3 : i32 to vector<32x1xi32>
    %30 = arith.cmpi sge, %0, %29 : vector<32x1xi32>
    %c20_i32 = arith.constant 20 : i32
    %31 = vector.broadcast %c20_i32 : i32 to vector<32x1xi32>
    %32 = arith.cmpi slt, %0, %31 : vector<32x1xi32>
    %33 = arith.andi %30, %32 : vector<32x1xi1>
    %34 = arith.extui %33 : vector<32x1xi1> to vector<32x1xi32>
    %35 = arith.sitofp %34 : vector<32x1xi32> to vector<32x1xf32>
    %c20_i32_4 = arith.constant 20 : i32
    %36 = vector.broadcast %c20_i32_4 : i32 to vector<32x1xi32>
    %37 = arith.cmpi sge, %0, %36 : vector<32x1xi32>
    %c24_i32 = arith.constant 24 : i32
    %38 = vector.broadcast %c24_i32 : i32 to vector<32x1xi32>
    %39 = arith.cmpi slt, %0, %38 : vector<32x1xi32>
    %40 = arith.andi %37, %39 : vector<32x1xi1>
    %41 = arith.extui %40 : vector<32x1xi1> to vector<32x1xi32>
    %42 = arith.sitofp %41 : vector<32x1xi32> to vector<32x1xf32>
    %c24_i32_5 = arith.constant 24 : i32
    %43 = vector.broadcast %c24_i32_5 : i32 to vector<32x1xi32>
    %44 = arith.cmpi sge, %0, %43 : vector<32x1xi32>
    %c28_i32 = arith.constant 28 : i32
    %45 = vector.broadcast %c28_i32 : i32 to vector<32x1xi32>
    %46 = arith.cmpi slt, %0, %45 : vector<32x1xi32>
    %47 = arith.andi %44, %46 : vector<32x1xi1>
    %48 = arith.extui %47 : vector<32x1xi1> to vector<32x1xi32>
    %49 = arith.sitofp %48 : vector<32x1xi32> to vector<32x1xf32>
    %c28_i32_6 = arith.constant 28 : i32
    %50 = vector.broadcast %c28_i32_6 : i32 to vector<32x1xi32>
    %51 = arith.cmpi sge, %0, %50 : vector<32x1xi32>
    %c32_i32 = arith.constant 32 : i32
    %52 = vector.broadcast %c32_i32 : i32 to vector<32x1xi32>
    %53 = arith.cmpi slt, %0, %52 : vector<32x1xi32>
    %54 = arith.andi %51, %53 : vector<32x1xi1>
    %55 = arith.extui %54 : vector<32x1xi1> to vector<32x1xi32>
    %56 = arith.sitofp %55 : vector<32x1xi32> to vector<32x1xf32>
    %c0 = arith.constant 0 : index
    %c0_7 = arith.constant 0 : index
    %57 = vector.load %arg3[%c0, %c0_7] : memref<96x32xf32, #tpu.memory_space<vmem>>, vector<96x32xf32>
    %c0_8 = arith.constant 0 : index
    %c0_9 = arith.constant 0 : index
    %58 = vector.load %arg4[%c0_8, %c0_9] : memref<96x1xf32, #tpu.memory_space<vmem>>, vector<96x1xf32>
    %c0_10 = arith.constant 0 : index
    %c0_11 = arith.constant 0 : index
    %59 = vector.load %arg5[%c0_10, %c0_11] : memref<32x32xf32, #tpu.memory_space<vmem>>, vector<32x32xf32>
    %c0_12 = arith.constant 0 : index
    %c0_13 = arith.constant 0 : index
    %60 = vector.load %arg6[%c0_12, %c0_13] : memref<32x1xf32, #tpu.memory_space<vmem>>, vector<32x1xf32>
    %c0_14 = arith.constant 0 : index
    %c0_15 = arith.constant 0 : index
    %c0_16 = arith.constant 0 : index
    %61 = vector.load %arg1[%c0_14, %c0_15, %c0_16] : memref<1x32x16xf32, #tpu.memory_space<vmem>>, vector<1x32x16xf32>
    %62 = vector.shape_cast %61 : vector<1x32x16xf32> to vector<32x16xf32>
    %c0_17 = arith.constant 0 : index
    %c0_18 = arith.constant 0 : index
    %63 = vector.load %arg2[%c0_17, %c0_18] : memref<32x1xf32, #tpu.memory_space<vmem>>, vector<32x1xf32>
    %64 = vector.shape_cast %63 : vector<32x1xf32> to vector<32x1xf32>
    %65 = vector.broadcast %64 : vector<32x1xf32> to vector<32x16xf32>
    %cst = arith.constant dense<0.000000e+00> : vector<96x16xf32>
    %66 = tpu.matmul %57, %62, %cst {dimension_numbers = #tpu.dot_dimension_numbers<[1], [0], [0], [1], [0, 0, 1, 1], [], []>} : vector<96x32xf32>, vector<32x16xf32>, vector<96x16xf32> -> vector<96x16xf32>
    %67 = vector.broadcast %58 : vector<96x1xf32> to vector<96x16xf32>
    %68 = arith.addf %66, %67 : vector<96x16xf32>
    %69 = vector.extract_strided_slice %68 {offsets = [0, 0], sizes = [32, 16], strides = [1, 1]} : vector<96x16xf32> to vector<32x16xf32>
    %70 = vector.extract_strided_slice %68 {offsets = [32, 0], sizes = [32, 16], strides = [1, 1]} : vector<96x16xf32> to vector<32x16xf32>
    %71 = vector.extract_strided_slice %68 {offsets = [64, 0], sizes = [32, 16], strides = [1, 1]} : vector<96x16xf32> to vector<32x16xf32>
    %cst_19 = arith.constant 0.000000e+00 : f32
    %72 = vector.broadcast %cst_19 : f32 to vector<32x16xf32>
    %73 = vector.broadcast %7 : vector<32x1xf32> to vector<32x16xf32>
    %74 = arith.mulf %69, %73 : vector<32x16xf32>
    %cst_20 = arith.constant dense<0.000000e+00> : vector<16x16xf32>
    %75 = tpu.matmul %74, %70, %cst_20 {dimension_numbers = #tpu.dot_dimension_numbers<[0], [0], [1], [1], [0, 1, 1, 1], [], []>} : vector<32x16xf32>, vector<32x16xf32>, vector<16x16xf32> -> vector<16x16xf32>
    %cst_21 = arith.constant 2.000000e+00 : f32
    %76 = vector.broadcast %cst_21 : f32 to vector<16x16xf32>
    %77 = arith.mulf %75, %76 : vector<16x16xf32>
    %cst_22 = arith.constant dense<0xFF800000> : vector<16xf32>
    %78 = vector.multi_reduction <maximumf>, %77, %cst_22 [1] : vector<16x16xf32> to vector<16xf32>
    %79 = vector.shape_cast %78 : vector<16xf32> to vector<16x1xf32>
    %80 = vector.broadcast %79 : vector<16x1xf32> to vector<16x16xf32>
    %81 = arith.subf %77, %80 : vector<16x16xf32>
    %82 = math.exp %81 : vector<16x16xf32>
    %cst_23 = arith.constant dense<0.000000e+00> : vector<16xf32>
    %83 = vector.multi_reduction <add>, %82, %cst_23 [1] : vector<16x16xf32> to vector<16xf32>
    %84 = vector.shape_cast %83 : vector<16xf32> to vector<16x1xf32>
    %85 = tpu.reciprocal %84 {approx = true} : vector<16x1xf32> -> vector<16x1xf32>
    %86 = vector.broadcast %85 : vector<16x1xf32> to vector<16x16xf32>
    %87 = arith.mulf %82, %86 : vector<16x16xf32>
    %88 = vector.broadcast %7 : vector<32x1xf32> to vector<32x16xf32>
    %89 = arith.mulf %71, %88 : vector<32x16xf32>
    %cst_24 = arith.constant dense<0.000000e+00> : vector<32x16xf32>
    %90 = tpu.matmul %89, %87, %cst_24 {dimension_numbers = #tpu.dot_dimension_numbers<[1], [1], [0], [0], [0, 0, 1, 0], [], []>} : vector<32x16xf32>, vector<16x16xf32>, vector<32x16xf32> -> vector<32x16xf32>
    %91 = arith.addf %72, %90 : vector<32x16xf32>
    %92 = vector.broadcast %14 : vector<32x1xf32> to vector<32x16xf32>
    %93 = arith.mulf %69, %92 : vector<32x16xf32>
    %cst_25 = arith.constant dense<0.000000e+00> : vector<16x16xf32>
    %94 = tpu.matmul %93, %70, %cst_25 {dimension_numbers = #tpu.dot_dimension_numbers<[0], [0], [1], [1], [0, 1, 1, 1], [], []>} : vector<32x16xf32>, vector<32x16xf32>, vector<16x16xf32> -> vector<16x16xf32>
    %cst_26 = arith.constant 2.000000e+00 : f32
    %95 = vector.broadcast %cst_26 : f32 to vector<16x16xf32>
    %96 = arith.mulf %94, %95 : vector<16x16xf32>
    %cst_27 = arith.constant dense<0xFF800000> : vector<16xf32>
    %97 = vector.multi_reduction <maximumf>, %96, %cst_27 [1] : vector<16x16xf32> to vector<16xf32>
    %98 = vector.shape_cast %97 : vector<16xf32> to vector<16x1xf32>
    %99 = vector.broadcast %98 : vector<16x1xf32> to vector<16x16xf32>
    %100 = arith.subf %96, %99 : vector<16x16xf32>
    %101 = math.exp %100 : vector<16x16xf32>
    %cst_28 = arith.constant dense<0.000000e+00> : vector<16xf32>
    %102 = vector.multi_reduction <add>, %101, %cst_28 [1] : vector<16x16xf32> to vector<16xf32>
    %103 = vector.shape_cast %102 : vector<16xf32> to vector<16x1xf32>
    %104 = tpu.reciprocal %103 {approx = true} : vector<16x1xf32> -> vector<16x1xf32>
    %105 = vector.broadcast %104 : vector<16x1xf32> to vector<16x16xf32>
    %106 = arith.mulf %101, %105 : vector<16x16xf32>
    %107 = vector.broadcast %14 : vector<32x1xf32> to vector<32x16xf32>
    %108 = arith.mulf %71, %107 : vector<32x16xf32>
    %cst_29 = arith.constant dense<0.000000e+00> : vector<32x16xf32>
    %109 = tpu.matmul %108, %106, %cst_29 {dimension_numbers = #tpu.dot_dimension_numbers<[1], [1], [0], [0], [0, 0, 1, 0], [], []>} : vector<32x16xf32>, vector<16x16xf32>, vector<32x16xf32> -> vector<32x16xf32>
    %110 = arith.addf %91, %109 : vector<32x16xf32>
    %111 = vector.broadcast %21 : vector<32x1xf32> to vector<32x16xf32>
    %112 = arith.mulf %69, %111 : vector<32x16xf32>
    %cst_30 = arith.constant dense<0.000000e+00> : vector<16x16xf32>
    %113 = tpu.matmul %112, %70, %cst_30 {dimension_numbers = #tpu.dot_dimension_numbers<[0], [0], [1], [1], [0, 1, 1, 1], [], []>} : vector<32x16xf32>, vector<32x16xf32>, vector<16x16xf32> -> vector<16x16xf32>
    %cst_31 = arith.constant 2.000000e+00 : f32
    %114 = vector.broadcast %cst_31 : f32 to vector<16x16xf32>
    %115 = arith.mulf %113, %114 : vector<16x16xf32>
    %cst_32 = arith.constant dense<0xFF800000> : vector<16xf32>
    %116 = vector.multi_reduction <maximumf>, %115, %cst_32 [1] : vector<16x16xf32> to vector<16xf32>
    %117 = vector.shape_cast %116 : vector<16xf32> to vector<16x1xf32>
    %118 = vector.broadcast %117 : vector<16x1xf32> to vector<16x16xf32>
    %119 = arith.subf %115, %118 : vector<16x16xf32>
    %120 = math.exp %119 : vector<16x16xf32>
    %cst_33 = arith.constant dense<0.000000e+00> : vector<16xf32>
    %121 = vector.multi_reduction <add>, %120, %cst_33 [1] : vector<16x16xf32> to vector<16xf32>
    %122 = vector.shape_cast %121 : vector<16xf32> to vector<16x1xf32>
    %123 = tpu.reciprocal %122 {approx = true} : vector<16x1xf32> -> vector<16x1xf32>
    %124 = vector.broadcast %123 : vector<16x1xf32> to vector<16x16xf32>
    %125 = arith.mulf %120, %124 : vector<16x16xf32>
    %126 = vector.broadcast %21 : vector<32x1xf32> to vector<32x16xf32>
    %127 = arith.mulf %71, %126 : vector<32x16xf32>
    %cst_34 = arith.constant dense<0.000000e+00> : vector<32x16xf32>
    %128 = tpu.matmul %127, %125, %cst_34 {dimension_numbers = #tpu.dot_dimension_numbers<[1], [1], [0], [0], [0, 0, 1, 0], [], []>} : vector<32x16xf32>, vector<16x16xf32>, vector<32x16xf32> -> vector<32x16xf32>
    %129 = arith.addf %110, %128 : vector<32x16xf32>
    %130 = vector.broadcast %28 : vector<32x1xf32> to vector<32x16xf32>
    %131 = arith.mulf %69, %130 : vector<32x16xf32>
    %cst_35 = arith.constant dense<0.000000e+00> : vector<16x16xf32>
    %132 = tpu.matmul %131, %70, %cst_35 {dimension_numbers = #tpu.dot_dimension_numbers<[0], [0], [1], [1], [0, 1, 1, 1], [], []>} : vector<32x16xf32>, vector<32x16xf32>, vector<16x16xf32> -> vector<16x16xf32>
    %cst_36 = arith.constant 2.000000e+00 : f32
    %133 = vector.broadcast %cst_36 : f32 to vector<16x16xf32>
    %134 = arith.mulf %132, %133 : vector<16x16xf32>
    %cst_37 = arith.constant dense<0xFF800000> : vector<16xf32>
    %135 = vector.multi_reduction <maximumf>, %134, %cst_37 [1] : vector<16x16xf32> to vector<16xf32>
    %136 = vector.shape_cast %135 : vector<16xf32> to vector<16x1xf32>
    %137 = vector.broadcast %136 : vector<16x1xf32> to vector<16x16xf32>
    %138 = arith.subf %134, %137 : vector<16x16xf32>
    %139 = math.exp %138 : vector<16x16xf32>
    %cst_38 = arith.constant dense<0.000000e+00> : vector<16xf32>
    %140 = vector.multi_reduction <add>, %139, %cst_38 [1] : vector<16x16xf32> to vector<16xf32>
    %141 = vector.shape_cast %140 : vector<16xf32> to vector<16x1xf32>
    %142 = tpu.reciprocal %141 {approx = true} : vector<16x1xf32> -> vector<16x1xf32>
    %143 = vector.broadcast %142 : vector<16x1xf32> to vector<16x16xf32>
    %144 = arith.mulf %139, %143 : vector<16x16xf32>
    %145 = vector.broadcast %28 : vector<32x1xf32> to vector<32x16xf32>
    %146 = arith.mulf %71, %145 : vector<32x16xf32>
    %cst_39 = arith.constant dense<0.000000e+00> : vector<32x16xf32>
    %147 = tpu.matmul %146, %144, %cst_39 {dimension_numbers = #tpu.dot_dimension_numbers<[1], [1], [0], [0], [0, 0, 1, 0], [], []>} : vector<32x16xf32>, vector<16x16xf32>, vector<32x16xf32> -> vector<32x16xf32>
    %148 = arith.addf %129, %147 : vector<32x16xf32>
    %149 = vector.broadcast %35 : vector<32x1xf32> to vector<32x16xf32>
    %150 = arith.mulf %69, %149 : vector<32x16xf32>
    %cst_40 = arith.constant dense<0.000000e+00> : vector<16x16xf32>
    %151 = tpu.matmul %150, %70, %cst_40 {dimension_numbers = #tpu.dot_dimension_numbers<[0], [0], [1], [1], [0, 1, 1, 1], [], []>} : vector<32x16xf32>, vector<32x16xf32>, vector<16x16xf32> -> vector<16x16xf32>
    %cst_41 = arith.constant 2.000000e+00 : f32
    %152 = vector.broadcast %cst_41 : f32 to vector<16x16xf32>
    %153 = arith.mulf %151, %152 : vector<16x16xf32>
    %cst_42 = arith.constant dense<0xFF800000> : vector<16xf32>
    %154 = vector.multi_reduction <maximumf>, %153, %cst_42 [1] : vector<16x16xf32> to vector<16xf32>
    %155 = vector.shape_cast %154 : vector<16xf32> to vector<16x1xf32>
    %156 = vector.broadcast %155 : vector<16x1xf32> to vector<16x16xf32>
    %157 = arith.subf %153, %156 : vector<16x16xf32>
    %158 = math.exp %157 : vector<16x16xf32>
    %cst_43 = arith.constant dense<0.000000e+00> : vector<16xf32>
    %159 = vector.multi_reduction <add>, %158, %cst_43 [1] : vector<16x16xf32> to vector<16xf32>
    %160 = vector.shape_cast %159 : vector<16xf32> to vector<16x1xf32>
    %161 = tpu.reciprocal %160 {approx = true} : vector<16x1xf32> -> vector<16x1xf32>
    %162 = vector.broadcast %161 : vector<16x1xf32> to vector<16x16xf32>
    %163 = arith.mulf %158, %162 : vector<16x16xf32>
    %164 = vector.broadcast %35 : vector<32x1xf32> to vector<32x16xf32>
    %165 = arith.mulf %71, %164 : vector<32x16xf32>
    %cst_44 = arith.constant dense<0.000000e+00> : vector<32x16xf32>
    %166 = tpu.matmul %165, %163, %cst_44 {dimension_numbers = #tpu.dot_dimension_numbers<[1], [1], [0], [0], [0, 0, 1, 0], [], []>} : vector<32x16xf32>, vector<16x16xf32>, vector<32x16xf32> -> vector<32x16xf32>
    %167 = arith.addf %148, %166 : vector<32x16xf32>
    %168 = vector.broadcast %42 : vector<32x1xf32> to vector<32x16xf32>
    %169 = arith.mulf %69, %168 : vector<32x16xf32>
    %cst_45 = arith.constant dense<0.000000e+00> : vector<16x16xf32>
    %170 = tpu.matmul %169, %70, %cst_45 {dimension_numbers = #tpu.dot_dimension_numbers<[0], [0], [1], [1], [0, 1, 1, 1], [], []>} : vector<32x16xf32>, vector<32x16xf32>, vector<16x16xf32> -> vector<16x16xf32>
    %cst_46 = arith.constant 2.000000e+00 : f32
    %171 = vector.broadcast %cst_46 : f32 to vector<16x16xf32>
    %172 = arith.mulf %170, %171 : vector<16x16xf32>
    %cst_47 = arith.constant dense<0xFF800000> : vector<16xf32>
    %173 = vector.multi_reduction <maximumf>, %172, %cst_47 [1] : vector<16x16xf32> to vector<16xf32>
    %174 = vector.shape_cast %173 : vector<16xf32> to vector<16x1xf32>
    %175 = vector.broadcast %174 : vector<16x1xf32> to vector<16x16xf32>
    %176 = arith.subf %172, %175 : vector<16x16xf32>
    %177 = math.exp %176 : vector<16x16xf32>
    %cst_48 = arith.constant dense<0.000000e+00> : vector<16xf32>
    %178 = vector.multi_reduction <add>, %177, %cst_48 [1] : vector<16x16xf32> to vector<16xf32>
    %179 = vector.shape_cast %178 : vector<16xf32> to vector<16x1xf32>
    %180 = tpu.reciprocal %179 {approx = true} : vector<16x1xf32> -> vector<16x1xf32>
    %181 = vector.broadcast %180 : vector<16x1xf32> to vector<16x16xf32>
    %182 = arith.mulf %177, %181 : vector<16x16xf32>
    %183 = vector.broadcast %42 : vector<32x1xf32> to vector<32x16xf32>
    %184 = arith.mulf %71, %183 : vector<32x16xf32>
    %cst_49 = arith.constant dense<0.000000e+00> : vector<32x16xf32>
    %185 = tpu.matmul %184, %182, %cst_49 {dimension_numbers = #tpu.dot_dimension_numbers<[1], [1], [0], [0], [0, 0, 1, 0], [], []>} : vector<32x16xf32>, vector<16x16xf32>, vector<32x16xf32> -> vector<32x16xf32>
    %186 = arith.addf %167, %185 : vector<32x16xf32>
    %187 = vector.broadcast %49 : vector<32x1xf32> to vector<32x16xf32>
    %188 = arith.mulf %69, %187 : vector<32x16xf32>
    %cst_50 = arith.constant dense<0.000000e+00> : vector<16x16xf32>
    %189 = tpu.matmul %188, %70, %cst_50 {dimension_numbers = #tpu.dot_dimension_numbers<[0], [0], [1], [1], [0, 1, 1, 1], [], []>} : vector<32x16xf32>, vector<32x16xf32>, vector<16x16xf32> -> vector<16x16xf32>
    %cst_51 = arith.constant 2.000000e+00 : f32
    %190 = vector.broadcast %cst_51 : f32 to vector<16x16xf32>
    %191 = arith.mulf %189, %190 : vector<16x16xf32>
    %cst_52 = arith.constant dense<0xFF800000> : vector<16xf32>
    %192 = vector.multi_reduction <maximumf>, %191, %cst_52 [1] : vector<16x16xf32> to vector<16xf32>
    %193 = vector.shape_cast %192 : vector<16xf32> to vector<16x1xf32>
    %194 = vector.broadcast %193 : vector<16x1xf32> to vector<16x16xf32>
    %195 = arith.subf %191, %194 : vector<16x16xf32>
    %196 = math.exp %195 : vector<16x16xf32>
    %cst_53 = arith.constant dense<0.000000e+00> : vector<16xf32>
    %197 = vector.multi_reduction <add>, %196, %cst_53 [1] : vector<16x16xf32> to vector<16xf32>
    %198 = vector.shape_cast %197 : vector<16xf32> to vector<16x1xf32>
    %199 = tpu.reciprocal %198 {approx = true} : vector<16x1xf32> -> vector<16x1xf32>
    %200 = vector.broadcast %199 : vector<16x1xf32> to vector<16x16xf32>
    %201 = arith.mulf %196, %200 : vector<16x16xf32>
    %202 = vector.broadcast %49 : vector<32x1xf32> to vector<32x16xf32>
    %203 = arith.mulf %71, %202 : vector<32x16xf32>
    %cst_54 = arith.constant dense<0.000000e+00> : vector<32x16xf32>
    %204 = tpu.matmul %203, %201, %cst_54 {dimension_numbers = #tpu.dot_dimension_numbers<[1], [1], [0], [0], [0, 0, 1, 0], [], []>} : vector<32x16xf32>, vector<16x16xf32>, vector<32x16xf32> -> vector<32x16xf32>
    %205 = arith.addf %186, %204 : vector<32x16xf32>
    %206 = vector.broadcast %56 : vector<32x1xf32> to vector<32x16xf32>
    %207 = arith.mulf %69, %206 : vector<32x16xf32>
    %cst_55 = arith.constant dense<0.000000e+00> : vector<16x16xf32>
    %208 = tpu.matmul %207, %70, %cst_55 {dimension_numbers = #tpu.dot_dimension_numbers<[0], [0], [1], [1], [0, 1, 1, 1], [], []>} : vector<32x16xf32>, vector<32x16xf32>, vector<16x16xf32> -> vector<16x16xf32>
    %cst_56 = arith.constant 2.000000e+00 : f32
    %209 = vector.broadcast %cst_56 : f32 to vector<16x16xf32>
    %210 = arith.mulf %208, %209 : vector<16x16xf32>
    %cst_57 = arith.constant dense<0xFF800000> : vector<16xf32>
    %211 = vector.multi_reduction <maximumf>, %210, %cst_57 [1] : vector<16x16xf32> to vector<16xf32>
    %212 = vector.shape_cast %211 : vector<16xf32> to vector<16x1xf32>
    %213 = vector.broadcast %212 : vector<16x1xf32> to vector<16x16xf32>
    %214 = arith.subf %210, %213 : vector<16x16xf32>
    %215 = math.exp %214 : vector<16x16xf32>
    %cst_58 = arith.constant dense<0.000000e+00> : vector<16xf32>
    %216 = vector.multi_reduction <add>, %215, %cst_58 [1] : vector<16x16xf32> to vector<16xf32>
    %217 = vector.shape_cast %216 : vector<16xf32> to vector<16x1xf32>
    %218 = tpu.reciprocal %217 {approx = true} : vector<16x1xf32> -> vector<16x1xf32>
    %219 = vector.broadcast %218 : vector<16x1xf32> to vector<16x16xf32>
    %220 = arith.mulf %215, %219 : vector<16x16xf32>
    %221 = vector.broadcast %56 : vector<32x1xf32> to vector<32x16xf32>
    %222 = arith.mulf %71, %221 : vector<32x16xf32>
    %cst_59 = arith.constant dense<0.000000e+00> : vector<32x16xf32>
    %223 = tpu.matmul %222, %220, %cst_59 {dimension_numbers = #tpu.dot_dimension_numbers<[1], [1], [0], [0], [0, 0, 1, 0], [], []>} : vector<32x16xf32>, vector<16x16xf32>, vector<32x16xf32> -> vector<32x16xf32>
    %224 = arith.addf %205, %223 : vector<32x16xf32>
    %cst_60 = arith.constant 0.261799395 : f32
    %225 = vector.broadcast %cst_60 : f32 to vector<32x16xf32>
    %226 = arith.mulf %224, %225 : vector<32x16xf32>
    %227 = math.sin %226 : vector<32x16xf32>
    %228 = math.cos %226 : vector<32x16xf32>
    %c12 = arith.constant 12 : index
    %c0_61 = arith.constant 0 : index
    %c0_62 = arith.constant 0 : index
    %229 = vector.load %arg7[%c12, %c0_61, %c0_62] : memref<24x32x1xf32, #tpu.memory_space<vmem>>, vector<1x32x1xf32>
    %230 = vector.shape_cast %229 : vector<1x32x1xf32> to vector<32x1xf32>
    %231 = vector.shape_cast %230 : vector<32x1xf32> to vector<32x1xf32>
    %232 = vector.broadcast %231 : vector<32x1xf32> to vector<32x16xf32>
    %c1 = arith.constant 1 : index
    %c0_63 = arith.constant 0 : index
    %c0_64 = arith.constant 0 : index
    %233 = vector.load %arg7[%c1, %c0_63, %c0_64] : memref<24x32x1xf32, #tpu.memory_space<vmem>>, vector<1x32x1xf32>
    %234 = vector.shape_cast %233 : vector<1x32x1xf32> to vector<32x1xf32>
    %235 = vector.broadcast %234 : vector<32x1xf32> to vector<32x16xf32>
    %236 = arith.mulf %227, %235 : vector<32x16xf32>
    %237 = arith.addf %232, %236 : vector<32x16xf32>
    %c13 = arith.constant 13 : index
    %c0_65 = arith.constant 0 : index
    %c0_66 = arith.constant 0 : index
    %238 = vector.load %arg7[%c13, %c0_65, %c0_66] : memref<24x32x1xf32, #tpu.memory_space<vmem>>, vector<1x32x1xf32>
    %239 = vector.shape_cast %238 : vector<1x32x1xf32> to vector<32x1xf32>
    %240 = vector.broadcast %239 : vector<32x1xf32> to vector<32x16xf32>
    %241 = arith.mulf %228, %240 : vector<32x16xf32>
    %242 = arith.addf %237, %241 : vector<32x16xf32>
    %243 = arith.mulf %227, %228 : vector<32x16xf32>
    %244 = arith.mulf %228, %227 : vector<32x16xf32>
    %245 = arith.addf %243, %244 : vector<32x16xf32>
    %246 = arith.mulf %228, %228 : vector<32x16xf32>
    %247 = arith.mulf %227, %227 : vector<32x16xf32>
    %248 = arith.subf %246, %247 : vector<32x16xf32>
    %c2 = arith.constant 2 : index
    %c0_67 = arith.constant 0 : index
    %c0_68 = arith.constant 0 : index
    %249 = vector.load %arg7[%c2, %c0_67, %c0_68] : memref<24x32x1xf32, #tpu.memory_space<vmem>>, vector<1x32x1xf32>
    %250 = vector.shape_cast %249 : vector<1x32x1xf32> to vector<32x1xf32>
    %251 = vector.broadcast %250 : vector<32x1xf32> to vector<32x16xf32>
    %252 = arith.mulf %245, %251 : vector<32x16xf32>
    %253 = arith.addf %242, %252 : vector<32x16xf32>
    %c14 = arith.constant 14 : index
    %c0_69 = arith.constant 0 : index
    %c0_70 = arith.constant 0 : index
    %254 = vector.load %arg7[%c14, %c0_69, %c0_70] : memref<24x32x1xf32, #tpu.memory_space<vmem>>, vector<1x32x1xf32>
    %255 = vector.shape_cast %254 : vector<1x32x1xf32> to vector<32x1xf32>
    %256 = vector.broadcast %255 : vector<32x1xf32> to vector<32x16xf32>
    %257 = arith.mulf %248, %256 : vector<32x16xf32>
    %258 = arith.addf %253, %257 : vector<32x16xf32>
    %259 = arith.mulf %245, %228 : vector<32x16xf32>
    %260 = arith.mulf %248, %227 : vector<32x16xf32>
    %261 = arith.addf %259, %260 : vector<32x16xf32>
    %262 = arith.mulf %248, %228 : vector<32x16xf32>
    %263 = arith.mulf %245, %227 : vector<32x16xf32>
    %264 = arith.subf %262, %263 : vector<32x16xf32>
    %c3 = arith.constant 3 : index
    %c0_71 = arith.constant 0 : index
    %c0_72 = arith.constant 0 : index
    %265 = vector.load %arg7[%c3, %c0_71, %c0_72] : memref<24x32x1xf32, #tpu.memory_space<vmem>>, vector<1x32x1xf32>
    %266 = vector.shape_cast %265 : vector<1x32x1xf32> to vector<32x1xf32>
    %267 = vector.broadcast %266 : vector<32x1xf32> to vector<32x16xf32>
    %268 = arith.mulf %261, %267 : vector<32x16xf32>
    %269 = arith.addf %258, %268 : vector<32x16xf32>
    %c15 = arith.constant 15 : index
    %c0_73 = arith.constant 0 : index
    %c0_74 = arith.constant 0 : index
    %270 = vector.load %arg7[%c15, %c0_73, %c0_74] : memref<24x32x1xf32, #tpu.memory_space<vmem>>, vector<1x32x1xf32>
    %271 = vector.shape_cast %270 : vector<1x32x1xf32> to vector<32x1xf32>
    %272 = vector.broadcast %271 : vector<32x1xf32> to vector<32x16xf32>
    %273 = arith.mulf %264, %272 : vector<32x16xf32>
    %274 = arith.addf %269, %273 : vector<32x16xf32>
    %275 = arith.mulf %261, %228 : vector<32x16xf32>
    %276 = arith.mulf %264, %227 : vector<32x16xf32>
    %277 = arith.addf %275, %276 : vector<32x16xf32>
    %278 = arith.mulf %264, %228 : vector<32x16xf32>
    %279 = arith.mulf %261, %227 : vector<32x16xf32>
    %280 = arith.subf %278, %279 : vector<32x16xf32>
    %c4 = arith.constant 4 : index
    %c0_75 = arith.constant 0 : index
    %c0_76 = arith.constant 0 : index
    %281 = vector.load %arg7[%c4, %c0_75, %c0_76] : memref<24x32x1xf32, #tpu.memory_space<vmem>>, vector<1x32x1xf32>
    %282 = vector.shape_cast %281 : vector<1x32x1xf32> to vector<32x1xf32>
    %283 = vector.broadcast %282 : vector<32x1xf32> to vector<32x16xf32>
    %284 = arith.mulf %277, %283 : vector<32x16xf32>
    %285 = arith.addf %274, %284 : vector<32x16xf32>
    %c16 = arith.constant 16 : index
    %c0_77 = arith.constant 0 : index
    %c0_78 = arith.constant 0 : index
    %286 = vector.load %arg7[%c16, %c0_77, %c0_78] : memref<24x32x1xf32, #tpu.memory_space<vmem>>, vector<1x32x1xf32>
    %287 = vector.shape_cast %286 : vector<1x32x1xf32> to vector<32x1xf32>
    %288 = vector.broadcast %287 : vector<32x1xf32> to vector<32x16xf32>
    %289 = arith.mulf %280, %288 : vector<32x16xf32>
    %290 = arith.addf %285, %289 : vector<32x16xf32>
    %291 = arith.mulf %277, %228 : vector<32x16xf32>
    %292 = arith.mulf %280, %227 : vector<32x16xf32>
    %293 = arith.addf %291, %292 : vector<32x16xf32>
    %294 = arith.mulf %280, %228 : vector<32x16xf32>
    %295 = arith.mulf %277, %227 : vector<32x16xf32>
    %296 = arith.subf %294, %295 : vector<32x16xf32>
    %c5 = arith.constant 5 : index
    %c0_79 = arith.constant 0 : index
    %c0_80 = arith.constant 0 : index
    %297 = vector.load %arg7[%c5, %c0_79, %c0_80] : memref<24x32x1xf32, #tpu.memory_space<vmem>>, vector<1x32x1xf32>
    %298 = vector.shape_cast %297 : vector<1x32x1xf32> to vector<32x1xf32>
    %299 = vector.broadcast %298 : vector<32x1xf32> to vector<32x16xf32>
    %300 = arith.mulf %293, %299 : vector<32x16xf32>
    %301 = arith.addf %290, %300 : vector<32x16xf32>
    %c17 = arith.constant 17 : index
    %c0_81 = arith.constant 0 : index
    %c0_82 = arith.constant 0 : index
    %302 = vector.load %arg7[%c17, %c0_81, %c0_82] : memref<24x32x1xf32, #tpu.memory_space<vmem>>, vector<1x32x1xf32>
    %303 = vector.shape_cast %302 : vector<1x32x1xf32> to vector<32x1xf32>
    %304 = vector.broadcast %303 : vector<32x1xf32> to vector<32x16xf32>
    %305 = arith.mulf %296, %304 : vector<32x16xf32>
    %306 = arith.addf %301, %305 : vector<32x16xf32>
    %307 = arith.mulf %293, %228 : vector<32x16xf32>
    %308 = arith.mulf %296, %227 : vector<32x16xf32>
    %309 = arith.addf %307, %308 : vector<32x16xf32>
    %310 = arith.mulf %296, %228 : vector<32x16xf32>
    %311 = arith.mulf %293, %227 : vector<32x16xf32>
    %312 = arith.subf %310, %311 : vector<32x16xf32>
    %c6 = arith.constant 6 : index
    %c0_83 = arith.constant 0 : index
    %c0_84 = arith.constant 0 : index
    %313 = vector.load %arg7[%c6, %c0_83, %c0_84] : memref<24x32x1xf32, #tpu.memory_space<vmem>>, vector<1x32x1xf32>
    %314 = vector.shape_cast %313 : vector<1x32x1xf32> to vector<32x1xf32>
    %315 = vector.broadcast %314 : vector<32x1xf32> to vector<32x16xf32>
    %316 = arith.mulf %309, %315 : vector<32x16xf32>
    %317 = arith.addf %306, %316 : vector<32x16xf32>
    %c18 = arith.constant 18 : index
    %c0_85 = arith.constant 0 : index
    %c0_86 = arith.constant 0 : index
    %318 = vector.load %arg7[%c18, %c0_85, %c0_86] : memref<24x32x1xf32, #tpu.memory_space<vmem>>, vector<1x32x1xf32>
    %319 = vector.shape_cast %318 : vector<1x32x1xf32> to vector<32x1xf32>
    %320 = vector.broadcast %319 : vector<32x1xf32> to vector<32x16xf32>
    %321 = arith.mulf %312, %320 : vector<32x16xf32>
    %322 = arith.addf %317, %321 : vector<32x16xf32>
    %323 = arith.mulf %309, %228 : vector<32x16xf32>
    %324 = arith.mulf %312, %227 : vector<32x16xf32>
    %325 = arith.addf %323, %324 : vector<32x16xf32>
    %326 = arith.mulf %312, %228 : vector<32x16xf32>
    %327 = arith.mulf %309, %227 : vector<32x16xf32>
    %328 = arith.subf %326, %327 : vector<32x16xf32>
    %c7 = arith.constant 7 : index
    %c0_87 = arith.constant 0 : index
    %c0_88 = arith.constant 0 : index
    %329 = vector.load %arg7[%c7, %c0_87, %c0_88] : memref<24x32x1xf32, #tpu.memory_space<vmem>>, vector<1x32x1xf32>
    %330 = vector.shape_cast %329 : vector<1x32x1xf32> to vector<32x1xf32>
    %331 = vector.broadcast %330 : vector<32x1xf32> to vector<32x16xf32>
    %332 = arith.mulf %325, %331 : vector<32x16xf32>
    %333 = arith.addf %322, %332 : vector<32x16xf32>
    %c19 = arith.constant 19 : index
    %c0_89 = arith.constant 0 : index
    %c0_90 = arith.constant 0 : index
    %334 = vector.load %arg7[%c19, %c0_89, %c0_90] : memref<24x32x1xf32, #tpu.memory_space<vmem>>, vector<1x32x1xf32>
    %335 = vector.shape_cast %334 : vector<1x32x1xf32> to vector<32x1xf32>
    %336 = vector.broadcast %335 : vector<32x1xf32> to vector<32x16xf32>
    %337 = arith.mulf %328, %336 : vector<32x16xf32>
    %338 = arith.addf %333, %337 : vector<32x16xf32>
    %339 = arith.mulf %325, %228 : vector<32x16xf32>
    %340 = arith.mulf %328, %227 : vector<32x16xf32>
    %341 = arith.addf %339, %340 : vector<32x16xf32>
    %342 = arith.mulf %328, %228 : vector<32x16xf32>
    %343 = arith.mulf %325, %227 : vector<32x16xf32>
    %344 = arith.subf %342, %343 : vector<32x16xf32>
    %c8 = arith.constant 8 : index
    %c0_91 = arith.constant 0 : index
    %c0_92 = arith.constant 0 : index
    %345 = vector.load %arg7[%c8, %c0_91, %c0_92] : memref<24x32x1xf32, #tpu.memory_space<vmem>>, vector<1x32x1xf32>
    %346 = vector.shape_cast %345 : vector<1x32x1xf32> to vector<32x1xf32>
    %347 = vector.broadcast %346 : vector<32x1xf32> to vector<32x16xf32>
    %348 = arith.mulf %341, %347 : vector<32x16xf32>
    %349 = arith.addf %338, %348 : vector<32x16xf32>
    %c20 = arith.constant 20 : index
    %c0_93 = arith.constant 0 : index
    %c0_94 = arith.constant 0 : index
    %350 = vector.load %arg7[%c20, %c0_93, %c0_94] : memref<24x32x1xf32, #tpu.memory_space<vmem>>, vector<1x32x1xf32>
    %351 = vector.shape_cast %350 : vector<1x32x1xf32> to vector<32x1xf32>
    %352 = vector.broadcast %351 : vector<32x1xf32> to vector<32x16xf32>
    %353 = arith.mulf %344, %352 : vector<32x16xf32>
    %354 = arith.addf %349, %353 : vector<32x16xf32>
    %355 = arith.mulf %341, %228 : vector<32x16xf32>
    %356 = arith.mulf %344, %227 : vector<32x16xf32>
    %357 = arith.addf %355, %356 : vector<32x16xf32>
    %358 = arith.mulf %344, %228 : vector<32x16xf32>
    %359 = arith.mulf %341, %227 : vector<32x16xf32>
    %360 = arith.subf %358, %359 : vector<32x16xf32>
    %c9 = arith.constant 9 : index
    %c0_95 = arith.constant 0 : index
    %c0_96 = arith.constant 0 : index
    %361 = vector.load %arg7[%c9, %c0_95, %c0_96] : memref<24x32x1xf32, #tpu.memory_space<vmem>>, vector<1x32x1xf32>
    %362 = vector.shape_cast %361 : vector<1x32x1xf32> to vector<32x1xf32>
    %363 = vector.broadcast %362 : vector<32x1xf32> to vector<32x16xf32>
    %364 = arith.mulf %357, %363 : vector<32x16xf32>
    %365 = arith.addf %354, %364 : vector<32x16xf32>
    %c21 = arith.constant 21 : index
    %c0_97 = arith.constant 0 : index
    %c0_98 = arith.constant 0 : index
    %366 = vector.load %arg7[%c21, %c0_97, %c0_98] : memref<24x32x1xf32, #tpu.memory_space<vmem>>, vector<1x32x1xf32>
    %367 = vector.shape_cast %366 : vector<1x32x1xf32> to vector<32x1xf32>
    %368 = vector.broadcast %367 : vector<32x1xf32> to vector<32x16xf32>
    %369 = arith.mulf %360, %368 : vector<32x16xf32>
    %370 = arith.addf %365, %369 : vector<32x16xf32>
    %371 = arith.mulf %357, %228 : vector<32x16xf32>
    %372 = arith.mulf %360, %227 : vector<32x16xf32>
    %373 = arith.addf %371, %372 : vector<32x16xf32>
    %374 = arith.mulf %360, %228 : vector<32x16xf32>
    %375 = arith.mulf %357, %227 : vector<32x16xf32>
    %376 = arith.subf %374, %375 : vector<32x16xf32>
    %c10 = arith.constant 10 : index
    %c0_99 = arith.constant 0 : index
    %c0_100 = arith.constant 0 : index
    %377 = vector.load %arg7[%c10, %c0_99, %c0_100] : memref<24x32x1xf32, #tpu.memory_space<vmem>>, vector<1x32x1xf32>
    %378 = vector.shape_cast %377 : vector<1x32x1xf32> to vector<32x1xf32>
    %379 = vector.broadcast %378 : vector<32x1xf32> to vector<32x16xf32>
    %380 = arith.mulf %373, %379 : vector<32x16xf32>
    %381 = arith.addf %370, %380 : vector<32x16xf32>
    %c22 = arith.constant 22 : index
    %c0_101 = arith.constant 0 : index
    %c0_102 = arith.constant 0 : index
    %382 = vector.load %arg7[%c22, %c0_101, %c0_102] : memref<24x32x1xf32, #tpu.memory_space<vmem>>, vector<1x32x1xf32>
    %383 = vector.shape_cast %382 : vector<1x32x1xf32> to vector<32x1xf32>
    %384 = vector.broadcast %383 : vector<32x1xf32> to vector<32x16xf32>
    %385 = arith.mulf %376, %384 : vector<32x16xf32>
    %386 = arith.addf %381, %385 : vector<32x16xf32>
    %387 = arith.mulf %373, %228 : vector<32x16xf32>
    %388 = arith.mulf %376, %227 : vector<32x16xf32>
    %389 = arith.addf %387, %388 : vector<32x16xf32>
    %390 = arith.mulf %376, %228 : vector<32x16xf32>
    %391 = arith.mulf %373, %227 : vector<32x16xf32>
    %392 = arith.subf %390, %391 : vector<32x16xf32>
    %c11 = arith.constant 11 : index
    %c0_103 = arith.constant 0 : index
    %c0_104 = arith.constant 0 : index
    %393 = vector.load %arg7[%c11, %c0_103, %c0_104] : memref<24x32x1xf32, #tpu.memory_space<vmem>>, vector<1x32x1xf32>
    %394 = vector.shape_cast %393 : vector<1x32x1xf32> to vector<32x1xf32>
    %395 = vector.broadcast %394 : vector<32x1xf32> to vector<32x16xf32>
    %396 = arith.mulf %389, %395 : vector<32x16xf32>
    %397 = arith.addf %386, %396 : vector<32x16xf32>
    %c23 = arith.constant 23 : index
    %c0_105 = arith.constant 0 : index
    %c0_106 = arith.constant 0 : index
    %398 = vector.load %arg7[%c23, %c0_105, %c0_106] : memref<24x32x1xf32, #tpu.memory_space<vmem>>, vector<1x32x1xf32>
    %399 = vector.shape_cast %398 : vector<1x32x1xf32> to vector<32x1xf32>
    %400 = vector.broadcast %399 : vector<32x1xf32> to vector<32x16xf32>
    %401 = arith.mulf %392, %400 : vector<32x16xf32>
    %402 = arith.addf %397, %401 : vector<32x16xf32>
    %403 = arith.addf %402, %62 : vector<32x16xf32>
    %cst_107 = arith.constant dense<0.000000e+00> : vector<32x16xf32>
    %404 = tpu.matmul %59, %65, %cst_107 {dimension_numbers = #tpu.dot_dimension_numbers<[1], [0], [0], [1], [0, 0, 1, 1], [], []>} : vector<32x32xf32>, vector<32x16xf32>, vector<32x16xf32> -> vector<32x16xf32>
    %405 = vector.broadcast %60 : vector<32x1xf32> to vector<32x16xf32>
    %406 = arith.addf %404, %405 : vector<32x16xf32>
    %cst_108 = arith.constant 0.000000e+00 : f32
    %407 = vector.broadcast %cst_108 : f32 to vector<32x16xf32>
    %408 = vector.broadcast %7 : vector<32x1xf32> to vector<32x16xf32>
    %409 = arith.mulf %406, %408 : vector<32x16xf32>
    %cst_109 = arith.constant dense<0.000000e+00> : vector<16x16xf32>
    %410 = tpu.matmul %409, %403, %cst_109 {dimension_numbers = #tpu.dot_dimension_numbers<[0], [0], [1], [1], [0, 1, 1, 1], [], []>} : vector<32x16xf32>, vector<32x16xf32>, vector<16x16xf32> -> vector<16x16xf32>
    %cst_110 = arith.constant 2.000000e+00 : f32
    %411 = vector.broadcast %cst_110 : f32 to vector<16x16xf32>
    %412 = arith.mulf %410, %411 : vector<16x16xf32>
    %cst_111 = arith.constant dense<0xFF800000> : vector<16xf32>
    %413 = vector.multi_reduction <maximumf>, %412, %cst_111 [1] : vector<16x16xf32> to vector<16xf32>
    %414 = vector.shape_cast %413 : vector<16xf32> to vector<16x1xf32>
    %415 = vector.broadcast %414 : vector<16x1xf32> to vector<16x16xf32>
    %416 = arith.subf %412, %415 : vector<16x16xf32>
    %417 = math.exp %416 : vector<16x16xf32>
    %cst_112 = arith.constant dense<0.000000e+00> : vector<16xf32>
    %418 = vector.multi_reduction <add>, %417, %cst_112 [1] : vector<16x16xf32> to vector<16xf32>
    %419 = vector.shape_cast %418 : vector<16xf32> to vector<16x1xf32>
    %420 = tpu.reciprocal %419 {approx = true} : vector<16x1xf32> -> vector<16x1xf32>
    %421 = vector.broadcast %420 : vector<16x1xf32> to vector<16x16xf32>
    %422 = arith.mulf %417, %421 : vector<16x16xf32>
    %423 = vector.broadcast %7 : vector<32x1xf32> to vector<32x16xf32>
    %424 = arith.mulf %403, %423 : vector<32x16xf32>
    %cst_113 = arith.constant dense<0.000000e+00> : vector<32x16xf32>
    %425 = tpu.matmul %424, %422, %cst_113 {dimension_numbers = #tpu.dot_dimension_numbers<[1], [1], [0], [0], [0, 0, 1, 0], [], []>} : vector<32x16xf32>, vector<16x16xf32>, vector<32x16xf32> -> vector<32x16xf32>
    %426 = arith.addf %407, %425 : vector<32x16xf32>
    %427 = vector.broadcast %14 : vector<32x1xf32> to vector<32x16xf32>
    %428 = arith.mulf %406, %427 : vector<32x16xf32>
    %cst_114 = arith.constant dense<0.000000e+00> : vector<16x16xf32>
    %429 = tpu.matmul %428, %403, %cst_114 {dimension_numbers = #tpu.dot_dimension_numbers<[0], [0], [1], [1], [0, 1, 1, 1], [], []>} : vector<32x16xf32>, vector<32x16xf32>, vector<16x16xf32> -> vector<16x16xf32>
    %cst_115 = arith.constant 2.000000e+00 : f32
    %430 = vector.broadcast %cst_115 : f32 to vector<16x16xf32>
    %431 = arith.mulf %429, %430 : vector<16x16xf32>
    %cst_116 = arith.constant dense<0xFF800000> : vector<16xf32>
    %432 = vector.multi_reduction <maximumf>, %431, %cst_116 [1] : vector<16x16xf32> to vector<16xf32>
    %433 = vector.shape_cast %432 : vector<16xf32> to vector<16x1xf32>
    %434 = vector.broadcast %433 : vector<16x1xf32> to vector<16x16xf32>
    %435 = arith.subf %431, %434 : vector<16x16xf32>
    %436 = math.exp %435 : vector<16x16xf32>
    %cst_117 = arith.constant dense<0.000000e+00> : vector<16xf32>
    %437 = vector.multi_reduction <add>, %436, %cst_117 [1] : vector<16x16xf32> to vector<16xf32>
    %438 = vector.shape_cast %437 : vector<16xf32> to vector<16x1xf32>
    %439 = tpu.reciprocal %438 {approx = true} : vector<16x1xf32> -> vector<16x1xf32>
    %440 = vector.broadcast %439 : vector<16x1xf32> to vector<16x16xf32>
    %441 = arith.mulf %436, %440 : vector<16x16xf32>
    %442 = vector.broadcast %14 : vector<32x1xf32> to vector<32x16xf32>
    %443 = arith.mulf %403, %442 : vector<32x16xf32>
    %cst_118 = arith.constant dense<0.000000e+00> : vector<32x16xf32>
    %444 = tpu.matmul %443, %441, %cst_118 {dimension_numbers = #tpu.dot_dimension_numbers<[1], [1], [0], [0], [0, 0, 1, 0], [], []>} : vector<32x16xf32>, vector<16x16xf32>, vector<32x16xf32> -> vector<32x16xf32>
    %445 = arith.addf %426, %444 : vector<32x16xf32>
    %446 = vector.broadcast %21 : vector<32x1xf32> to vector<32x16xf32>
    %447 = arith.mulf %406, %446 : vector<32x16xf32>
    %cst_119 = arith.constant dense<0.000000e+00> : vector<16x16xf32>
    %448 = tpu.matmul %447, %403, %cst_119 {dimension_numbers = #tpu.dot_dimension_numbers<[0], [0], [1], [1], [0, 1, 1, 1], [], []>} : vector<32x16xf32>, vector<32x16xf32>, vector<16x16xf32> -> vector<16x16xf32>
    %cst_120 = arith.constant 2.000000e+00 : f32
    %449 = vector.broadcast %cst_120 : f32 to vector<16x16xf32>
    %450 = arith.mulf %448, %449 : vector<16x16xf32>
    %cst_121 = arith.constant dense<0xFF800000> : vector<16xf32>
    %451 = vector.multi_reduction <maximumf>, %450, %cst_121 [1] : vector<16x16xf32> to vector<16xf32>
    %452 = vector.shape_cast %451 : vector<16xf32> to vector<16x1xf32>
    %453 = vector.broadcast %452 : vector<16x1xf32> to vector<16x16xf32>
    %454 = arith.subf %450, %453 : vector<16x16xf32>
    %455 = math.exp %454 : vector<16x16xf32>
    %cst_122 = arith.constant dense<0.000000e+00> : vector<16xf32>
    %456 = vector.multi_reduction <add>, %455, %cst_122 [1] : vector<16x16xf32> to vector<16xf32>
    %457 = vector.shape_cast %456 : vector<16xf32> to vector<16x1xf32>
    %458 = tpu.reciprocal %457 {approx = true} : vector<16x1xf32> -> vector<16x1xf32>
    %459 = vector.broadcast %458 : vector<16x1xf32> to vector<16x16xf32>
    %460 = arith.mulf %455, %459 : vector<16x16xf32>
    %461 = vector.broadcast %21 : vector<32x1xf32> to vector<32x16xf32>
    %462 = arith.mulf %403, %461 : vector<32x16xf32>
    %cst_123 = arith.constant dense<0.000000e+00> : vector<32x16xf32>
    %463 = tpu.matmul %462, %460, %cst_123 {dimension_numbers = #tpu.dot_dimension_numbers<[1], [1], [0], [0], [0, 0, 1, 0], [], []>} : vector<32x16xf32>, vector<16x16xf32>, vector<32x16xf32> -> vector<32x16xf32>
    %464 = arith.addf %445, %463 : vector<32x16xf32>
    %465 = vector.broadcast %28 : vector<32x1xf32> to vector<32x16xf32>
    %466 = arith.mulf %406, %465 : vector<32x16xf32>
    %cst_124 = arith.constant dense<0.000000e+00> : vector<16x16xf32>
    %467 = tpu.matmul %466, %403, %cst_124 {dimension_numbers = #tpu.dot_dimension_numbers<[0], [0], [1], [1], [0, 1, 1, 1], [], []>} : vector<32x16xf32>, vector<32x16xf32>, vector<16x16xf32> -> vector<16x16xf32>
    %cst_125 = arith.constant 2.000000e+00 : f32
    %468 = vector.broadcast %cst_125 : f32 to vector<16x16xf32>
    %469 = arith.mulf %467, %468 : vector<16x16xf32>
    %cst_126 = arith.constant dense<0xFF800000> : vector<16xf32>
    %470 = vector.multi_reduction <maximumf>, %469, %cst_126 [1] : vector<16x16xf32> to vector<16xf32>
    %471 = vector.shape_cast %470 : vector<16xf32> to vector<16x1xf32>
    %472 = vector.broadcast %471 : vector<16x1xf32> to vector<16x16xf32>
    %473 = arith.subf %469, %472 : vector<16x16xf32>
    %474 = math.exp %473 : vector<16x16xf32>
    %cst_127 = arith.constant dense<0.000000e+00> : vector<16xf32>
    %475 = vector.multi_reduction <add>, %474, %cst_127 [1] : vector<16x16xf32> to vector<16xf32>
    %476 = vector.shape_cast %475 : vector<16xf32> to vector<16x1xf32>
    %477 = tpu.reciprocal %476 {approx = true} : vector<16x1xf32> -> vector<16x1xf32>
    %478 = vector.broadcast %477 : vector<16x1xf32> to vector<16x16xf32>
    %479 = arith.mulf %474, %478 : vector<16x16xf32>
    %480 = vector.broadcast %28 : vector<32x1xf32> to vector<32x16xf32>
    %481 = arith.mulf %403, %480 : vector<32x16xf32>
    %cst_128 = arith.constant dense<0.000000e+00> : vector<32x16xf32>
    %482 = tpu.matmul %481, %479, %cst_128 {dimension_numbers = #tpu.dot_dimension_numbers<[1], [1], [0], [0], [0, 0, 1, 0], [], []>} : vector<32x16xf32>, vector<16x16xf32>, vector<32x16xf32> -> vector<32x16xf32>
    %483 = arith.addf %464, %482 : vector<32x16xf32>
    %484 = vector.broadcast %35 : vector<32x1xf32> to vector<32x16xf32>
    %485 = arith.mulf %406, %484 : vector<32x16xf32>
    %cst_129 = arith.constant dense<0.000000e+00> : vector<16x16xf32>
    %486 = tpu.matmul %485, %403, %cst_129 {dimension_numbers = #tpu.dot_dimension_numbers<[0], [0], [1], [1], [0, 1, 1, 1], [], []>} : vector<32x16xf32>, vector<32x16xf32>, vector<16x16xf32> -> vector<16x16xf32>
    %cst_130 = arith.constant 2.000000e+00 : f32
    %487 = vector.broadcast %cst_130 : f32 to vector<16x16xf32>
    %488 = arith.mulf %486, %487 : vector<16x16xf32>
    %cst_131 = arith.constant dense<0xFF800000> : vector<16xf32>
    %489 = vector.multi_reduction <maximumf>, %488, %cst_131 [1] : vector<16x16xf32> to vector<16xf32>
    %490 = vector.shape_cast %489 : vector<16xf32> to vector<16x1xf32>
    %491 = vector.broadcast %490 : vector<16x1xf32> to vector<16x16xf32>
    %492 = arith.subf %488, %491 : vector<16x16xf32>
    %493 = math.exp %492 : vector<16x16xf32>
    %cst_132 = arith.constant dense<0.000000e+00> : vector<16xf32>
    %494 = vector.multi_reduction <add>, %493, %cst_132 [1] : vector<16x16xf32> to vector<16xf32>
    %495 = vector.shape_cast %494 : vector<16xf32> to vector<16x1xf32>
    %496 = tpu.reciprocal %495 {approx = true} : vector<16x1xf32> -> vector<16x1xf32>
    %497 = vector.broadcast %496 : vector<16x1xf32> to vector<16x16xf32>
    %498 = arith.mulf %493, %497 : vector<16x16xf32>
    %499 = vector.broadcast %35 : vector<32x1xf32> to vector<32x16xf32>
    %500 = arith.mulf %403, %499 : vector<32x16xf32>
    %cst_133 = arith.constant dense<0.000000e+00> : vector<32x16xf32>
    %501 = tpu.matmul %500, %498, %cst_133 {dimension_numbers = #tpu.dot_dimension_numbers<[1], [1], [0], [0], [0, 0, 1, 0], [], []>} : vector<32x16xf32>, vector<16x16xf32>, vector<32x16xf32> -> vector<32x16xf32>
    %502 = arith.addf %483, %501 : vector<32x16xf32>
    %503 = vector.broadcast %42 : vector<32x1xf32> to vector<32x16xf32>
    %504 = arith.mulf %406, %503 : vector<32x16xf32>
    %cst_134 = arith.constant dense<0.000000e+00> : vector<16x16xf32>
    %505 = tpu.matmul %504, %403, %cst_134 {dimension_numbers = #tpu.dot_dimension_numbers<[0], [0], [1], [1], [0, 1, 1, 1], [], []>} : vector<32x16xf32>, vector<32x16xf32>, vector<16x16xf32> -> vector<16x16xf32>
    %cst_135 = arith.constant 2.000000e+00 : f32
    %506 = vector.broadcast %cst_135 : f32 to vector<16x16xf32>
    %507 = arith.mulf %505, %506 : vector<16x16xf32>
    %cst_136 = arith.constant dense<0xFF800000> : vector<16xf32>
    %508 = vector.multi_reduction <maximumf>, %507, %cst_136 [1] : vector<16x16xf32> to vector<16xf32>
    %509 = vector.shape_cast %508 : vector<16xf32> to vector<16x1xf32>
    %510 = vector.broadcast %509 : vector<16x1xf32> to vector<16x16xf32>
    %511 = arith.subf %507, %510 : vector<16x16xf32>
    %512 = math.exp %511 : vector<16x16xf32>
    %cst_137 = arith.constant dense<0.000000e+00> : vector<16xf32>
    %513 = vector.multi_reduction <add>, %512, %cst_137 [1] : vector<16x16xf32> to vector<16xf32>
    %514 = vector.shape_cast %513 : vector<16xf32> to vector<16x1xf32>
    %515 = tpu.reciprocal %514 {approx = true} : vector<16x1xf32> -> vector<16x1xf32>
    %516 = vector.broadcast %515 : vector<16x1xf32> to vector<16x16xf32>
    %517 = arith.mulf %512, %516 : vector<16x16xf32>
    %518 = vector.broadcast %42 : vector<32x1xf32> to vector<32x16xf32>
    %519 = arith.mulf %403, %518 : vector<32x16xf32>
    %cst_138 = arith.constant dense<0.000000e+00> : vector<32x16xf32>
    %520 = tpu.matmul %519, %517, %cst_138 {dimension_numbers = #tpu.dot_dimension_numbers<[1], [1], [0], [0], [0, 0, 1, 0], [], []>} : vector<32x16xf32>, vector<16x16xf32>, vector<32x16xf32> -> vector<32x16xf32>
    %521 = arith.addf %502, %520 : vector<32x16xf32>
    %522 = vector.broadcast %49 : vector<32x1xf32> to vector<32x16xf32>
    %523 = arith.mulf %406, %522 : vector<32x16xf32>
    %cst_139 = arith.constant dense<0.000000e+00> : vector<16x16xf32>
    %524 = tpu.matmul %523, %403, %cst_139 {dimension_numbers = #tpu.dot_dimension_numbers<[0], [0], [1], [1], [0, 1, 1, 1], [], []>} : vector<32x16xf32>, vector<32x16xf32>, vector<16x16xf32> -> vector<16x16xf32>
    %cst_140 = arith.constant 2.000000e+00 : f32
    %525 = vector.broadcast %cst_140 : f32 to vector<16x16xf32>
    %526 = arith.mulf %524, %525 : vector<16x16xf32>
    %cst_141 = arith.constant dense<0xFF800000> : vector<16xf32>
    %527 = vector.multi_reduction <maximumf>, %526, %cst_141 [1] : vector<16x16xf32> to vector<16xf32>
    %528 = vector.shape_cast %527 : vector<16xf32> to vector<16x1xf32>
    %529 = vector.broadcast %528 : vector<16x1xf32> to vector<16x16xf32>
    %530 = arith.subf %526, %529 : vector<16x16xf32>
    %531 = math.exp %530 : vector<16x16xf32>
    %cst_142 = arith.constant dense<0.000000e+00> : vector<16xf32>
    %532 = vector.multi_reduction <add>, %531, %cst_142 [1] : vector<16x16xf32> to vector<16xf32>
    %533 = vector.shape_cast %532 : vector<16xf32> to vector<16x1xf32>
    %534 = tpu.reciprocal %533 {approx = true} : vector<16x1xf32> -> vector<16x1xf32>
    %535 = vector.broadcast %534 : vector<16x1xf32> to vector<16x16xf32>
    %536 = arith.mulf %531, %535 : vector<16x16xf32>
    %537 = vector.broadcast %49 : vector<32x1xf32> to vector<32x16xf32>
    %538 = arith.mulf %403, %537 : vector<32x16xf32>
    %cst_143 = arith.constant dense<0.000000e+00> : vector<32x16xf32>
    %539 = tpu.matmul %538, %536, %cst_143 {dimension_numbers = #tpu.dot_dimension_numbers<[1], [1], [0], [0], [0, 0, 1, 0], [], []>} : vector<32x16xf32>, vector<16x16xf32>, vector<32x16xf32> -> vector<32x16xf32>
    %540 = arith.addf %521, %539 : vector<32x16xf32>
    %541 = vector.broadcast %56 : vector<32x1xf32> to vector<32x16xf32>
    %542 = arith.mulf %406, %541 : vector<32x16xf32>
    %cst_144 = arith.constant dense<0.000000e+00> : vector<16x16xf32>
    %543 = tpu.matmul %542, %403, %cst_144 {dimension_numbers = #tpu.dot_dimension_numbers<[0], [0], [1], [1], [0, 1, 1, 1], [], []>} : vector<32x16xf32>, vector<32x16xf32>, vector<16x16xf32> -> vector<16x16xf32>
    %cst_145 = arith.constant 2.000000e+00 : f32
    %544 = vector.broadcast %cst_145 : f32 to vector<16x16xf32>
    %545 = arith.mulf %543, %544 : vector<16x16xf32>
    %cst_146 = arith.constant dense<0xFF800000> : vector<16xf32>
    %546 = vector.multi_reduction <maximumf>, %545, %cst_146 [1] : vector<16x16xf32> to vector<16xf32>
    %547 = vector.shape_cast %546 : vector<16xf32> to vector<16x1xf32>
    %548 = vector.broadcast %547 : vector<16x1xf32> to vector<16x16xf32>
    %549 = arith.subf %545, %548 : vector<16x16xf32>
    %550 = math.exp %549 : vector<16x16xf32>
    %cst_147 = arith.constant dense<0.000000e+00> : vector<16xf32>
    %551 = vector.multi_reduction <add>, %550, %cst_147 [1] : vector<16x16xf32> to vector<16xf32>
    %552 = vector.shape_cast %551 : vector<16xf32> to vector<16x1xf32>
    %553 = tpu.reciprocal %552 {approx = true} : vector<16x1xf32> -> vector<16x1xf32>
    %554 = vector.broadcast %553 : vector<16x1xf32> to vector<16x16xf32>
    %555 = arith.mulf %550, %554 : vector<16x16xf32>
    %556 = vector.broadcast %56 : vector<32x1xf32> to vector<32x16xf32>
    %557 = arith.mulf %403, %556 : vector<32x16xf32>
    %cst_148 = arith.constant dense<0.000000e+00> : vector<32x16xf32>
    %558 = tpu.matmul %557, %555, %cst_148 {dimension_numbers = #tpu.dot_dimension_numbers<[1], [1], [0], [0], [0, 0, 1, 0], [], []>} : vector<32x16xf32>, vector<16x16xf32>, vector<32x16xf32> -> vector<32x16xf32>
    %559 = arith.addf %540, %558 : vector<32x16xf32>
    %560 = arith.addf %559, %65 : vector<32x16xf32>
    %c0_149 = arith.constant 0 : index
    %c0_150 = arith.constant 0 : index
    %c0_151 = arith.constant 0 : index
    %561 = vector.load %arg14[%c0_149, %c0_150, %c0_151] : memref<1x32x16xf32, #tpu.memory_space<vmem>>, vector<1x32x16xf32>
    %562 = vector.shape_cast %561 : vector<1x32x16xf32> to vector<32x16xf32>
    %563 = vector.shape_cast %560 : vector<32x16xf32> to vector<1x32x16xf32>
    tpu.vector_store %arg14[%c0_149, %c0_150, %c0_151], %563 {strides = array<i32>} : memref<1x32x16xf32, #tpu.memory_space<vmem>>, vector<1x32x16xf32>,
    %564 = tpu.transpose %560, [1, 0] : vector<32x16xf32> -> vector<16x32xf32>
    %565 = arith.index_cast %arg0 : i32 to index
    %c0_152 = arith.constant 0 : index
    %c0_153 = arith.constant 0 : index
    %566 = vector.load %arg16[%565, %c0_152, %c0_153] : memref<2x16x32xf32, #tpu.memory_space<vmem>>, vector<1x16x32xf32>
    %567 = vector.shape_cast %566 : vector<1x16x32xf32> to vector<16x32xf32>
    %568 = vector.shape_cast %564 : vector<16x32xf32> to vector<1x16x32xf32>
    tpu.vector_store %arg16[%565, %c0_152, %c0_153], %568 {strides = array<i32>} : memref<2x16x32xf32, #tpu.memory_space<vmem>>, vector<1x16x32xf32>,
    %c1_i32 = arith.constant 1 : i32
    %569 = arith.cmpi eq, %arg0, %c1_i32 : i32
    %570 = arith.extui %569 : i1 to i32
    %c0_i32_154 = arith.constant 0 : i32
    %571 = arith.cmpi ne, %570, %c0_i32_154 : i32
    scf.if %571 {
      %c0_155 = arith.constant 0 : index
      %c0_156 = arith.constant 0 : index
      %c0_157 = arith.constant 0 : index
      %572 = vector.load %arg16[%c0_155, %c0_156, %c0_157] : memref<2x16x32xf32, #tpu.memory_space<vmem>>, vector<1x16x32xf32>
      %573 = vector.shape_cast %572 : vector<1x16x32xf32> to vector<16x32xf32>
      %c1_158 = arith.constant 1 : index
      %c0_159 = arith.constant 0 : index
      %c0_160 = arith.constant 0 : index
      %574 = vector.load %arg16[%c1_158, %c0_159, %c0_160] : memref<2x16x32xf32, #tpu.memory_space<vmem>>, vector<1x16x32xf32>
      %575 = vector.shape_cast %574 : vector<1x16x32xf32> to vector<16x32xf32>
      %576 = tpu.concatenate %573, %575 in 0 : vector<16x32xf32>, vector<16x32xf32> -> vector<32x32xf32>
      %c0_161 = arith.constant 0 : index
      %c0_162 = arith.constant 0 : index
      %577 = vector.load %arg8[%c0_161, %c0_162] : memref<32x32xf32, #tpu.memory_space<vmem>>, vector<32x32xf32>
      %cst_163 = arith.constant dense<0.000000e+00> : vector<32x32xf32>
      %578 = tpu.matmul %576, %577, %cst_163 {dimension_numbers = #tpu.dot_dimension_numbers<[1], [0], [0], [1], [0, 0, 1, 1], [], []>} : vector<32x32xf32>, vector<32x32xf32>, vector<32x32xf32> -> vector<32x32xf32>
      %cst_164 = arith.constant dense<0.000000e+00> : vector<32xf32>
      %579 = vector.multi_reduction <add>, %578, %cst_164 [0] : vector<32x32xf32> to vector<32xf32>
      %580 = vector.shape_cast %579 : vector<32xf32> to vector<1x32xf32>
      %cst_165 = arith.constant 3.200000e+01 : f32
      %581 = vector.broadcast %cst_165 : f32 to vector<1x32xf32>
      %582 = arith.divf %580, %581 : vector<1x32xf32>
      %583 = vector.broadcast %582 : vector<1x32xf32> to vector<32x32xf32>
      %584 = arith.subf %578, %583 : vector<32x32xf32>
      %585 = arith.mulf %584, %584 : vector<32x32xf32>
      %cst_166 = arith.constant dense<0.000000e+00> : vector<32xf32>
      %586 = vector.multi_reduction <add>, %585, %cst_166 [0] : vector<32x32xf32> to vector<32xf32>
      %587 = vector.shape_cast %586 : vector<32xf32> to vector<1x32xf32>
      %cst_167 = arith.constant 3.200000e+01 : f32
      %588 = vector.broadcast %cst_167 : f32 to vector<1x32xf32>
      %589 = arith.divf %587, %588 : vector<1x32xf32>
      %590 = vector.broadcast %582 : vector<1x32xf32> to vector<32x32xf32>
      %591 = arith.subf %578, %590 : vector<32x32xf32>
      %cst_168 = arith.constant 9.99999974E-6 : f32
      %592 = vector.broadcast %cst_168 : f32 to vector<1x32xf32>
      %593 = arith.addf %589, %592 : vector<1x32xf32>
      %594 = math.rsqrt %593 : vector<1x32xf32>
      %595 = vector.broadcast %594 : vector<1x32xf32> to vector<32x32xf32>
      %596 = arith.mulf %591, %595 : vector<32x32xf32>
      %c0_169 = arith.constant 0 : index
      %c0_170 = arith.constant 0 : index
      %597 = vector.load %arg9[%c0_169, %c0_170] : memref<1x32xf32, #tpu.memory_space<vmem>>, vector<1x32xf32>
      %598 = vector.broadcast %597 : vector<1x32xf32> to vector<32x32xf32>
      %599 = arith.mulf %596, %598 : vector<32x32xf32>
      %c0_171 = arith.constant 0 : index
      %c0_172 = arith.constant 0 : index
      %600 = vector.load %arg10[%c0_171, %c0_172] : memref<1x32xf32, #tpu.memory_space<vmem>>, vector<1x32xf32>
      %601 = vector.broadcast %600 : vector<1x32xf32> to vector<32x32xf32>
      %602 = arith.addf %599, %601 : vector<32x32xf32>
      %cst_173 = arith.constant 0.000000e+00 : f32
      %603 = vector.broadcast %cst_173 : f32 to vector<32x32xf32>
      %604 = arith.cmpf ogt, %602, %603 : vector<32x32xf32>
      %cst_174 = arith.constant 2.000000e-01 : f32
      %605 = vector.broadcast %cst_174 : f32 to vector<32x32xf32>
      %606 = arith.mulf %605, %602 : vector<32x32xf32>
      %607 = arith.select %604, %602, %606 : vector<32x32xi1>, vector<32x32xf32>
      %c0_175 = arith.constant 0 : index
      %c0_176 = arith.constant 0 : index
      %608 = vector.load %arg11[%c0_175, %c0_176] : memref<32x3xf32, #tpu.memory_space<vmem>>, vector<32x3xf32>
      %cst_177 = arith.constant dense<0.000000e+00> : vector<32x3xf32>
      %609 = tpu.matmul %607, %608, %cst_177 {dimension_numbers = #tpu.dot_dimension_numbers<[1], [0], [0], [1], [0, 0, 1, 1], [], []>} : vector<32x32xf32>, vector<32x3xf32>, vector<32x3xf32> -> vector<32x3xf32>
      %cst_178 = arith.constant dense<0.000000e+00> : vector<3xf32>
      %610 = vector.multi_reduction <add>, %609, %cst_178 [0] : vector<32x3xf32> to vector<3xf32>
      %611 = vector.shape_cast %610 : vector<3xf32> to vector<1x3xf32>
      %cst_179 = arith.constant 3.200000e+01 : f32
      %612 = vector.broadcast %cst_179 : f32 to vector<1x3xf32>
      %613 = arith.divf %611, %612 : vector<1x3xf32>
      %614 = vector.broadcast %613 : vector<1x3xf32> to vector<32x3xf32>
      %615 = arith.subf %609, %614 : vector<32x3xf32>
      %616 = arith.mulf %615, %615 : vector<32x3xf32>
      %cst_180 = arith.constant dense<0.000000e+00> : vector<3xf32>
      %617 = vector.multi_reduction <add>, %616, %cst_180 [0] : vector<32x3xf32> to vector<3xf32>
      %618 = vector.shape_cast %617 : vector<3xf32> to vector<1x3xf32>
      %cst_181 = arith.constant 3.200000e+01 : f32
      %619 = vector.broadcast %cst_181 : f32 to vector<1x3xf32>
      %620 = arith.divf %618, %619 : vector<1x3xf32>
      %621 = vector.broadcast %613 : vector<1x3xf32> to vector<32x3xf32>
      %622 = arith.subf %609, %621 : vector<32x3xf32>
      %cst_182 = arith.constant 9.99999974E-6 : f32
      %623 = vector.broadcast %cst_182 : f32 to vector<1x3xf32>
      %624 = arith.addf %620, %623 : vector<1x3xf32>
      %625 = math.rsqrt %624 : vector<1x3xf32>
      %626 = vector.broadcast %625 : vector<1x3xf32> to vector<32x3xf32>
      %627 = arith.mulf %622, %626 : vector<32x3xf32>
      %c0_183 = arith.constant 0 : index
      %c0_184 = arith.constant 0 : index
      %628 = vector.load %arg12[%c0_183, %c0_184] : memref<1x3xf32, #tpu.memory_space<vmem>>, vector<1x3xf32>
      %629 = vector.broadcast %628 : vector<1x3xf32> to vector<32x3xf32>
      %630 = arith.mulf %627, %629 : vector<32x3xf32>
      %c0_185 = arith.constant 0 : index
      %c0_186 = arith.constant 0 : index
      %631 = vector.load %arg13[%c0_185, %c0_186] : memref<1x3xf32, #tpu.memory_space<vmem>>, vector<1x3xf32>
      %632 = vector.broadcast %631 : vector<1x3xf32> to vector<32x3xf32>
      %633 = arith.addf %630, %632 : vector<32x3xf32>
      %cst_187 = arith.constant 0.000000e+00 : f32
      %634 = vector.broadcast %cst_187 : f32 to vector<32x3xf32>
      %635 = arith.cmpf ogt, %633, %634 : vector<32x3xf32>
      %cst_188 = arith.constant 2.000000e-01 : f32
      %636 = vector.broadcast %cst_188 : f32 to vector<32x3xf32>
      %637 = arith.mulf %636, %633 : vector<32x3xf32>
      %638 = arith.select %635, %633, %637 : vector<32x3xi1>, vector<32x3xf32>
      %639 = vector.extract_strided_slice %638 {offsets = [0, 0], sizes = [16, 3], strides = [1, 1]} : vector<32x3xf32> to vector<16x3xf32>
      %c0_189 = arith.constant 0 : index
      %c0_190 = arith.constant 0 : index
      %c0_191 = arith.constant 0 : index
      %640 = vector.load %arg15[%c0_189, %c0_190, %c0_191] : memref<2x16x3xf32, #tpu.memory_space<vmem>>, vector<1x16x3xf32>
      %641 = vector.shape_cast %640 : vector<1x16x3xf32> to vector<16x3xf32>
      %642 = vector.shape_cast %639 : vector<16x3xf32> to vector<1x16x3xf32>
      tpu.vector_store %arg15[%c0_189, %c0_190, %c0_191], %642 {strides = array<i32>} : memref<2x16x3xf32, #tpu.memory_space<vmem>>, vector<1x16x3xf32>,
      %643 = vector.extract_strided_slice %638 {offsets = [16, 0], sizes = [16, 3], strides = [1, 1]} : vector<32x3xf32> to vector<16x3xf32>
      %c1_192 = arith.constant 1 : index
      %c0_193 = arith.constant 0 : index
      %c0_194 = arith.constant 0 : index
      %644 = vector.load %arg15[%c1_192, %c0_193, %c0_194] : memref<2x16x3xf32, #tpu.memory_space<vmem>>, vector<1x16x3xf32>
      %645 = vector.shape_cast %644 : vector<1x16x3xf32> to vector<16x3xf32>
      %646 = vector.shape_cast %643 : vector<16x3xf32> to vector<1x16x3xf32>
      tpu.vector_store %arg15[%c1_192, %c0_193, %c0_194], %646 {strides = array<i32>} : memref<2x16x3xf32, #tpu.memory_space<vmem>>, vector<1x16x3xf32>,
    } else {
    }
    return
  }
  func.func @transform_0(%arg0: i32) -> (i32, i32, i32) {
    %c0_i32 = arith.constant 0 : i32
    %c0_i32_0 = arith.constant 0 : i32
    %c0_i32_1 = arith.constant 0 : i32
    return %arg0, %c0_i32, %c0_i32_0 : i32, i32, i32
  }
  func.func @transform_1(%arg0: i32) -> (i32, i32) {
    %c0_i32 = arith.constant 0 : i32
    %c0_i32_0 = arith.constant 0 : i32
    %c0_i32_1 = arith.constant 0 : i32
    return %c0_i32, %c0_i32_0 : i32, i32
  }
  func.func @transform_2(%arg0: i32) -> (i32, i32) {
    %c0_i32 = arith.constant 0 : i32
    %c0_i32_0 = arith.constant 0 : i32
    %c0_i32_1 = arith.constant 0 : i32
    return %c0_i32, %c0_i32_0 : i32, i32
  }
  func.func @transform_3(%arg0: i32) -> (i32, i32) {
    %c0_i32 = arith.constant 0 : i32
    %c0_i32_0 = arith.constant 0 : i32
    %c0_i32_1 = arith.constant 0 : i32
    return %c0_i32, %c0_i32_0 : i32, i32
  }
  func.func @transform_4(%arg0: i32) -> (i32, i32) {
    %c0_i32 = arith.constant 0 : i32
    %c0_i32_0 = arith.constant 0 : i32
    %c0_i32_1 = arith.constant 0 : i32
    return %c0_i32, %c0_i32_0 : i32, i32
  }
  func.func @transform_5(%arg0: i32) -> (i32, i32) {
    %c0_i32 = arith.constant 0 : i32
    %c0_i32_0 = arith.constant 0 : i32
    %c0_i32_1 = arith.constant 0 : i32
    return %c0_i32, %c0_i32_0 : i32, i32
  }
  func.func @transform_6(%arg0: i32) -> (i32, i32, i32) {
    %c0_i32 = arith.constant 0 : i32
    %c0_i32_0 = arith.constant 0 : i32
    %c0_i32_1 = arith.constant 0 : i32
    %c0_i32_2 = arith.constant 0 : i32
    return %c0_i32, %c0_i32_0, %c0_i32_1 : i32, i32, i32
  }
  func.func @transform_7(%arg0: i32) -> (i32, i32) {
    %c0_i32 = arith.constant 0 : i32
    %c0_i32_0 = arith.constant 0 : i32
    %c0_i32_1 = arith.constant 0 : i32
    return %c0_i32, %c0_i32_0 : i32, i32
  }
  func.func @transform_8(%arg0: i32) -> (i32, i32) {
    %c0_i32 = arith.constant 0 : i32
    %c0_i32_0 = arith.constant 0 : i32
    %c0_i32_1 = arith.constant 0 : i32
    return %c0_i32, %c0_i32_0 : i32, i32
  }
  func.func @transform_9(%arg0: i32) -> (i32, i32) {
    %c0_i32 = arith.constant 0 : i32
    %c0_i32_0 = arith.constant 0 : i32
    %c0_i32_1 = arith.constant 0 : i32
    return %c0_i32, %c0_i32_0 : i32, i32
  }
  func.func @transform_10(%arg0: i32) -> (i32, i32) {
    %c0_i32 = arith.constant 0 : i32
    %c0_i32_0 = arith.constant 0 : i32
    %c0_i32_1 = arith.constant 0 : i32
    return %c0_i32, %c0_i32_0 : i32, i32
  }
  func.func @transform_11(%arg0: i32) -> (i32, i32) {
    %c0_i32 = arith.constant 0 : i32
    %c0_i32_0 = arith.constant 0 : i32
    %c0_i32_1 = arith.constant 0 : i32
    return %c0_i32, %c0_i32_0 : i32, i32
  }
  func.func @transform_12(%arg0: i32) -> (i32, i32) {
    %c0_i32 = arith.constant 0 : i32
    %c0_i32_0 = arith.constant 0 : i32
    %c0_i32_1 = arith.constant 0 : i32
    return %c0_i32, %c0_i32_0 : i32, i32
  }
  func.func @transform_13(%arg0: i32) -> (i32, i32, i32) {
    %c0_i32 = arith.constant 0 : i32
    %c0_i32_0 = arith.constant 0 : i32
    %c0_i32_1 = arith.constant 0 : i32
    return %arg0, %c0_i32, %c0_i32_0 : i32, i32, i32
  }
  func.func @transform_14(%arg0: i32) -> (i32, i32, i32) {
    %c0_i32 = arith.constant 0 : i32
    %c0_i32_0 = arith.constant 0 : i32
    %c0_i32_1 = arith.constant 0 : i32
    %c0_i32_2 = arith.constant 0 : i32
    return %c0_i32, %c0_i32_0, %c0_i32_1 : i32, i32, i32
  }
}

</mosaic_0001>

<bundles_post_ra>
// kernel: latent_attn_forward.1
= control target key start
LH: loop header
LB: loop body
LE: loop exit
PB: predicated region body
PF: predicated region fallthrough
CT: control target
= control target key end

     0   :  { %s8881_s29 = smov 0   ;;  %s11048_s0 = inlined_call_operand.vmem [shape: f32[2,32,16], index: 0, kind: input, shape index: {}]   ;;  %s11049_s1 = inlined_call_operand.vmem [shape: f32[32,1], index: 1, kind: input, shape index: {}]   ;;  %s11050_s2 = inlined_call_operand.vmem [shape: f32[96,32], index: 2, kind: input, shape index: {}]   ;;  %s11051_s3 = inlined_call_operand.vmem [shape: f32[96,1], index: 3, kind: input, shape index: {}]   ;;  %s11052_s4 = inlined_call_operand.vmem [shape: f32[32,32], index: 4, kind: input, shape index: {}]   ;;  %s11053_s5 = inlined_call_operand.vmem [shape: f32[32,1], index: 5, kind: input, shape index: {}]   ;;  %s11054_s6 = inlined_call_operand.vmem [shape: f32[24,32,1], index: 6, kind: input, shape index: {}]   ;;  %s11055_s7 = inlined_call_operand.vmem [shape: f32[32,32], index: 7, kind: input, shape index: {}]   ;;  %s11056_s8 = inlined_call_operand.vmem [shape: f32[1,32], index: 8, kind: input, shape index: {}]   ;;  %s11057_s9 = inlined_call_operand.vmem [shape: f32[1,32], index: 9, kind: input, shape index: {}]   ;;  %s11058_s10 = inlined_call_operand.vmem [shape: f32[32,3], index: 10, kind: input, shape index: {}]   ;;  %s11059_s11 = inlined_call_operand.vmem [shape: f32[1,3], index: 11, kind: input, shape index: {}]   ;;  %s11060_s12 = inlined_call_operand.vmem [shape: f32[1,3], index: 12, kind: input, shape index: {}]   ;;  %s11061_s13 = inlined_call_operand.vmem [shape: f32[2,32,16], index: 13, kind: output, shape index: {0}]   ;;  %s11062_s14 = inlined_call_operand.vmem [shape: f32[2,16,3], index: 14, kind: output, shape index: {1}]  }
   0x1 LB: > { %s8887_s30 = sadd.s32 4294967295, %s8796_s29   ;;  %p7351_p0 = scmp.ge.s32.totalorder %s8796_s29, 1  ;;  %s8796_s29 = sphi %s8881_s29, %s25_s29  }
   0x2   : > { %p410_p1 = scmp.lt.s32.totalorder %s8796_s29, 3 }
   0x4   : > { %p411_p2 = pnand %p7351_p0, %p410_p1 }
   0x6   : > { %414 = sbr.rel (%p411_p2) target bundleno = 3177 (0xc69), region = 72 }
   0xd   : > { %p456_p3 = scmp.lt.s32.totalorder %s8887_s30, 1  ;;  %v631_v0 = vld [vmem:[%s11050_s2] sm:$0xff]  ;;  %vm751_vm0 = vcmask 261120   ;;  %v8798_v1 = vmov 0   ;;  %v645_v3 = vld [vmem:[%s11051_s3 + $0x10] sm:$0xff]  ;;  %v644_v4 = vld [vmem:[%s11051_s3 + $0x8] sm:$0xff]  ;;  %v466_v26 = vlaneseq }
   0xe   : > { %7892 = vmatprep.mubr.msk.f32.mxu0 %vm751_vm0, %v631_v0  ;;  %8636 = vset.pattern.permute.xlu0 %v8798_v1  ;;  %v643_v2 = vld [vmem:[%s11051_s3] sm:$0xff]  ;;  %v646_v5 = vld [vmem:[%s11051_s3 + $0x18] sm:$0xff]  ;;  %v648_v13 = vld [vmem:[%s11051_s3 + $0x28] sm:$0xff]  ;;  %v8799_v34 = vmov 0.0   ;;  %vm1032_vm9 = vcmask 130048   ;;  %p7633_p4 = scmp.ne.s32.totalorder %s8887_s30, 1 }
   0xf   : > { %s8897_s17 = scalar_select %p456_p3, %s8887_s30, 1  ;;  %8637 = vset.pattern.permute.xlu1 %v8798_v1  ;;  %693 = vperm.xlu0 %8636, %v643_v2   ;;  %v647_v12 = vld [vmem:[%s11051_s3 + $0x20] sm:$0xff]  ;;  %v649_v14 = vld [vmem:[%s11051_s3 + $0x30] sm:$0xff]  ;;  %v650_v15 = vld [vmem:[%s11051_s3 + $0x38] sm:$0xff]  ;;  %v8975_v29 = vshrl.u32 %v466_v26, 7 }
  0x10   : > { %703 = vperm.xlu1 %8637, %v645_v3   ;;  %v632_v16 = vld [vmem:[%s11050_s2 + $0x8] sm:$0xff]  ;;  %v633_v17 = vld [vmem:[%s11050_s2 + $0x10] sm:$0xff]  ;;  %v634_v18 = vld [vmem:[%s11050_s2 + $0x18] sm:$0xff] }
  0x11   : > { %s7650_s22 = sshll.u32 %s8897_s17, 5  ;;  %v635_v19 = vld [vmem:[%s11050_s2 + $0x20] sm:$0xff]  ;;  %v636_v20 = vld [vmem:[%s11050_s2 + $0x28] sm:$0xff]  ;;  %v637_v21 = vld [vmem:[%s11050_s2 + $0x30] sm:$0xff]  ;;  %vm491_vm1 = vcmp.ge.s32.totalorder %v8975_v29, 4  ;;  %vm475_vm2 = vcmp.lt.s32.totalorder %v8975_v29, 4 }
  0x12   : > { %s8914_s27 = scalar_lea.vmem %s11048_s0, %s7650_s22  ;;  %v638_v22 = vld [vmem:[%s11050_s2 + $0x38] sm:$0xff]  ;;  %v639_v23 = vld [vmem:[%s11050_s2 + $0x40] sm:$0xff]  ;;  %v640_v24 = vld [vmem:[%s11050_s2 + $0x48] sm:$0xff]  ;;  %v8980_v35 = vsel %vm491_vm1, 1.0, %v8799_v34  ;;  %v8983_v36 = vsel %vm475_vm2, 1.0, %v8799_v34  ;;  %v468_v61 = vadd.s32 8, %v8975_v29  ;;  %s465_s23 = scalar_lea.vmem %s11061_s13, %s7650_s22 }
  0x13   : > { %v663_v6 = vld [vmem:[%s8914_s27] sm:$0xff]  ;;  %v664_v7 = vld [vmem:[%s8914_s27 + $0x8] sm:$0xff]  ;;  %v665_v8 = vld [vmem:[%s8914_s27 + $0x10] sm:$0xff]  ;;  %698 = vperm.xlu0 %8636, %v644_v4   ;;  %7904 = vmatprep.mubr.msk.f32.mxu1 %vm751_vm0, %v639_v23  ;;  %11093 = vst [vmem:[#allocation3_spill] sm:$0xff] %v8980_v35  ;;  %s7632_s17 = sshll.u32 %s8887_s30, 4 }
  0x14   : > { %v8288_v9 = vpack.c.bf16 %v664_v7, %v663_v6  ;;  %v666_v10 = vld [vmem:[%s8914_s27 + $0x18] sm:$0xff]  ;;  %708 = vperm.xlu1 %8637, %v646_v5   ;;  %v641_v25 = vld [vmem:[%s11050_s2 + $0x50] sm:$0xff]  ;;  %11094 = vst [vmem:[#allocation4_spill] sm:$0xff] %v8983_v36  ;;  %vm516_vm3 = vcmp.lt.s32.totalorder %v468_v61, 12  ;;  %vm532_vm4 = vcmp.ge.s32.totalorder %v468_v61, 12  ;;  %v469_v5 = vadd.s32 16, %v8975_v29  ;;  %vm9397_vm10 = vmpackc.low %vm1032_vm9, %vm1032_vm9 }
  0x15   : > { %v8292_v11 = vpack.c.bf16 %v666_v10, %v665_v8  ;;  %v642_v46 = vld [vmem:[%s11050_s2 + $0x58] sm:$0xff]  ;;  %v9018_v1 = vsel %vm516_vm3, 1.0, %v8799_v34  ;;  %v9021_v2 = vsel %vm532_vm4, 1.0, %v8799_v34  ;;  %v470_v10 = vadd.s32 24, %v8975_v29  ;;  %s6911_s22 = scalar_lea.vmem [#allocation2], %s7632_s17 }
  0x16   : > { %8289 = vmatprep.subr.bf16.mxu0 %v8288_v9  ;;  %8544 = vmatprep.subr.bf16.mxu1 %v8288_v9  ;;  %11095 = vst [vmem:[#allocation5_spill] sm:$0xff] %v9018_v1  ;;  %11096 = vst [vmem:[#allocation6_spill] sm:$0xff] %v9021_v2  ;;  %vm557_vm5 = vcmp.lt.s32.totalorder %v469_v5, 20  ;;  %vm573_vm6 = vcmp.ge.s32.totalorder %v469_v5, 20 }
  0x17   : > { %8291 = vmatpush3.bf16.msra.mxu0 %v8288_v9  ;;  %8546 = vmatpush3.bf16.msra.mxu1 %v8288_v9  ;;  %v9029_v6 = vsel %vm557_vm5, 1.0, %v8799_v34  ;;  %v9032_v7 = vsel %vm573_vm6, 1.0, %v8799_v34  ;;  %vm598_vm7 = vcmp.lt.s32.totalorder %v470_v10, 28  ;;  %vm614_vm8 = vcmp.ge.s32.totalorder %v470_v10, 28 }
  0x18   : > { %8293 = vmatprep.subr.bf16.mxu0 %v8292_v11  ;;  %713 = vperm.xlu0 %8636, %v647_v12   ;;  %11097 = vst [vmem:[#allocation7_spill] sm:$0xff] %v9029_v6  ;;  %11098 = vst [vmem:[#allocation8_spill] sm:$0xff] %v9032_v7  ;;  %v9045_v12 = vsel %vm614_vm8, 1.0, %v8799_v34 }
  0x19   : > { %718 = vperm.xlu1 %8637, %v648_v13   ;;  %8545 = vmatprep.subr.bf16.mxu1 %v8292_v11  ;;  %11100 = vst [vmem:[#allocation10_spill] sm:$0xff] %v9045_v12 }
  0x1b   : > { %8295 = vmatpush3.bf16.msra.mxu0 %v8292_v11  ;;  %8547 = vmatpush3.bf16.msra.mxu1 %v8292_v11  ;;  %v9042_v11 = vsel %vm598_vm7, 1.0, %v8799_v34 }
  0x1c   : > { %723 = vperm.xlu0 %8636, %v649_v14   ;;  %11099 = vst [vmem:[#allocation9_spill] sm:$0xff] %v9042_v11 }
  0x1d   : > { %728 = vperm.xlu1 %8637, %v650_v15   ;;  %v667_v15 = vld [vmem:[%s11049_s1] sm:$0xff] }
  0x1e   : > { %7893 = vmatmul.mubr.msk.f32.vlgmr.msra.gmra.mrb[0].mxu0 %vm751_vm0, %v632_v16  ;;  %7905 = vmatmul.mubr.msk.f32.vlgmr.msra.gmra.mrb[0].mxu1 %vm751_vm0, %v640_v24  ;;  %v669_v16 = vld [vmem:[%s11049_s1 + $0x10] sm:$0xff] }
  0x1f   : > { %7895 = vmatprep.mubr.msk.f32.mxu0 %vm751_vm0, %v633_v17  ;;  %7907 = vmatprep.mubr.msk.f32.mxu1 %vm751_vm0, %v641_v25  ;;  %v668_v17 = vld [vmem:[%s11049_s1 + $0x8] sm:$0xff] }
  0x22   : > { %7896 = vmatmul.mubr.msk.f32.gmra.mrb[2].mxu0 %vm751_vm0, %v634_v18  ;;  %7908 = vmatmul.mubr.msk.f32.gmra.mrb[2].mxu1 %vm751_vm0, %v642_v46 }
  0x23   : > { %7898 = vmatprep.mubr.msk.f32.mxu0 %vm751_vm0, %v635_v19 }
  0x26   : > { %7899 = vmatmul.mubr.msk.f32.gmra.mrb[4].mxu0 %vm751_vm0, %v636_v20 }
  0x27   : > { %7901 = vmatprep.mubr.msk.f32.mxu0 %vm751_vm0, %v637_v21 }
  0x2a   : > { %7902 = vmatmul.mubr.msk.f32.gmra.mrb[6].mxu0 %vm751_vm0, %v638_v22 }
  0x8e   : > { %v694_v28 = vpop.permute.xlu0 %693 }
  0x8f   : > { %v704_v27 = vpop.permute.xlu1 %703 }
  0x92   : > { %v699_v32 = vpop.permute.xlu0 %698 }
  0x93   : > { %v709_v31 = vpop.permute.xlu1 %708 }
  0x97   : > { %v714_v44 = vpop.permute.xlu0 %713 }
  0x98   : > { %v719_v43 = vpop.permute.xlu1 %718 }
  0x9b   : > { %v724_v56 = vpop.permute.xlu0 %723 }
  0x9c   : > { %v729_v53 = vpop.permute.xlu1 %728 }
  0xf1   : > { %v7894_v30 = vpop.f32.mrb[0].mxu0  ;;  %v9062_v18 = vpop.f32.mrb[0].mxu1 }
  0xf2   : > { %v854_v33 = vpop.f32.mrb[1].mxu0  ;;  %v860_v38 = vadd.f32 %v7894_v30, %v699_v32  ;;  %v9064_v19 = vpop.f32.mrb[1].mxu1 }
  0xf3   : > { %v855_v37 = vadd.f32 %v854_v33, %v694_v28 }
  0xf4   : > { %v8990_v47 = vmul.f32 0.0, %v860_v38  ;;  %v1411_v3 = vmul.f32 %v9018_v1, %v860_v38  ;;  %v1663_v4 = vmul.f32 %v9021_v2, %v860_v38 }
  0xf5   : > { %v7897_v39 = vpop.f32.mrb[2].mxu0  ;;  %v1059_v40 = vmul.f32 %v8980_v35, %v855_v37  ;;  %v913_v41 = vmul.f32 %v8983_v36, %v855_v37  ;;  %v1410_v0 = vmul.f32 0.0, %v855_v37  ;;  %v9104_v38 = vpop.f32.mrb[2].mxu1 }
  0xf6   : > { %v864_v42 = vpop.f32.mrb[3].mxu0  ;;  %v8999_v57 = vadd.f32 %v7897_v39, %v709_v31  ;;  %v9106_v39 = vpop.f32.mrb[3].mxu1 }
  0xf7   : > { %1063 = vxpose.xlu1.b32.start [1/4] (short) (narrow) %v1059_v40, 16  ;;  %917 = vxpose.xlu0.b32.start [1/4] (short) (narrow) %v913_v41, 16  ;;  %v865_v45 = vadd.f32 %v864_v42, %v704_v27 }
  0xf8   : > { %v916_v63 = vmul.f32 0.0, %v8999_v57  ;;  %v2421_v13 = vmul.f32 %v9042_v11, %v8999_v57  ;;  %v2673_v14 = vmul.f32 %v9045_v12, %v8999_v57 }
  0xf9   : > { %v7900_v48 = vpop.f32.mrb[4].mxu0  ;;  %v8995_v52 = vmul.f32 0.0, %v865_v45  ;;  %v1916_v8 = vmul.f32 %v9029_v6, %v865_v45  ;;  %v2168_v9 = vmul.f32 %v9032_v7, %v865_v45 }
  0xfa   : > { %v880_v49 = vadd.f32 %v7900_v48, %v719_v43  ;;  %v874_v50 = vpop.f32.mrb[5].mxu0 }
  0xfb   : > { %v875_v51 = vadd.f32 %v874_v50, %v714_v44  ;;  %1064 = vxpose.xlu1.b32.cont [2/4] (short) (narrow) %v8990_v47, 16  ;;  %918 = vxpose.xlu0.b32.cont [2/4] (short) (narrow) %v8990_v47, 16 }
  0xfd   : > { %v8997_v54 = vpack.c.bf16 %v880_v49, %v875_v51  ;;  %v7903_v55 = vpop.f32.mrb[6].mxu0 }
  0xfe   : > { %v890_v58 = vadd.f32 %v7903_v55, %v729_v53  ;;  %v884_v59 = vpop.f32.mrb[7].mxu0 }
  0xff   : > { %v885_v60 = vadd.f32 %v884_v59, %v724_v56  ;;  %8297 = vmatprep.subr.bf16.mxu1 %v8997_v54  ;;  %8325 = vmatprep.subr.bf16.mxu0 %v8997_v54 }
 0x100   : > { %1065 = vxpose.xlu1.b32.cont [3/4] (short) (narrow) %v8995_v52, 16  ;;  %919 = vxpose.xlu0.b32.cont [3/4] (short) (narrow) %v8995_v52, 16 }
 0x101   : > { %v9006_v62 = vpack.c.bf16 %v890_v58, %v885_v60  ;;  %8299 = vmatpush3.bf16.msra.mxu1 %v8997_v54  ;;  %8327 = vmatpush3.bf16.msra.mxu0 %v8997_v54 }
 0x103   : > { %8301 = vmatprep.subr.bf16.mxu1 %v9006_v62  ;;  %8329 = vmatprep.subr.bf16.mxu0 %v9006_v62 }
 0x104   : > { %1066 = vxpose.xlu1.b32.end [4/4] (short) (narrow) %v916_v63, 16  ;;  %920 = vxpose.xlu0.b32.end [4/4] (short) (narrow) %v916_v63, 16 }
 0x105   : > { %8303 = vmatpush3.bf16.msra.mxu1 %v9006_v62  ;;  %8331 = vmatpush3.bf16.msra.mxu0 %v9006_v62 }
 0x106   : > { %8305 = vmatprep.subr.bf16.mxu1 %v8997_v54  ;;  %8339 = vmatprep.subr.bf16.mxu0 %v8997_v54 }
 0x108   : > { %1666 = vxpose.xlu1.b32.start [1/4] (short) (narrow) %v1410_v0, 16  ;;  %1414 = vxpose.xlu0.b32.start [1/4] (short) (narrow) %v1410_v0, 16 }
 0x10c   : > { %1667 = vxpose.xlu1.b32.cont [2/4] (short) (narrow) %v1663_v4, 16  ;;  %1415 = vxpose.xlu0.b32.cont [2/4] (short) (narrow) %v1411_v3, 16 }
 0x110   : > { %1668 = vxpose.xlu1.b32.cont [3/4] (short) (narrow) %v8995_v52, 16  ;;  %1416 = vxpose.xlu0.b32.cont [3/4] (short) (narrow) %v8995_v52, 16 }
 0x114   : > { %1669 = vxpose.xlu1.b32.end [4/4] (short) (narrow) %v916_v63, 16  ;;  %1417 = vxpose.xlu0.b32.end [4/4] (short) (narrow) %v916_v63, 16 }
 0x118   : > { %2170 = vxpose.xlu1.b32.start [1/4] (short) (narrow) %v1410_v0, 16  ;;  %1918 = vxpose.xlu0.b32.start [1/4] (short) (narrow) %v1410_v0, 16 }
 0x11c   : > { %2171 = vxpose.xlu1.b32.cont [2/4] (short) (narrow) %v8990_v47, 16  ;;  %1919 = vxpose.xlu0.b32.cont [2/4] (short) (narrow) %v8990_v47, 16 }
 0x120   : > { %2172 = vxpose.xlu1.b32.cont [3/4] (short) (narrow) %v2168_v9, 16  ;;  %1920 = vxpose.xlu0.b32.cont [3/4] (short) (narrow) %v1916_v8, 16 }
 0x124   : > { %2173 = vxpose.xlu1.b32.end [4/4] (short) (narrow) %v916_v63, 16  ;;  %1921 = vxpose.xlu0.b32.end [4/4] (short) (narrow) %v916_v63, 16 }
 0x128   : > { %2674 = vxpose.xlu1.b32.start [1/4] (short) (narrow) %v1410_v0, 16  ;;  %2422 = vxpose.xlu0.b32.start [1/4] (short) (narrow) %v1410_v0, 16 }
 0x12c   : > { %2675 = vxpose.xlu1.b32.cont [2/4] (short) (narrow) %v8990_v47, 16  ;;  %2423 = vxpose.xlu0.b32.cont [2/4] (short) (narrow) %v8990_v47, 16 }
 0x130   : > { %2676 = vxpose.xlu1.b32.cont [3/4] (short) (narrow) %v8995_v52, 16  ;;  %2424 = vxpose.xlu0.b32.cont [3/4] (short) (narrow) %v8995_v52, 16 }
 0x134   : > { %2677 = vxpose.xlu1.b32.end [4/4] (short) (narrow) %v2673_v14, 16  ;;  %2425 = vxpose.xlu0.b32.end [4/4] (short) (narrow) %v2421_v13, 16 }
 0x152   : > { %673 = vperm.xlu1 %8637, %v667_v15  }
 0x156   : > { %683 = vperm.xlu1 %8637, %v669_v16  }
 0x15d   : > { %678 = vperm.xlu0 %8636, %v668_v17  }
 0x178   : > { %v933_v20 = vpop.trf.xlu0  ;;  %v1079_v22 = vpop.trf.xlu1 }
 0x179   : > { %7918 = vmatprep.mubr.msk.f32.mxu1 %vm751_vm0, %v933_v20 }
 0x17c   : > { %v934_v21 = vpop.trf.xlu0  ;;  %v1080_v23 = vpop.trf.xlu1 }
 0x17d   : > { %7919 = vmatmul.mubr.msk.f32.vlgmr.msra.gmra.mrb[4].mxu1 %vm751_vm0, %v934_v21 }
 0x17e   : > { %8307 = vmatpush3.bf16.msra.mxu1 %v8997_v54  ;;  %7929 = vmatprep.mubr.msk.f32.mxu1 %vm751_vm0, %v1079_v22 }
 0x17f   : > { %8309 = vmatprep.subr.bf16.mxu1 %v9006_v62 }
 0x182   : > { %8311 = vmatpush3.bf16.msra.mxu1 %v9006_v62 }
 0x185   : > { %7930 = vmatmul.mubr.msk.f32.vlgmr.msra.gmra.mrb[6].mxu1 %vm751_vm0, %v1080_v23 }
 0x188   : > { %v1430_v24 = vpop.trf.xlu0  ;;  %v1682_v26 = vpop.trf.xlu1 }
 0x189   : > { %7960 = vmatprep.mubr.msk.f32.mxu0 %vm751_vm0, %v1430_v24 }
 0x18c   : > { %v1431_v25 = vpop.trf.xlu0  ;;  %v1683_v27 = vpop.trf.xlu1 }
 0x18d   : > { %7961 = vmatmul.mubr.msk.f32.vlgmr.msra.gmra.mrb[8].mxu0 %vm751_vm0, %v1431_v25 }
 0x18e   : > { %8341 = vmatpush3.bf16.msra.mxu0 %v8997_v54  ;;  %7981 = vmatprep.mubr.msk.f32.mxu0 %vm751_vm0, %v1682_v26 }
 0x18f   : > { %8343 = vmatprep.subr.bf16.mxu0 %v9006_v62 }
 0x192   : > { %8345 = vmatpush3.bf16.msra.mxu0 %v9006_v62 }
 0x193   : > { %8353 = vmatprep.subr.bf16.mxu0 %v8997_v54 }
 0x195   : > { %7982 = vmatmul.mubr.msk.f32.vlgmr.msra.gmra.mrb[10].mxu0 %vm751_vm0, %v1683_v27  ;;  %v652_v27 = vld [vmem:[%s11051_s3 + $0x48] sm:$0xff] }
 0x196   : > { %8355 = vmatpush3.bf16.msra.mxu0 %v8997_v54 }
 0x197   : > { %8357 = vmatprep.subr.bf16.mxu0 %v9006_v62 }
 0x198   : > { %v1934_v28 = vpop.trf.xlu0  ;;  %v2186_v30 = vpop.trf.xlu1 }
 0x199   : > { %8002 = vmatprep.mubr.msk.f32.mxu0 %vm751_vm0, %v1934_v28  ;;  %v651_v28 = vld [vmem:[%s11051_s3 + $0x40] sm:$0xff] }
 0x19a   : > { %8359 = vmatpush3.bf16.msra.mxu0 %v9006_v62 }
 0x19b   : > { %8367 = vmatprep.subr.bf16.mxu0 %v8997_v54 }
 0x19c   : > { %v1935_v29 = vpop.trf.xlu0  ;;  %v2187_v31 = vpop.trf.xlu1 }
 0x19d   : > { %8003 = vmatmul.mubr.msk.f32.vlgmr.msra.gmra.mrb[12].mxu0 %vm751_vm0, %v1935_v29 }
 0x19e   : > { %8369 = vmatpush3.bf16.msra.mxu0 %v8997_v54  ;;  %8023 = vmatprep.mubr.msk.f32.mxu0 %vm751_vm0, %v2186_v30 }
 0x19f   : > { %8371 = vmatprep.subr.bf16.mxu0 %v9006_v62 }
 0x1a2   : > { %8373 = vmatpush3.bf16.msra.mxu0 %v9006_v62 }
 0x1a3   : > { %8381 = vmatprep.subr.bf16.mxu0 %v8997_v54 }
 0x1a5   : > { %8024 = vmatmul.mubr.msk.f32.vlgmr.msra.gmra.mrb[14].mxu0 %vm751_vm0, %v2187_v31 }
 0x1a6   : > { %8383 = vmatpush3.bf16.msra.mxu0 %v8997_v54 }
 0x1a7   : > { %8385 = vmatprep.subr.bf16.mxu0 %v9006_v62 }
 0x1a8   : > { %v2438_v32 = vpop.trf.xlu0  ;;  %v2690_v34 = vpop.trf.xlu1 }
 0x1a9   : > { %8044 = vmatprep.mubr.msk.f32.mxu0 %vm751_vm0, %v2438_v32 }
 0x1aa   : > { %8387 = vmatpush3.bf16.msra.mxu0 %v9006_v62 }
 0x1ab   : > { %8395 = vmatprep.subr.bf16.mxu0 %v8997_v54 }
 0x1ac   : > { %v2439_v33 = vpop.trf.xlu0  ;;  %v2691_v37 = vpop.trf.xlu1 }
 0x1ad   : > { %8045 = vmatmul.mubr.msk.f32.vlgmr.msra.gmra.mrb[16].mxu0 %vm751_vm0, %v2439_v33 }
 0x1ae   : > { %8397 = vmatpush3.bf16.msra.mxu0 %v8997_v54  ;;  %8065 = vmatprep.mubr.msk.f32.mxu0 %vm751_vm0, %v2690_v34 }
 0x1af   : > { %8399 = vmatprep.subr.bf16.mxu0 %v9006_v62 }
 0x1b2   : > { %8401 = vmatpush3.bf16.msra.mxu0 %v9006_v62 }
 0x1b5   : > { %8066 = vmatmul.mubr.msk.f32.vlgmr.msra.gmra.mrb[18].mxu0 %vm751_vm0, %v2691_v37 }
 0x1d1   : > { %v9108_v40 = vpop.permute.xlu1 %673 }
 0x1d2   : > { %11101 = vst [vmem:[#allocation11_spill] sm:$0xff] %v9108_v40 }
 0x1dc   : > { %v9110_v41 = vpop.permute.xlu0 %678 }
 0x1dd   : > { %11102 = vst [vmem:[#allocation12_spill] sm:$0xff] %v9110_v41  ;;  %v8408_v42 = vpack.c.bf16 %v9110_v41, %v9108_v40 }
 0x1df   : > { %8409 = vmatprep.subr.bf16.mxu0 %v8408_v42 }
 0x1e0   : > { %8411 = vmatpush3.bf16.msra.mxu0 %v8408_v42 }
 0x250   : > { %v7920_v43 = vpop.f32.mrb[4].mxu1 }
 0x251   : > { %v9114_v44 = vmul.f32 2.0, %v7920_v43  ;;  %v1021_v45 = vpop.f32.mrb[5].mxu1 }
 0x252   : > { %v9124_v54 = vmul.f32 2.0, %v1021_v45 }
 0x253   : > { %v1036_v46 = vsel %vm1032_vm9, %v9114_v44, -inf }
 0x254   : > { %1037 = vmax.xlane.f32.xlu0 %v1036_v46  ;;  %v1033_v58 = vsel %vm1032_vm9, %v9124_v54, -inf }
 0x258   : > { %v7931_v47 = vpop.f32.mrb[6].mxu1 }
 0x259   : > { %v1167_v48 = vpop.f32.mrb[7].mxu1  ;;  %v9122_v53 = vmul.f32 2.0, %v7931_v47  ;;  %v9185_v47 = vpop.permute.xlu1 %683 }
 0x25a   : > { %v9138_v63 = vmul.f32 2.0, %v1167_v48  ;;  %11103 = vst [vmem:[#allocation13_spill] sm:$0xff] %v9185_v47 }
 0x25b   : > { %v1181_v57 = vsel %vm1032_vm9, %v9122_v53, -inf }
 0x25c   : > { %v1178_v4 = vsel %vm1032_vm9, %v9138_v63, -inf }
 0x260   : > { %v7962_v49 = vpop.f32.mrb[8].mxu0 }
 0x261   : > { %v9118_v50 = vmul.f32 2.0, %v7962_v49  ;;  %v1518_v51 = vpop.f32.mrb[9].mxu0 }
 0x262   : > { %v9120_v52 = vmul.f32 2.0, %v1518_v51 }
 0x263   : > { %v1532_v55 = vsel %vm1032_vm9, %v9118_v50, -inf }
 0x264   : > { %1533 = vmax.xlane.f32.xlu0 %v1532_v55  ;;  %v1529_v56 = vsel %vm1032_vm9, %v9120_v52, -inf }
 0x265   : > { %1530 = vmax.xlane.f32.xlu1 %v1529_v56 }
 0x268   : > { %1034 = vmax.xlane.f32.xlu0 %v1033_v58  ;;  %v7983_v59 = vpop.f32.mrb[10].mxu0 }
 0x269   : > { %v9134_v60 = vmul.f32 2.0, %v7983_v59  ;;  %v1770_v61 = vpop.f32.mrb[11].mxu0  ;;  %1182 = vmax.xlane.f32.xlu1 %v1181_v57 }
 0x26a   : > { %v9136_v62 = vmul.f32 2.0, %v1770_v61 }
 0x26b   : > { %v1784_v0 = vsel %vm1032_vm9, %v9134_v60, -inf }
 0x26c   : > { %1785 = vmax.xlane.f32.xlu0 %v1784_v0  ;;  %v1781_v3 = vsel %vm1032_vm9, %v9136_v62, -inf }
 0x26d   : > { %1782 = vmax.xlane.f32.xlu1 %v1781_v3 }
 0x270   : > { %1179 = vmax.xlane.f32.xlu0 %v1178_v4  ;;  %v8004_v5 = vpop.f32.mrb[12].mxu0 }
 0x271   : > { %v9146_v8 = vmul.f32 2.0, %v8004_v5  ;;  %v2022_v9 = vpop.f32.mrb[13].mxu0 }
 0x272   : > { %v9148_v10 = vmul.f32 2.0, %v2022_v9 }
 0x273   : > { %v2036_v13 = vsel %vm1032_vm9, %v9146_v8, -inf }
 0x274   : > { %2037 = vmax.xlane.f32.xlu0 %v2036_v13  ;;  %v2033_v14 = vsel %vm1032_vm9, %v9148_v10, -inf }
 0x275   : > { %2034 = vmax.xlane.f32.xlu1 %v2033_v14 }
 0x278   : > { %v8025_v15 = vpop.f32.mrb[14].mxu0 }
 0x279   : > { %v9154_v16 = vmul.f32 2.0, %v8025_v15  ;;  %v2274_v17 = vpop.f32.mrb[15].mxu0 }
 0x27a   : > { %v9156_v20 = vmul.f32 2.0, %v2274_v17 }
 0x27b   : > { %v2288_v21 = vsel %vm1032_vm9, %v9154_v16, -inf }
 0x27c   : > { %2289 = vmax.xlane.f32.xlu0 %v2288_v21  ;;  %v2285_v22 = vsel %vm1032_vm9, %v9156_v20, -inf }
 0x27d   : > { %2286 = vmax.xlane.f32.xlu1 %v2285_v22 }
 0x280   : > { %v8046_v23 = vpop.f32.mrb[16].mxu0 }
 0x281   : > { %v2526_v24 = vpop.f32.mrb[17].mxu0  ;;  %v9168_v29 = vmul.f32 2.0, %v8046_v23 }
 0x282   : > { %v9170_v30 = vmul.f32 2.0, %v2526_v24 }
 0x283   : > { %v2540_v31 = vsel %vm1032_vm9, %v9168_v29, -inf }
 0x284   : > { %v2537_v34 = vsel %vm1032_vm9, %v9170_v30, -inf }
 0x288   : > { %v8067_v25 = vpop.f32.mrb[18].mxu0 }
 0x289   : > { %v2778_v26 = vpop.f32.mrb[19].mxu0  ;;  %v9174_v32 = vmul.f32 2.0, %v8067_v25 }
 0x28a   : > { %v9176_v33 = vmul.f32 2.0, %v2778_v26 }
 0x28b   : > { %v2792_v37 = vsel %vm1032_vm9, %v9174_v32, -inf }
 0x28c   : > { %v2789_v42 = vsel %vm1032_vm9, %v9176_v33, -inf }
 0x28e   : > { %738 = vperm.xlu1 %8637, %v652_v27  }
 0x292   : > { %733 = vperm.xlu0 %8636, %v651_v28  }
 0x2b1   : > { %2541 = vmax.xlane.f32.xlu0 %v2540_v31 }
 0x2b2   : > { %2538 = vmax.xlane.f32.xlu1 %v2537_v34 }
 0x2b5   : > { %2793 = vmax.xlane.f32.xlu0 %v2792_v37 }
 0x2b6   : > { %2790 = vmax.xlane.f32.xlu1 %v2789_v42 }
 0x2e1   : > { %v1038_v43 = vpop.xlane.xlu0 %1037 }
 0x2e2   : > { %v1040_v45 = vsub.f32 %v9114_v44, %v1038_v43 }
 0x2e4   : > { %v1043_v46 = vmul.f32 1.442695, %v1040_v45 }
 0x2e6   : > { %8638 = vpow2.f32 %v1043_v46 }
 0x2f0   : > { %v9187_v48 = vpop.eup %8638 }
 0x2f1   : > { %v1534_v49 = vpop.xlane.xlu0 %1533  ;;  %v1048_v51 = vsel %vm1032_vm9, %v9187_v48, 0.0 }
 0x2f2   : > { %v1536_v55 = vsub.f32 %v9118_v50, %v1534_v49  ;;  %v1531_v56 = vpop.xlane.xlu1 %1530  ;;  %1049 = vadd.xlane.f32.xlu1 %v1048_v51  ;;  %v653_v51 = vld [vmem:[%s11051_s3 + $0x50] sm:$0xff] }
 0x2f3   : > { %v1535_v58 = vsub.f32 %v9120_v52, %v1531_v56 }
 0x2f4   : > { %v1539_v57 = vmul.f32 1.442695, %v1536_v55  ;;  %v654_v55 = vld [vmem:[%s11051_s3 + $0x58] sm:$0xff] }
 0x2f5   : > { %v1035_v59 = vpop.xlane.xlu0 %1034  ;;  %v1537_v0 = vmul.f32 1.442695, %v1535_v58 }
 0x2f6   : > { %8640 = vpow2.f32 %v1539_v57  ;;  %v1039_v44 = vsub.f32 %v9124_v54, %v1035_v59  ;;  %v1183_v61 = vpop.xlane.xlu1 %1182 }
 0x2f7   : > { %v1185_v4 = vsub.f32 %v9122_v53, %v1183_v61 }
 0x2f8   : > { %v1041_v3 = vmul.f32 1.442695, %v1039_v44 }
 0x2f9   : > { %v1786_v5 = vpop.xlane.xlu0 %1785  ;;  %v1188_v50 = vmul.f32 1.442695, %v1185_v4 }
 0x2fa   : > { %8642 = vpow2.f32 %v1041_v3  ;;  %v1788_v9 = vsub.f32 %v9134_v60, %v1786_v5  ;;  %v1783_v13 = vpop.xlane.xlu1 %1782 }
 0x2fb   : > { %8644 = vpow2.f32 %v1537_v0  ;;  %v1787_v15 = vsub.f32 %v9136_v62, %v1783_v13 }
 0x2fc   : > { %v1791_v14 = vmul.f32 1.442695, %v1788_v9 }
 0x2fd   : > { %v1180_v52 = vpop.xlane.xlu0 %1179  ;;  %v1789_v21 = vmul.f32 1.442695, %v1787_v15 }
 0x2fe   : > { %8646 = vpow2.f32 %v1791_v14  ;;  %v1184_v17 = vsub.f32 %v9138_v63, %v1180_v52 }
 0x2ff   : > { %8648 = vpow2.f32 %v1188_v50 }
 0x300   : > { %v9198_v54 = vpop.eup %8640  ;;  %v1186_v22 = vmul.f32 1.442695, %v1184_v17 }
 0x301   : > { %v1544_v53 = vsel %vm1032_vm9, %v9198_v54, 0.0  ;;  %v2038_v24 = vpop.xlane.xlu0 %2037 }
 0x302   : > { %8650 = vpow2.f32 %v1186_v22  ;;  %1545 = vadd.xlane.f32.xlu1 %v1544_v53  ;;  %v2035_v56 = vpop.xlane.xlu1 %2034  ;;  %v2040_v57 = vsub.f32 %v9146_v8, %v2038_v24 }
 0x303   : > { %8652 = vpow2.f32 %v1789_v21 }
 0x304   : > { %v9202_v60 = vpop.eup %8642  ;;  %v2043_v61 = vmul.f32 1.442695, %v2040_v57  ;;  %v7474_v57 = vld [vmem:[%s11054_s6 + $0x190] sm:$0xff] }
 0x305   : > { %v1045_v62 = vsel %vm1032_vm9, %v9202_v60, 0.0  ;;  %v9206_v23 = vpop.eup %8644 }
 0x306   : > { %1046 = vadd.xlane.f32.xlu0 %v1045_v62  ;;  %v1541_v25 = vsel %vm1032_vm9, %v9206_v23, 0.0 }
 0x308   : > { %v9208_v63 = vpop.eup %8646 }
 0x309   : > { %v1796_v26 = vsel %vm1032_vm9, %v9208_v63, 0.0  ;;  %v9214_v27 = vpop.eup %8648  ;;  %v2290_v31 = vpop.xlane.xlu0 %2289 }
 0x30a   : > { %1542 = vadd.xlane.f32.xlu0 %v1541_v25  ;;  %1797 = vadd.xlane.f32.xlu1 %v1796_v26  ;;  %v1193_v34 = vsel %vm1032_vm9, %v9214_v27, 0.0  ;;  %v2292_v59 = vsub.f32 %v9154_v16, %v2290_v31  ;;  %v2287_v44 = vpop.xlane.xlu1 %2286 }
 0x30b   : > { %v2291_v3 = vsub.f32 %v9156_v20, %v2287_v44  ;;  %v655_v44 = vld [vmem:[%s11052_s4] sm:$0xff] }
 0x30c   : > { %v9216_v28 = vpop.eup %8650  ;;  %v2295_v0 = vmul.f32 1.442695, %v2292_v59  ;;  %v7476_v59 = vld [vmem:[%s11054_s6 + $0x20] sm:$0xff]  ;;  %8086 = vmatprep.mubr.msk.f32.mxu0 %vm751_vm0, %v655_v44  ;;  %v7503_v44 = vld [vmem:[%s11054_s6 + $0x98] sm:$0xff] }
 0x30d   : > { %v1190_v37 = vsel %vm1032_vm9, %v9216_v28, 0.0  ;;  %v9222_v42 = vpop.eup %8652  ;;  %v2293_v4 = vmul.f32 1.442695, %v2291_v3  ;;  %v7481_v3 = vld [vmem:[%s11054_s6 + $0x1a8] sm:$0xff] }
 0x30e   : > { %1194 = vadd.xlane.f32.xlu0 %v1193_v34  ;;  %1191 = vadd.xlane.f32.xlu1 %v1190_v37  ;;  %v1793_v45 = vsel %vm1032_vm9, %v9222_v42, 0.0  ;;  %v9242_v5 = vpop.permute.xlu1 %738 }
 0x311   : > { %v734_v43 = vpop.permute.xlu0 %733 }
 0x312   : > { %v9227_v46 = vadd.f32 %v9064_v19, %v734_v43  ;;  %1794 = vadd.xlane.f32.xlu0 %v1793_v45  ;;  %v2039_v19 = vsub.f32 %v9148_v10, %v2035_v56  ;;  %v670_v56 = vld [vmem:[%s11049_s1 + $0x18] sm:$0xff] }
 0x314   : > { %v1200_v49 = vmul.f32 %v8980_v35, %v9227_v46  ;;  %v2041_v58 = vmul.f32 1.442695, %v2039_v19  ;;  %v7475_v19 = vld [vmem:[%s11054_s6 + $0x198] sm:$0xff] }
 0x316   : > { %7936 = vmatprep.mubr.msk.f32.mxu1 %vm1032_vm9, %v1200_v49  ;;  %8654 = vpow2.f32 %v2041_v58  ;;  %v7477_v58 = vld [vmem:[%s11054_s6 + $0x28] sm:$0xff] }
 0x317   : > { %8656 = vpow2.f32 %v2043_v61  ;;  %v7479_v61 = vld [vmem:[%s11054_s6 + $0x38] sm:$0xff] }
 0x318   : > { %8658 = vpow2.f32 %v2295_v0  ;;  %v7478_v0 = vld [vmem:[%s11054_s6 + $0x30] sm:$0xff] }
 0x319   : > { %8660 = vpow2.f32 %v2293_v4  ;;  %v7480_v4 = vld [vmem:[%s11054_s6 + $0x1a0] sm:$0xff] }
 0x31f   : > { %743 = vperm.xlu1 %8637, %v653_v51   ;;  %v7472_v51 = vld [vmem:[%s11054_s6 + $0x180] sm:$0xff] }
 0x320   : > { %v9244_v13 = vpop.eup %8654 }
 0x321   : > { %v9248_v14 = vpop.eup %8656  ;;  %v2045_v20 = vsel %vm1032_vm9, %v9244_v13, 0.0 }
 0x322   : > { %v9252_v17 = vpop.eup %8658  ;;  %v2048_v62 = vsel %vm1032_vm9, %v9248_v14, 0.0 }
 0x323   : > { %v2300_v24 = vsel %vm1032_vm9, %v9252_v17, 0.0  ;;  %v9260_v25 = vpop.eup %8660 }
 0x328   : > { %748 = vperm.xlu0 %8636, %v654_v55   ;;  %v7473_v55 = vld [vmem:[%s11054_s6 + $0x188] sm:$0xff] }
 0x33e   : > { %v2542_v9 = vpop.xlane.xlu0 %2541 }
 0x33f   : > { %v2544_v8 = vsub.f32 %v9168_v29, %v2542_v9  ;;  %v2539_v10 = vpop.xlane.xlu1 %2538  ;;  %v7483_v9 = vld [vmem:[%s11054_s6 + $0x1b8] sm:$0xff] }
 0x340   : > { %v2543_v16 = vsub.f32 %v9170_v30, %v2539_v10  ;;  %v7485_v10 = vld [vmem:[%s11054_s6 + $0x48] sm:$0xff] }
 0x341   : > { %v2547_v50 = vmul.f32 1.442695, %v2544_v8  ;;  %v7482_v8 = vld [vmem:[%s11054_s6 + $0x1b0] sm:$0xff] }
 0x342   : > { %v2545_v15 = vmul.f32 1.442695, %v2543_v16  ;;  %v2794_v52 = vpop.xlane.xlu0 %2793  ;;  %v7484_v16 = vld [vmem:[%s11054_s6 + $0x40] sm:$0xff] }
 0x343   : > { %8662 = vpow2.f32 %v2547_v50  ;;  %v2796_v21 = vsub.f32 %v9174_v32, %v2794_v52  ;;  %v2791_v22 = vpop.xlane.xlu1 %2790  ;;  %2046 = vadd.xlane.f32.xlu1 %v2045_v20  ;;  %v2297_v32 = vsel %vm1032_vm9, %v9260_v25, 0.0  ;;  %v7487_v50 = vld [vmem:[%s11054_s6 + $0x58] sm:$0xff]  ;;  %v7489_v52 = vld [vmem:[%s11054_s6 + $0x1c8] sm:$0xff]  ;;  %v7488_v20 = vld [vmem:[%s11054_s6 + $0x1c0] sm:$0xff] }
 0x344   : > { %8664 = vpow2.f32 %v2545_v15  ;;  %v2795_v29 = vsub.f32 %v9176_v33, %v2791_v22  ;;  %v7486_v15 = vld [vmem:[%s11054_s6 + $0x50] sm:$0xff] }
 0x345   : > { %v2799_v53 = vmul.f32 1.442695, %v2796_v21  ;;  %v7491_v21 = vld [vmem:[%s11054_s6 + $0x1d8] sm:$0xff]  ;;  %v7490_v22 = vld [vmem:[%s11054_s6 + $0x1d0] sm:$0xff] }
 0x346   : > { %v2797_v30 = vmul.f32 1.442695, %v2795_v29  ;;  %v7493_v29 = vld [vmem:[%s11054_s6 + $0x68] sm:$0xff] }
 0x347   : > { %8666 = vpow2.f32 %v2799_v53  ;;  %2049 = vadd.xlane.f32.xlu0 %v2048_v62  ;;  %2301 = vadd.xlane.f32.xlu1 %v2300_v24  ;;  %v7495_v62 = vld [vmem:[%s11054_s6 + $0x78] sm:$0xff] }
 0x348   : > { %8668 = vpow2.f32 %v2797_v30  ;;  %v7492_v30 = vld [vmem:[%s11054_s6 + $0x60] sm:$0xff] }
 0x34b   : > { %2298 = vadd.xlane.f32.xlu0 %v2297_v32 }
 0x34d   : > { %v9264_v26 = vpop.eup %8662 }
 0x34e   : > { %v9266_v33 = vpop.eup %8664  ;;  %v2552_v31 = vsel %vm1032_vm9, %v9264_v26, 0.0 }
 0x34f   : > { %2553 = vadd.xlane.f32.xlu1 %v2552_v31  ;;  %v2549_v34 = vsel %vm1032_vm9, %v9266_v33, 0.0  ;;  %v7494_v31 = vld [vmem:[%s11054_s6 + $0x70] sm:$0xff] }
 0x350   : > { %2550 = vadd.xlane.f32.xlu0 %v2549_v34  ;;  %v7497_v34 = vld [vmem:[%s11054_s6 + $0x1e8] sm:$0xff] }
 0x351   : > { %v9272_v37 = vpop.eup %8666 }
 0x352   : > { %v9274_v43 = vpop.eup %8668  ;;  %v2804_v45 = vsel %vm1032_vm9, %v9272_v37, 0.0 }
 0x353   : > { %2805 = vadd.xlane.f32.xlu1 %v2804_v45  ;;  %v2801_v49 = vsel %vm1032_vm9, %v9274_v43, 0.0 }
 0x354   : > { %2802 = vadd.xlane.f32.xlu0 %v2801_v49 }
 0x364   : > { %3761 = vperm.xlu1 %8637, %v7472_v51   ;;  %v7496_v51 = vld [vmem:[%s11054_s6 + $0x1e0] sm:$0xff] }
 0x368   : > { %3766 = vperm.xlu1 %8637, %v7473_v55   ;;  %v7499_v55 = vld [vmem:[%s11054_s6 + $0x1f8] sm:$0xff] }
 0x36a   : > { %688 = vperm.xlu0 %8636, %v670_v56  }
 0x36c   : > { %3776 = vperm.xlu1 %8637, %v7475_v19  }
 0x36e   : > { %3771 = vperm.xlu0 %8636, %v7474_v57   ;;  %v7498_v57 = vld [vmem:[%s11054_s6 + $0x1f0] sm:$0xff] }
 0x370   : > { %3791 = vperm.xlu1 %8637, %v7477_v58   ;;  %v7501_v58 = vld [vmem:[%s11054_s6 + $0x88] sm:$0xff] }
 0x372   : > { %3786 = vperm.xlu0 %8636, %v7476_v59   ;;  %v7500_v59 = vld [vmem:[%s11054_s6 + $0x80] sm:$0xff] }
 0x374   : > { %3801 = vperm.xlu1 %8637, %v7479_v61   ;;  %v7502_v61 = vld [vmem:[%s11054_s6 + $0x90] sm:$0xff] }
 0x376   : > { %3796 = vperm.xlu0 %8636, %v7478_v0  }
 0x378   : > { %3824 = vperm.xlu1 %8637, %v7481_v3  }
 0x37a   : > { %3819 = vperm.xlu0 %8636, %v7480_v4   ;;  %v7505_v4 = vld [vmem:[%s11054_s6 + $0x208] sm:$0xff] }
 0x37c   : > { %3834 = vperm.xlu1 %8637, %v7483_v9  }
 0x37e   : > { %3829 = vperm.xlu0 %8636, %v7482_v8  }
 0x37f   : > { %v1050_v53 = vpop.xlane.xlu1 %1049 }
 0x380   : > { %3877 = vperm.xlu1 %8637, %v7485_v10   ;;  %8670 = vrcp.f32 %v1050_v53  ;;  %v7504_v10 = vld [vmem:[%s11054_s6 + $0x200] sm:$0xff] }
 0x382   : > { %3872 = vperm.xlu0 %8636, %v7484_v16  }
 0x384   : > { %3887 = vperm.xlu1 %8637, %v7487_v50  }
 0x386   : > { %3882 = vperm.xlu0 %8636, %v7486_v15  }
 0x388   : > { %3910 = vperm.xlu1 %8637, %v7489_v52  }
 0x38a   : > { %3905 = vperm.xlu0 %8636, %v7488_v20   ;;  %v8671_v0 = vpop.eup %8670  ;;  %v7507_v20 = vld [vmem:[%s11054_s6 + $0x218] sm:$0xff] }
 0x38c   : > { %3920 = vperm.xlu1 %8637, %v7491_v21   ;;  %v11104_v21 = vmov 0 }
 0x38d   : > { %v11105_v21 = vsel %vm9397_vm10, 4294967295, %v11104_v21 }
 0x38e   : > { %3915 = vperm.xlu0 %8636, %v7490_v22   ;;  %11106 = vst [vmem:[#allocation14_spill] sm:$0xff] %v11105_v21 }
 0x38f   : > { %v1546_v24 = vpop.xlane.xlu1 %1545 }
 0x390   : > { %3967 = vperm.xlu1 %8637, %v7493_v29  }
 0x392   : > { %3962 = vperm.xlu0 %8636, %v7492_v30   ;;  %v9414_v30 = vadd.f32 %v9062_v18, %v9242_v5  ;;  %v7511_v18 = vld [vmem:[%s11054_s6 + $0xb8] sm:$0xff] }
 0x393   : > { %v1047_v32 = vpop.xlane.xlu0 %1046 }
 0x394   : > { %3977 = vperm.xlu1 %8637, %v7495_v62   ;;  %8672 = vrcp.f32 %v1047_v32  ;;  %v9429_v5 = vmul.f32 0.0, %v9414_v30 }
 0x396   : > { %3972 = vperm.xlu0 %8636, %v7494_v31   ;;  %v7508_v31 = vld [vmem:[%s11054_s6 + $0xa0] sm:$0xff] }
 0x397   : > { %v1798_v45 = vpop.xlane.xlu1 %1797  ;;  %v1543_v49 = vpop.xlane.xlu0 %1542 }
 0x398   : > { %4000 = vperm.xlu1 %8637, %v7497_v34  }
 0x39a   : > { %3995 = vperm.xlu0 %8636, %v7496_v51  }
 0x39b   : > { %v1192_v56 = vpop.xlane.xlu1 %1191  ;;  %v1195_v19 = vpop.xlane.xlu0 %1194 }
 0x39c   : > { %8674 = vrcp.f32 %v1192_v56  ;;  %4010 = vperm.xlu1 %8637, %v7499_v55  }
 0x39d   : > { %8676 = vrcp.f32 %v1195_v19  ;;  %v1055_v19 = vmul.f32 %v8983_v36, %v9227_v46 }
 0x39e   : > { %4005 = vperm.xlu0 %8636, %v7498_v57   ;;  %8678 = vrcp.f32 %v1543_v49  ;;  %v8673_v3 = vpop.eup %8672  ;;  %v7512_v57 = vld [vmem:[%s11054_s6 + $0x220] sm:$0xff] }
 0x39f   : > { %8680 = vrcp.f32 %v1546_v24  ;;  %v1795_v50 = vpop.xlane.xlu0 %1794  ;;  %v1053_v52 = vmul.f32 %v8673_v3, %v9202_v60  ;;  %v744_v60 = vpop.permute.xlu1 %743  ;;  %v7516_v3 = vld [vmem:[%s11054_s6 + $0xc0] sm:$0xff] }
 0x3a0   : > { %4057 = vperm.xlu1 %8637, %v7501_v58   ;;  %8682 = vrcp.f32 %v1795_v50  ;;  %v9419_v24 = vadd.f32 %v9106_v39, %v744_v60  ;;  %v1804_v50 = vmul.f32 %v9021_v2, %v9414_v30 }
 0x3a1   : > { %8684 = vrcp.f32 %v1798_v45 }
 0x3a2   : > { %4052 = vperm.xlu0 %8636, %v7500_v59   ;;  %v9436_v49 = vmul.f32 0.0, %v9419_v24  ;;  %v7515_v59 = vld [vmem:[%s11054_s6 + $0x238] sm:$0xff] }
 0x3a4   : > { %4067 = vperm.xlu1 %8637, %v7503_v44  }
 0x3a6   : > { %v8675_v9 = vpop.eup %8674  ;;  %4062 = vperm.xlu0 %8636, %v7502_v61   ;;  %v7514_v61 = vld [vmem:[%s11054_s6 + $0x230] sm:$0xff] }
 0x3a7   : > { %v8677_v8 = vpop.eup %8676  ;;  %v1198_v16 = vmul.f32 %v8675_v9, %v9216_v28  ;;  %v1054_v28 = vmul.f32 %v8671_v0, %v9187_v48  ;;  %v7509_v48 = vld [vmem:[%s11054_s6 + $0xa8] sm:$0xff]  ;;  %v749_v32 = vpop.permute.xlu0 %748  ;;  %v1552_v9 = vmul.f32 %v9018_v1, %v9414_v30 }
 0x3a8   : > { %4090 = vperm.xlu1 %8637, %v7505_v4   ;;  %v1199_v15 = vmul.f32 %v8677_v8, %v9214_v27  ;;  %v7506_v27 = vld [vmem:[%s11054_s6 + $0x210] sm:$0xff]  ;;  %v8679_v53 = vpop.eup %8678  ;;  %v9432_v45 = vadd.f32 %v9104_v38, %v749_v32  ;;  %v7513_v38 = vld [vmem:[%s11054_s6 + $0x228] sm:$0xff]  ;;  %v7519_v4 = vld [vmem:[%s11054_s6 + $0xd8] sm:$0xff] }
 0x3a9   : > { %v8318_v29 = vpack.c.bf16 %v1054_v28, %v1053_v52  ;;  %v8681_v62 = vpop.eup %8680  ;;  %v1549_v34 = vmul.f32 %v8679_v53, %v9206_v23  ;;  %v7510_v23 = vld [vmem:[%s11054_s6 + $0xb0] sm:$0xff]  ;;  %v7521_v8 = vld [vmem:[%s11054_s6 + $0x248] sm:$0xff]  ;;  %v7527_v28 = vld [vmem:[%s11054_s6 + $0xf8] sm:$0xff] }
 0x3aa   : > { %4085 = vperm.xlu0 %8636, %v7504_v10   ;;  %v8312_v22 = vpack.c.bf16 %v1199_v15, %v1198_v16  ;;  %v1550_v39 = vmul.f32 %v8681_v62, %v9198_v54  ;;  %v8683_v55 = vpop.eup %8682  ;;  %v9451_v54 = vmul.f32 0.0, %v9432_v45  ;;  %v7520_v10 = vld [vmem:[%s11054_s6 + $0x240] sm:$0xff]  ;;  %v7523_v16 = vld [vmem:[%s11054_s6 + $0x258] sm:$0xff]  ;;  %v7522_v15 = vld [vmem:[%s11054_s6 + $0x250] sm:$0xff] }
 0x3ab   : > { %v8685_v56 = vpop.eup %8684  ;;  %v1801_v58 = vmul.f32 %v8683_v55, %v9222_v42  ;;  %v7517_v42 = vld [vmem:[%s11054_s6 + $0xc8] sm:$0xff]  ;;  %v7531_v62 = vld [vmem:[%s11054_s6 + $0x278] sm:$0xff]  ;;  %v7530_v32 = vld [vmem:[%s11054_s6 + $0x270] sm:$0xff] }
 0x3ac   : > { %4100 = vperm.xlu1 %8637, %v7507_v20   ;;  %8314 = vmatprep.subr.msk.bf16.mxu1 %vm9397_vm10, %v8312_v22  ;;  %v8332_v51 = vpack.c.bf16 %v1550_v39, %v1549_v34  ;;  %v1802_v44 = vmul.f32 %v8685_v56, %v9208_v63  ;;  %v9483_v63 = vmul.f32 0.0, %v9227_v46  ;;  %v7518_v46 = vld [vmem:[%s11054_s6 + $0xd0] sm:$0xff]  ;;  %v7525_v52 = vld [vmem:[%s11054_s6 + $0xe8] sm:$0xff]  ;;  %v7524_v20 = vld [vmem:[%s11054_s6 + $0xe0] sm:$0xff] }
 0x3ad   : > { %8317 = vmatpush3.bf16.xpose.msk.msra.mxu1 %vm9397_vm10, %v8312_v22  ;;  %v7529_v53 = vld [vmem:[%s11054_s6 + $0x268] sm:$0xff]  ;;  %v7535_v56 = vld [vmem:[%s11054_s6 + $0x118] sm:$0xff] }
 0x3ae   : > { %4095 = vperm.xlu0 %8636, %v7506_v27   ;;  %8320 = vmatprep.subr.msk.bf16.mxu1 %vm9397_vm10, %v8318_v29  ;;  %v8346_v0 = vpack.c.bf16 %v1802_v44, %v1801_v58  ;;  %v7526_v27 = vld [vmem:[%s11054_s6 + $0xf0] sm:$0xff] }
 0x3b0   : > { %4147 = vperm.xlu1 %8637, %v7509_v48   ;;  %v7528_v48 = vld [vmem:[%s11054_s6 + $0x260] sm:$0xff] }
 0x3b2   : > { %4142 = vperm.xlu0 %8636, %v7508_v31  }
 0x3b4   : > { %4157 = vperm.xlu1 %8637, %v7511_v18   ;;  %7937 = vmatmul.mubr.msk.f32.vlgmr.msra.gmra.mrb[8].mxu1 %vm1032_vm9, %v9429_v5  ;;  %v7533_v18 = vld [vmem:[%s11054_s6 + $0x108] sm:$0xff] }
 0x3b5   : > { %7939 = vmatprep.mubr.msk.f32.mxu1 %vm1032_vm9, %v9436_v49  ;;  %8323 = vmatpush3.bf16.xpose.msk.msra.mxu1 %vm9397_vm10, %v8318_v29 }
 0x3b6   : > { %4152 = vperm.xlu0 %8636, %v7510_v23   ;;  %8334 = vmatprep.subr.msk.bf16.mxu1 %vm9397_vm10, %v8332_v51  ;;  %v7532_v23 = vld [vmem:[%s11054_s6 + $0x100] sm:$0xff] }
 0x3b8   : > { %4180 = vperm.xlu1 %8637, %v7513_v38   ;;  %7940 = vmatmul.mubr.msk.f32.gmra.mrb[10].mxu1 %vm1032_vm9, %v9451_v54 }
 0x3b9   : > { %7946 = vmatprep.mubr.msk.f32.mxu1 %vm1032_vm9, %v1055_v19 }
 0x3ba   : > { %4175 = vperm.xlu0 %8636, %v7512_v57  }
 0x3bc   : > { %4190 = vperm.xlu1 %8637, %v7515_v59   ;;  %7947 = vmatmul.mubr.msk.f32.vlgmr.msra.gmra.mrb[8].mxu1 %vm1032_vm9, %v9429_v5 }
 0x3bd   : > { %7949 = vmatprep.mubr.msk.f32.mxu1 %vm1032_vm9, %v9436_v49  ;;  %8337 = vmatpush3.bf16.xpose.msk.msra.mxu1 %vm9397_vm10, %v8332_v51 }
 0x3be   : > { %4185 = vperm.xlu0 %8636, %v7514_v61   ;;  %8348 = vmatprep.subr.msk.bf16.mxu1 %vm9397_vm10, %v8346_v0  ;;  %v7534_v61 = vld [vmem:[%s11054_s6 + $0x110] sm:$0xff] }
 0x3c0   : > { %4237 = vperm.xlu1 %8637, %v7517_v42   ;;  %7950 = vmatmul.mubr.msk.f32.gmra.mrb[10].mxu1 %vm1032_vm9, %v9451_v54 }
 0x3c1   : > { %7967 = vmatprep.mubr.msk.f32.mxu1 %vm1032_vm9, %v9483_v63 }
 0x3c2   : > { %4232 = vperm.xlu0 %8636, %v7516_v3  }
 0x3c4   : > { %4247 = vperm.xlu1 %8637, %v7519_v4   ;;  %7968 = vmatmul.mubr.msk.f32.vlgmr.msra.gmra.mrb[8].mxu1 %vm1032_vm9, %v1552_v9  ;;  %v7539_v9 = vld [vmem:[%s11054_s6 + $0x298] sm:$0xff] }
 0x3c5   : > { %7970 = vmatprep.mubr.msk.f32.mxu1 %vm1032_vm9, %v9436_v49  ;;  %8351 = vmatpush3.bf16.xpose.msk.msra.mxu1 %vm9397_vm10, %v8346_v0 }
 0x3c6   : > { %4242 = vperm.xlu0 %8636, %v7518_v46  }
 0x3c8   : > { %4270 = vperm.xlu1 %8637, %v7521_v8   ;;  %7971 = vmatmul.mubr.msk.f32.gmra.mrb[10].mxu1 %vm1032_vm9, %v9451_v54 }
 0x3c9   : > { %7988 = vmatprep.mubr.msk.f32.mxu1 %vm1032_vm9, %v9483_v63 }
 0x3ca   : > { %4265 = vperm.xlu0 %8636, %v7520_v10  }
 0x3cc   : > { %4280 = vperm.xlu1 %8637, %v7523_v16   ;;  %7989 = vmatmul.mubr.msk.f32.vlgmr.msra.gmra.mrb[8].mxu1 %vm1032_vm9, %v1804_v50  ;;  %v7538_v16 = vld [vmem:[%s11054_s6 + $0x290] sm:$0xff]  ;;  %v2057_v50 = vmul.f32 %v9029_v6, %v9419_v24 }
 0x3cd   : > { %7991 = vmatprep.mubr.msk.f32.mxu1 %vm1032_vm9, %v9436_v49 }
 0x3ce   : > { %4275 = vperm.xlu0 %8636, %v7522_v15   ;;  %v659_v15 = vld [vmem:[%s11053_s5] sm:$0xff] }
 0x3d0   : > { %4327 = vperm.xlu1 %8637, %v7525_v52   ;;  %7992 = vmatmul.mubr.msk.f32.gmra.mrb[10].mxu1 %vm1032_vm9, %v9451_v54  ;;  %v2047_v22 = vpop.xlane.xlu1 %2046  ;;  %v656_v52 = vld [vmem:[%s11052_s4 + $0x8] sm:$0xff] }
 0x3d1   : > { %8009 = vmatprep.mubr.msk.f32.mxu1 %vm1032_vm9, %v9483_v63  ;;  %8686 = vrcp.f32 %v2047_v22  ;;  %v7540_v22 = vld [vmem:[%s11054_s6 + $0x120] sm:$0xff] }
 0x3d2   : > { %4322 = vperm.xlu0 %8636, %v7524_v20  }
 0x3d4   : > { %4337 = vperm.xlu1 %8637, %v7527_v28   ;;  %v2302_v60 = vpop.xlane.xlu1 %2301  ;;  %v2050_v29 = vpop.xlane.xlu0 %2049  ;;  %v657_v28 = vld [vmem:[%s11052_s4 + $0x10] sm:$0xff] }
 0x3d5   : > { %8688 = vrcp.f32 %v2050_v29 }
 0x3d6   : > { %4332 = vperm.xlu0 %8636, %v7526_v27   ;;  %8690 = vrcp.f32 %v2302_v60  ;;  %v661_v27 = vld [vmem:[%s11053_s5 + $0x10] sm:$0xff]  ;;  %v658_v60 = vld [vmem:[%s11052_s4 + $0x18] sm:$0xff] }
 0x3d8   : > { %4360 = vperm.xlu1 %8637, %v7529_v53   ;;  %v2299_v30 = vpop.xlane.xlu0 %2298 }
 0x3d9   : > { %8692 = vrcp.f32 %v2299_v30  ;;  %v660_v30 = vld [vmem:[%s11053_s5 + $0x8] sm:$0xff] }
 0x3da   : > { %4355 = vperm.xlu0 %8636, %v7528_v48  }
 0x3db   : > { %v8687_v39 = vpop.eup %8686 }
 0x3dc   : > { %v2554_v31 = vpop.xlane.xlu1 %2553  ;;  %4370 = vperm.xlu1 %8637, %v7531_v62   ;;  %v2053_v19 = vmul.f32 %v8687_v39, %v9244_v13  ;;  %v7537_v13 = vld [vmem:[%s11054_s6 + $0x288] sm:$0xff]  ;;  %v2309_v62 = vmul.f32 %v9032_v7, %v9419_v24  ;;  %v662_v24 = vld [vmem:[%s11053_s5 + $0x18] sm:$0xff] }
 0x3dd   : > { %8694 = vrcp.f32 %v2554_v31  ;;  %v2551_v34 = vpop.xlane.xlu0 %2550  ;;  %v7544_v31 = vld [vmem:[%s11054_s6 + $0x2a0] sm:$0xff]  ;;  %v7543_v39 = vld [vmem:[%s11054_s6 + $0x138] sm:$0xff] }
 0x3de   : > { %8696 = vrcp.f32 %v2551_v34  ;;  %4365 = vperm.xlu0 %8636, %v7530_v32  }
 0x3df   : > { %v8689_v51 = vpop.eup %8688 }
 0x3e0   : > { %4417 = vperm.xlu1 %8637, %v7533_v18   ;;  %v8691_v55 = vpop.eup %8690  ;;  %v2806_v38 = vpop.xlane.xlu1 %2805  ;;  %v2054_v57 = vmul.f32 %v8689_v51, %v9248_v14  ;;  %v7542_v18 = vld [vmem:[%s11054_s6 + $0x130] sm:$0xff]  ;;  %v2562_v51 = vmul.f32 %v9042_v11, %v9432_v45 }
 0x3e1   : > { %v2803_v58 = vpop.xlane.xlu0 %2802  ;;  %8698 = vrcp.f32 %v2806_v38  ;;  %v2306_v42 = vmul.f32 %v8691_v55, %v9252_v17  ;;  %v7549_v38 = vld [vmem:[%s11054_s6 + $0x148] sm:$0xff] }
 0x3e2   : > { %4412 = vperm.xlu0 %8636, %v7532_v23   ;;  %v8360_v44 = vpack.c.bf16 %v2054_v57, %v2053_v19  ;;  %8700 = vrcp.f32 %v2803_v58  ;;  %v7545_v23 = vld [vmem:[%s11054_s6 + $0x2a8] sm:$0xff]  ;;  %v7547_v57 = vld [vmem:[%s11054_s6 + $0x2b8] sm:$0xff] }
 0x3e3   : > { %v8693_v59 = vpop.eup %8692 }
 0x3e4   : > { %4427 = vperm.xlu1 %8637, %v7535_v56   ;;  %v2305_v0 = vmul.f32 %v8693_v59, %v9260_v25  ;;  %8362 = vmatprep.subr.msk.bf16.mxu1 %vm9397_vm10, %v8360_v44  ;;  %v7536_v25 = vld [vmem:[%s11054_s6 + $0x280] sm:$0xff]  ;;  %v9628_v48 = vpop.permute.xlu1 %3761  ;;  %v2814_v59 = vmul.f32 %v9045_v12, %v9432_v45  ;;  %v7551_v45 = vld [vmem:[%s11054_s6 + $0x158] sm:$0xff] }
 0x3e5   : > { %8365 = vmatpush3.bf16.xpose.msk.msra.mxu1 %vm9397_vm10, %v8360_v44  ;;  %v7548_v56 = vld [vmem:[%s11054_s6 + $0x140] sm:$0xff]  ;;  %v7553_v44 = vld [vmem:[%s11054_s6 + $0x2c8] sm:$0xff] }
 0x3e6   : > { %4422 = vperm.xlu0 %8636, %v7534_v61   ;;  %v8374_v14 = vpack.c.bf16 %v2306_v42, %v2305_v0  ;;  %v7550_v0 = vld [vmem:[%s11054_s6 + $0x150] sm:$0xff] }
 0x3e7   : > { %v8695_v3 = vpop.eup %8694 }
 0x3e8   : > { %v8697_v4 = vpop.eup %8696  ;;  %4450 = vperm.xlu1 %8637, %v7537_v13   ;;  %8376 = vmatprep.subr.msk.bf16.mxu1 %vm9397_vm10, %v8374_v14  ;;  %v2558_v10 = vmul.f32 %v8695_v3, %v9264_v26  ;;  %v9650_v32 = vpop.permute.xlu1 %3766  ;;  %v7557_v13 = vld [vmem:[%s11054_s6 + $0x168] sm:$0xff]  ;;  %v7556_v3 = vld [vmem:[%s11054_s6 + $0x160] sm:$0xff] }
 0x3e9   : > { %v9582_v17 = vpop.permute.xlu0 %688  ;;  %v2557_v8 = vmul.f32 %v8697_v4, %v9266_v33 }
 0x3ea   : > { %11107 = vst [vmem:[#allocation15_spill] sm:$0xff] %v9582_v17  ;;  %v8412_v46 = vpack.c.bf16 %v9582_v17, %v9185_v47  ;;  %4445 = vperm.xlu0 %8636, %v7536_v25   ;;  %v7555_v25 = vld [vmem:[%s11054_s6 + $0x2d8] sm:$0xff] }
 0x3eb   : > { %v8699_v33 = vpop.eup %8698  ;;  %v8388_v26 = vpack.c.bf16 %v2558_v10, %v2557_v8  ;;  %v7561_v8 = vld [vmem:[%s11054_s6 + $0x2e8] sm:$0xff]  ;;  %v7560_v10 = vld [vmem:[%s11054_s6 + $0x2e0] sm:$0xff] }
 0x3ec   : > { %4460 = vperm.xlu1 %8637, %v7539_v9   ;;  %8413 = vmatprep.subr.bf16.mxu0 %v8412_v46  ;;  %v8701_v20 = vpop.eup %8700  ;;  %v2810_v53 = vmul.f32 %v8699_v33, %v9272_v37  ;;  %v7554_v9 = vld [vmem:[%s11054_s6 + $0x2d0] sm:$0xff] }
 0x3ed   : > { %8010 = vmatmul.mubr.msk.f32.vlgmr.msra.gmra.mrb[8].mxu1 %vm1032_vm9, %v9429_v5  ;;  %8415 = vmatpush3.bf16.msra.mxu0 %v8412_v46  ;;  %v2809_v29 = vmul.f32 %v8701_v20, %v9274_v43  ;;  %v7541_v43 = vld [vmem:[%s11054_s6 + $0x128] sm:$0xff]  ;;  %v9657_v34 = vpop.permute.xlu0 %3771  ;;  %v7558_v33 = vld [vmem:[%s11054_s6 + $0x170] sm:$0xff] }
 0x3ee   : > { %4455 = vperm.xlu0 %8636, %v7538_v16   ;;  %8012 = vmatprep.mubr.msk.f32.mxu1 %vm1032_vm9, %v2057_v50  ;;  %11108 = vst [vmem:[#allocation16_spill] sm:$0xff] %v9657_v34  ;;  %v7559_v50 = vld [vmem:[%s11054_s6 + $0x178] sm:$0xff]  ;;  %v7562_v20 = vld [vmem:[%s11054_s6 + $0x2f0] sm:$0xff] }
 0x3ef   : > { %8379 = vmatpush3.bf16.xpose.msk.msra.mxu1 %vm9397_vm10, %v8374_v14  ;;  %v8402_v37 = vpack.c.bf16 %v2810_v53, %v2809_v29 }
 0x3f0   : > { %8390 = vmatprep.subr.msk.bf16.mxu1 %vm9397_vm10, %v8388_v26  ;;  %4747 = vperm.xlu1 %8637, %v659_v15  }
 0x3f1   : > { %8087 = vmatmul.mubr.msk.f32.vlgmr.msra.gmra.mrb[20].mxu0 %vm751_vm0, %v656_v52  ;;  %8013 = vmatmul.mubr.msk.f32.gmra.mrb[10].mxu1 %vm1032_vm9, %v9451_v54  ;;  %v9680_v55 = vpop.permute.xlu0 %3786 }
 0x3f2   : > { %4502 = vperm.xlu0 %8636, %v7540_v22   ;;  %8030 = vmatprep.mubr.msk.f32.mxu1 %vm1032_vm9, %v9483_v63 }
 0x3f3   : > { %8089 = vmatprep.mubr.msk.f32.mxu0 %vm751_vm0, %v657_v28 }
 0x3f4   : > { %4757 = vperm.xlu1 %8637, %v661_v27  }
 0x3f5   : > { %8090 = vmatmul.mubr.msk.f32.gmra.mrb[22].mxu0 %vm751_vm0, %v658_v60  ;;  %v9698_v58 = vpop.permute.xlu0 %3796 }
 0x3f6   : > { %8031 = vmatmul.mubr.msk.f32.vlgmr.msra.gmra.mrb[8].mxu1 %vm1032_vm9, %v9429_v5  ;;  %4752 = vperm.xlu0 %8636, %v660_v30   ;;  %11110 = vst [vmem:[#allocation18_spill] sm:$0xff] %v9698_v58 }
 0x3f7   : > { %8033 = vmatprep.mubr.msk.f32.mxu1 %vm1032_vm9, %v2309_v62  ;;  %8393 = vmatpush3.bf16.xpose.msk.msra.mxu1 %vm9397_vm10, %v8388_v26  ;;  %v7563_v26 = vld [vmem:[%s11054_s6 + $0x2f8] sm:$0xff] }
 0x3f8   : > { %8404 = vmatprep.subr.msk.bf16.mxu1 %vm9397_vm10, %v8402_v37  ;;  %4507 = vperm.xlu1 %8637, %v7541_v43  }
 0x3f9   : > { %v9716_v61 = vpop.permute.xlu0 %3819 }
 0x3fa   : > { %8034 = vmatmul.mubr.msk.f32.gmra.mrb[10].mxu1 %vm1032_vm9, %v9451_v54  ;;  %4762 = vperm.xlu0 %8636, %v662_v24   ;;  %v9669_v54 = vpop.permute.xlu1 %3776 }
 0x3fb   : > { %8051 = vmatprep.mubr.msk.f32.mxu1 %vm1032_vm9, %v9483_v63  ;;  %11109 = vst [vmem:[#allocation17_spill] sm:$0xff] %v9669_v54 }
 0x3fc   : > { %4535 = vperm.xlu1 %8637, %v7544_v31  }
 0x3fd   : > { %v9729_v14 = vpop.permute.xlu0 %3829 }
 0x3fe   : > { %8052 = vmatmul.mubr.msk.f32.vlgmr.msra.gmra.mrb[8].mxu1 %vm1032_vm9, %v9429_v5  ;;  %4512 = vperm.xlu0 %8636, %v7542_v18   ;;  %v9691_v19 = vpop.permute.xlu1 %3791  ;;  %11112 = vst [vmem:[#allocation20_spill] sm:$0xff] %v9729_v14 }
 0x3ff   : > { %8054 = vmatprep.mubr.msk.f32.mxu1 %vm1032_vm9, %v9436_v49  ;;  %8407 = vmatpush3.bf16.xpose.msk.msra.mxu1 %vm9397_vm10, %v8402_v37 }
 0x400   : > { %4517 = vperm.xlu1 %8637, %v7543_v39  }
 0x401   : > { %v9742_v46 = vpop.permute.xlu0 %3872 }
 0x402   : > { %8055 = vmatmul.mubr.msk.f32.gmra.mrb[10].mxu1 %vm1032_vm9, %v2562_v51  ;;  %4540 = vperm.xlu0 %8636, %v7545_v23  }
 0x403   : > { %8072 = vmatprep.mubr.msk.f32.mxu1 %vm1032_vm9, %v9483_v63  ;;  %v7546_v63 = vld [vmem:[%s11054_s6 + $0x2b0] sm:$0xff] }
 0x404   : > { %4597 = vperm.xlu1 %8637, %v7549_v38  }
 0x405   : > { %v9755_v15 = vpop.permute.xlu0 %3882 }
 0x406   : > { %8073 = vmatmul.mubr.msk.f32.vlgmr.msra.gmra.mrb[8].mxu1 %vm1032_vm9, %v9429_v5  ;;  %4592 = vperm.xlu0 %8636, %v7548_v56   ;;  %v9711_v5 = vpop.permute.xlu1 %3801  ;;  %11114 = vst [vmem:[#allocation22_spill] sm:$0xff] %v9755_v15 }
 0x407   : > { %8075 = vmatprep.mubr.msk.f32.mxu1 %vm1032_vm9, %v9436_v49  ;;  %11111 = vst [vmem:[#allocation19_spill] sm:$0xff] %v9711_v5  ;;  %v7552_v49 = vld [vmem:[%s11054_s6 + $0x2c0] sm:$0xff] }
 0x408   : > { %4550 = vperm.xlu1 %8637, %v7547_v57  }
 0x409   : > { %v9768_v22 = vpop.permute.xlu0 %3905 }
 0x40a   : > { %8076 = vmatmul.mubr.msk.f32.gmra.mrb[10].mxu1 %vm1032_vm9, %v2814_v59  ;;  %4545 = vperm.xlu0 %8636, %v7546_v63   ;;  %v9724_v42 = vpop.permute.xlu1 %3824 }
 0x40c   : > { %4630 = vperm.xlu1 %8637, %v7553_v44  }
 0x40d   : > { %v9772_v27 = vpop.permute.xlu0 %3915 }
 0x40e   : > { %4625 = vperm.xlu0 %8636, %v7552_v49   ;;  %v9737_v4 = vpop.permute.xlu1 %3834  ;;  %11116 = vst [vmem:[#allocation24_spill] sm:$0xff] %v9772_v27 }
 0x40f   : > { %11113 = vst [vmem:[#allocation21_spill] sm:$0xff] %v9737_v4 }
 0x410   : > { %4607 = vperm.xlu1 %8637, %v7551_v45  }
 0x411   : > { %v9776_v29 = vpop.permute.xlu0 %3962 }
 0x412   : > { %4602 = vperm.xlu0 %8636, %v7550_v0   ;;  %v9750_v16 = vpop.permute.xlu1 %3877 }
 0x414   : > { %4687 = vperm.xlu1 %8637, %v7557_v13  }
 0x415   : > { %v9780_v30 = vpop.permute.xlu0 %3972 }
 0x416   : > { %4682 = vperm.xlu0 %8636, %v7556_v3   ;;  %v9763_v52 = vpop.permute.xlu1 %3887  ;;  %11118 = vst [vmem:[#allocation26_spill] sm:$0xff] %v9780_v30 }
 0x417   : > { %11115 = vst [vmem:[#allocation23_spill] sm:$0xff] %v9763_v52 }
 0x418   : > { %4640 = vperm.xlu1 %8637, %v7555_v25  }
 0x419   : > { %v9784_v43 = vpop.permute.xlu0 %3995 }
 0x41a   : > { %4635 = vperm.xlu0 %8636, %v7554_v9   ;;  %v9770_v28 = vpop.permute.xlu1 %3910 }
 0x41c   : > { %4720 = vperm.xlu1 %8637, %v7561_v8  }
 0x41d   : > { %v9788_v24 = vpop.permute.xlu0 %4005 }
 0x41e   : > { %4715 = vperm.xlu0 %8636, %v7560_v10   ;;  %v9774_v60 = vpop.permute.xlu1 %3920  ;;  %11120 = vst [vmem:[#allocation28_spill] sm:$0xff] %v9788_v24 }
 0x41f   : > { %11117 = vst [vmem:[#allocation25_spill] sm:$0xff] %v9774_v60 }
 0x420   : > { %4697 = vperm.xlu1 %8637, %v7559_v50  }
 0x421   : > { %v9792_v18 = vpop.permute.xlu0 %4052 }
 0x422   : > { %4692 = vperm.xlu0 %8636, %v7558_v33   ;;  %v9778_v53 = vpop.permute.xlu1 %3967  ;;  %11122 = vst [vmem:[#allocation30_spill] sm:$0xff] %v9792_v18 }
 0x424   : > { %4730 = vperm.xlu1 %8637, %v7563_v26  }
 0x425   : > { %v9796_v23 = vpop.permute.xlu0 %4062 }
 0x426   : > { %4725 = vperm.xlu0 %8636, %v7562_v20   ;;  %v9782_v62 = vpop.permute.xlu1 %3977  ;;  %11123 = vst [vmem:[#allocation31_spill] sm:$0xff] %v9796_v23 }
 0x427   : > { %11119 = vst [vmem:[#allocation27_spill] sm:$0xff] %v9782_v62 }
 0x429   : > { %v9800_v38 = vpop.permute.xlu0 %4085 }
 0x42a   : > { %v9786_v37 = vpop.permute.xlu1 %4000  ;;  %11125 = vst [vmem:[#allocation33_spill] sm:$0xff] %v9800_v38 }
 0x42d   : > { %v9804_v57 = vpop.permute.xlu0 %4095 }
 0x42e   : > { %v9790_v31 = vpop.permute.xlu1 %4010  ;;  %11126 = vst [vmem:[#allocation34_spill] sm:$0xff] %v9804_v57 }
 0x42f   : > { %11121 = vst [vmem:[#allocation29_spill] sm:$0xff] %v9790_v31 }
 0x431   : > { %v9808_v59 = vpop.permute.xlu0 %4142 }
 0x432   : > { %v9794_v39 = vpop.permute.xlu1 %4057  ;;  %11128 = vst [vmem:[#allocation36_spill] sm:$0xff] %v9808_v59 }
 0x435   : > { %v9812_v49 = vpop.permute.xlu0 %4152 }
 0x436   : > { %v9798_v51 = vpop.permute.xlu1 %4067  ;;  %11129 = vst [vmem:[#allocation37_spill] sm:$0xff] %v9812_v49 }
 0x437   : > { %11124 = vst [vmem:[#allocation32_spill] sm:$0xff] %v9798_v51 }
 0x439   : > { %v9816_v0 = vpop.permute.xlu0 %4175 }
 0x43a   : > { %v9802_v56 = vpop.permute.xlu1 %4090  ;;  %11131 = vst [vmem:[#allocation39_spill] sm:$0xff] %v9816_v0  ;;  %v11087_v0 = vmov 1326507024  }
 0x43d   : > { %v9820_v3 = vpop.permute.xlu0 %4185 }
 0x43e   : > { %v9806_v63 = vpop.permute.xlu1 %4100  ;;  %11132 = vst [vmem:[#allocation40_spill] sm:$0xff] %v9820_v3 }
 0x43f   : > { %11127 = vst [vmem:[#allocation35_spill] sm:$0xff] %v9806_v63 }
 0x441   : > { %v9824_v9 = vpop.permute.xlu0 %4232 }
 0x442   : > { %v9810_v44 = vpop.permute.xlu1 %4147  ;;  %11134 = vst [vmem:[#allocation42_spill] sm:$0xff] %v9824_v9 }
 0x445   : > { %v9828_v10 = vpop.permute.xlu0 %4242 }
 0x446   : > { %v9814_v45 = vpop.permute.xlu1 %4157  ;;  %11135 = vst [vmem:[#allocation43_spill] sm:$0xff] %v9828_v10 }
 0x447   : > { %11130 = vst [vmem:[#allocation38_spill] sm:$0xff] %v9814_v45 }
 0x449   : > { %v9832_v33 = vpop.permute.xlu0 %4265 }
 0x44a   : > { %v9818_v13 = vpop.permute.xlu1 %4180  ;;  %11137 = vst [vmem:[#allocation45_spill] sm:$0xff] %v9832_v33 }
 0x44d   : > { %v9836_v20 = vpop.permute.xlu0 %4275 }
 0x44e   : > { %v9822_v25 = vpop.permute.xlu1 %4190  ;;  %11138 = vst [vmem:[#allocation46_spill] sm:$0xff] %v9836_v20 }
 0x44f   : > { %11133 = vst [vmem:[#allocation41_spill] sm:$0xff] %v9822_v25 }
 0x451   : > { %v9840_v17 = vpop.permute.xlu0 %4322 }
 0x452   : > { %v9826_v8 = vpop.permute.xlu1 %4237  ;;  %11140 = vst [vmem:[#allocation48_spill] sm:$0xff] %v9840_v17  ;;  %v11157_v17 = vmov 683565275  }
 0x455   : > { %v9844_v41 = vpop.permute.xlu0 %4332 }
 0x456   : > { %v9830_v50 = vpop.permute.xlu1 %4247  ;;  %11142 = vst [vmem:[#allocation50_spill] sm:$0xff] %v9844_v41 }
 0x457   : > { %11136 = vst [vmem:[#allocation44_spill] sm:$0xff] %v9830_v50 }
 0x459   : > { %v9848_v3 = vpop.permute.xlu0 %4355 }
 0x45a   : > { %v9834_v26 = vpop.permute.xlu1 %4270  ;;  %11144 = vst [vmem:[#allocation52_spill] sm:$0xff] %v9848_v3 }
 0x45d   : > { %v9852_v49 = vpop.permute.xlu0 %4365 }
 0x45e   : > { %v9838_v47 = vpop.permute.xlu1 %4280  ;;  %11146 = vst [vmem:[#allocation54_spill] sm:$0xff] %v9852_v49 }
 0x45f   : > { %11139 = vst [vmem:[#allocation47_spill] sm:$0xff] %v9838_v47 }
 0x461   : > { %v9856_v23 = vpop.permute.xlu0 %4412 }
 0x462   : > { %v9842_v40 = vpop.permute.xlu1 %4327  ;;  %11148 = vst [vmem:[#allocation56_spill] sm:$0xff] %v9856_v23 }
 0x463   : > { %11141 = vst [vmem:[#allocation49_spill] sm:$0xff] %v9842_v40 }
 0x465   : > { %v9860_v24 = vpop.permute.xlu0 %4422 }
 0x466   : > { %v9846_v21 = vpop.permute.xlu1 %4337  ;;  %11150 = vst [vmem:[#allocation58_spill] sm:$0xff] %v9860_v24 }
 0x467   : > { %11143 = vst [vmem:[#allocation51_spill] sm:$0xff] %v9846_v21 }
 0x469   : > { %v9864_v27 = vpop.permute.xlu0 %4445 }
 0x46a   : > { %v9850_v10 = vpop.permute.xlu1 %4360  ;;  %11152 = vst [vmem:[#allocation60_spill] sm:$0xff] %v9864_v27 }
 0x46b   : > { %11145 = vst [vmem:[#allocation53_spill] sm:$0xff] %v9850_v10 }
 0x46d   : > { %v9868_v15 = vpop.permute.xlu0 %4455 }
 0x46e   : > { %v9854_v57 = vpop.permute.xlu1 %4370  ;;  %11154 = vst [vmem:[#allocation62_spill] sm:$0xff] %v9868_v15 }
 0x46f   : > { %11147 = vst [vmem:[#allocation55_spill] sm:$0xff] %v9854_v57 }
 0x471   : > { %v9872_v34 = vpop.permute.xlu0 %4502 }
 0x472   : > { %v9858_v20 = vpop.permute.xlu1 %4417  ;;  %11156 = vst [vmem:[#allocation64_spill] sm:$0xff] %v9872_v34 }
 0x473   : > { %11149 = vst [vmem:[#allocation57_spill] sm:$0xff] %v9858_v20 }
 0x475   : > { %v4753_v47 = vpop.permute.xlu0 %4752 }
 0x476   : > { %v9862_v30 = vpop.permute.xlu1 %4427 }
 0x477   : > { %11151 = vst [vmem:[#allocation59_spill] sm:$0xff] %v9862_v30 }
 0x479   : > { %v4763_v51 = vpop.permute.xlu0 %4762 }
 0x47a   : > { %v9866_v41 = vpop.permute.xlu1 %4450 }
 0x47b   : > { %11153 = vst [vmem:[#allocation61_spill] sm:$0xff] %v9866_v41 }
 0x47e   : > { %v9870_v14 = vpop.permute.xlu1 %4460 }
 0x47f   : > { %11155 = vst [vmem:[#allocation63_spill] sm:$0xff] %v9870_v14 }
 0x482   : > { %v4748_v58 = vpop.permute.xlu1 %4747 }
 0x486   : > { %v4758_v63 = vpop.permute.xlu1 %4757 }
 0x4c4   : > { %v8088_v49 = vpop.f32.mrb[20].mxu0 }
 0x4c5   : > { %v4843_v57 = vpop.f32.mrb[21].mxu0  ;;  %v4849_v50 = vadd.f32 %v8088_v49, %v4753_v47 }
 0x4c6   : > { %v4844_v21 = vadd.f32 %v4843_v57, %v4748_v58 }
 0x4c7   : > { %v9876_v15 = vmul.f32 0.0, %v4849_v50  ;;  %v5359_v60 = vmul.f32 %v9018_v1, %v4849_v50 }
 0x4c8   : > { %v4862_v24 = vmul.f32 %v8983_v36, %v4844_v21  ;;  %v5007_v30 = vmul.f32 %v8980_v35, %v4844_v21  ;;  %v8091_v25 = vpop.f32.mrb[22].mxu0  ;;  %v5611_v36 = vmul.f32 %v9021_v2, %v4849_v50 }
 0x4c9   : > { %v4853_v45 = vpop.f32.mrb[23].mxu0  ;;  %v9880_v58 = vadd.f32 %v8091_v25, %v4763_v51 }
 0x4ca   : > { %5011 = vxpose.xlu0.b32.start [1/4] (short) (narrow) %v5007_v30, 16  ;;  %4866 = vxpose.xlu1.b32.start [1/4] (short) (narrow) %v4862_v24, 16  ;;  %v4854_v14 = vadd.f32 %v4853_v45, %v4758_v63  ;;  %v9891_v24 = vmul.f32 0.0, %v4844_v21 }
 0x4cb   : > { %v9887_v30 = vmul.f32 0.0, %v9880_v58 }
 0x4cc   : > { %v9882_v47 = vmul.f32 0.0, %v4854_v14 }
 0x4ce   : > { %4867 = vxpose.xlu1.b32.cont [2/4] (short) (narrow) %v9876_v15, 16  ;;  %5012 = vxpose.xlu0.b32.cont [2/4] (short) (narrow) %v9876_v15, 16 }
 0x4d2   : > { %4868 = vxpose.xlu1.b32.cont [3/4] (short) (narrow) %v9882_v47, 16  ;;  %5013 = vxpose.xlu0.b32.cont [3/4] (short) (narrow) %v9882_v47, 16 }
 0x4d6   : > { %4869 = vxpose.xlu1.b32.end [4/4] (short) (narrow) %v9887_v30, 16  ;;  %5014 = vxpose.xlu0.b32.end [4/4] (short) (narrow) %v9887_v30, 16 }
 0x4d9   : > { %v8074_v57 = vpop.f32.mrb[8].mxu1 }
 0x4da   : > { %v9893_v63 = vmul.f32 0.2617994, %v8074_v57  ;;  %v2899_v51 = vpop.f32.mrb[9].mxu1  ;;  %5614 = vxpose.xlu1.b32.start [1/4] (short) (narrow) %v9891_v24, 16  ;;  %5362 = vxpose.xlu0.b32.start [1/4] (short) (narrow) %v9891_v24, 16 }
 0x4db   : > { %v9897_v49 = vmul.f32 0.2617994, %v2899_v51 }
 0x4dc   : > { %v11073_v45 = vand.u32 2147483647, %v9893_v63  ;;  %v3033_v25 = vand.u32 2139095040, %v9893_v63 }
 0x4dd   : > { %v11072_v35 = vand.u32 2147483647, %v9897_v49  ;;  %v2929_v21 = vand.u32 2139095040, %v9897_v49  ;;  %v8077_v31 = vpop.f32.mrb[10].mxu1 }
 0x4de   : > { %v3034_v57 = vshrl.u32 %v3033_v25, 23  ;;  %v9904_v62 = vpop.f32.mrb[11].mxu1  ;;  %v3037_v51 = vand.u32 8388607, %v11073_v45  ;;  %5615 = vxpose.xlu1.b32.cont [2/4] (short) (narrow) %v5611_v36, 16  ;;  %5363 = vxpose.xlu0.b32.cont [2/4] (short) (narrow) %v5359_v60, 16  ;;  %v9917_v36 = vmul.f32 %v9029_v6, %v4854_v14 }
 0x4df   : > { %v2930_v52 = vshrl.u32 %v2929_v21, 23  ;;  %v2933_v4 = vand.u32 8388607, %v11072_v35  ;;  %v9911_v2 = vmul.f32 0.2617994, %v8077_v31 }
 0x4e0   : > { %v7444_v54 = vadd.s32 4294967169, %v3034_v57  ;;  %v3038_v27 = vor.u32 8388608, %v3037_v51  ;;  %v11085_v6 = vmov 920167782  }
 0x4e1   : > { %v7440_v5 = vadd.s32 4294967169, %v2930_v52  ;;  %v2934_v25 = vor.u32 8388608, %v2933_v4  ;;  %v3241_v3 = vand.u32 2139095040, %v9911_v2 }
 0x4e2   : > { %v3040_v34 = vadd.s32 1, %v7444_v54  ;;  %5616 = vxpose.xlu1.b32.cont [3/4] (short) (narrow) %v9882_v47, 16  ;;  %5364 = vxpose.xlu0.b32.cont [3/4] (short) (narrow) %v9882_v47, 16  ;;  %v6116_v54 = vmul.f32 %v9032_v7, %v4854_v14  ;;  %v9920_v4 = vshll.u32 %v3038_v27, 8  ;;  %v11081_v14 = vmov 2131351028  }
 0x4e3   : > { %v2936_v23 = vadd.s32 1, %v7440_v5  ;;  %v3242_v21 = vshrl.u32 %v3241_v3, 23  ;;  %v9924_v57 = vshll.u32 %v2934_v25, 8  ;;  %v11077_v3 = vmov 683565275  }
 0x4e4   : > { %vm3041_vm11 = vcmp.gt.s32.totalorder %v3040_v34, 0  ;;  %v11083_v7 = vmov 2102212464  }
 0x4e5   : > { %v3042_v50 = vsel %vm3041_vm11, %v3040_v34, 0  ;;  %vm2937_vm12 = vcmp.gt.s32.totalorder %v2936_v23, 0  ;;  %v9930_v45 = vadd.s32 4294967169, %v3242_v21  ;;  %vm3032_vm11 = vcmp.lt.s32.totalorder %v9893_v63, 0 }
 0x4e6   : > { %v3043_v31 = vshrl.u32 %v3042_v50, 5  ;;  %v3044_v52 = vand.u32 31, %v3042_v50  ;;  %v2938_v60 = vsel %vm2937_vm12, %v2936_v23, 0  ;;  %5617 = vxpose.xlu1.b32.end [4/4] (short) (narrow) %v9887_v30, 16  ;;  %v11079_v50 = vmov 2475754826  }
 0x4e7   : > { %v9922_v5 = vshrl.u32 %v2938_v60, 5  ;;  %v9928_v35 = vand.u32 31, %v2938_v60  ;;  %5365 = vxpose.xlu0.b32.end [4/4] (short) (narrow) %v9887_v30, 16 }
 0x4e8   : > { %v3045_v34 = vsub.s32 32, %v3044_v52  ;;  %v3047_v51 = vshll.u32 %v11077_v3, %v3044_v52  ;;  %v3050_v23 = vshll.u32 %v11079_v50, %v3044_v52  ;;  %v3053_v27 = vshll.u32 %v11081_v14, %v3044_v52 }
 0x4e9   : > { %v3056_v25 = vshll.u32 %v11083_v7, %v3044_v52  ;;  %v3059_v1 = vshll.u32 %v11085_v6, %v3044_v52  ;;  %vm3062_vm13 = vcmp.lt.s32.totalorder %v3043_v31, 1  ;;  %vm3063_vm14 = vcmp.lt.s32.totalorder %v3043_v31, 2 }
 0x4ea   : > { %v3048_v3 = vshrl.u32 %v11079_v50, %v3045_v34  ;;  %v3051_v60 = vshrl.u32 %v11081_v14, %v3045_v34  ;;  %v3054_v21 = vshrl.u32 %v11083_v7, %v3045_v34  ;;  %v3046_v33 = vshrl.u32 %v11157_v17, %v3045_v34  ;;  %6118 = vxpose.xlu1.b32.start [1/4] (short) (narrow) %v9891_v24, 16 }
 0x4eb   : > { %v3057_v9 = vshrl.u32 %v11085_v6, %v3045_v34  ;;  %v3060_v59 = vshrl.u32 %v11087_v0, %v3045_v34  ;;  %v2941_v50 = vsub.s32 32, %v9928_v35  ;;  %vm3064_vm15 = vcmp.lt.s32.totalorder %v3043_v31, 3  ;;  %5866 = vxpose.xlu0.b32.start [1/4] (short) (narrow) %v9891_v24, 16 }
 0x4ec   : > { %v3049_v52 = vor.u32 %v3048_v3, %v3047_v51  ;;  %v3052_v38 = vor.u32 %v3051_v60, %v3050_v23  ;;  %v3055_v41 = vor.u32 %v3054_v21, %v3053_v27  ;;  %vm3065_vm1 = vcmp.lt.s32.totalorder %v3043_v31, 4 }
 0x4ed   : > { %v3058_v20 = vor.u32 %v3057_v9, %v3056_v25  ;;  %v3061_v14 = vor.u32 %v3060_v59, %v3059_v1  ;;  %v2943_v51 = vshll.u32 %v11157_v17, %v9928_v35  ;;  %v11158_v9 = vmov 2475754826  }
 0x4ee   : > { %v3066_v7 = vsel %vm3062_vm13, %v3046_v33, %v3049_v52  ;;  %v3067_v6 = vsel %vm3065_vm1, %v3055_v41, 2102212464  ;;  %v3070_v18 = vsel %vm3062_vm13, %v3049_v52, %v3052_v38  ;;  %v3074_v34 = vsel %vm3062_vm13, %v3052_v38, %v3055_v41  ;;  %6119 = vxpose.xlu1.b32.cont [2/4] (short) (narrow) %v9876_v15, 16 }
 0x4ef   : > { %v3068_v0 = vsel %vm3064_vm15, %v3052_v38, %v3067_v6  ;;  %v3071_v10 = vsel %vm3065_vm1, %v3058_v20, 920167782  ;;  %v3075_v3 = vsel %vm3065_vm1, %v3061_v14, 1326507024  ;;  %v2944_v23 = vshrl.u32 %v11158_v9, %v2941_v50  ;;  %5867 = vxpose.xlu0.b32.cont [2/4] (short) (narrow) %v9876_v15, 16 }
 0x4f0   : > { %v3072_v1 = vsel %vm3064_vm15, %v3055_v41, %v3071_v10  ;;  %v3076_v59 = vsel %vm3064_vm15, %v3058_v20, %v3075_v3  ;;  %v2946_v33 = vshll.u32 %v11158_v9, %v9928_v35  ;;  %v3069_v27 = vsel %vm3063_vm14, %v3066_v7, %v3068_v0 }
 0x4f1   : > { %v3073_v25 = vsel %vm3063_vm14, %v3070_v18, %v3072_v1  ;;  %v3077_v6 = vsel %vm3063_vm14, %v3074_v34, %v3076_v59  ;;  %v11159_v38 = vmov 2131351028   ;;  %v2945_v20 = vor.u32 %v2944_v23, %v2943_v51 }
 0x4f2   : > { %v2947_v14 = vshrl.u32 %v11159_v38, %v2941_v50  ;;  %v9961_v60 = vmul.u32.u64.low %v9920_v4, %v3077_v6  ;;  %v9962_v21 = vmul.u32.u64.high %v9920_v4, %v3077_v6, %v9961_v60  ;;  %v2949_v7 = vshll.u32 %v11159_v38, %v9928_v35  ;;  %6120 = vxpose.xlu1.b32.cont [3/4] (short) (narrow) %v6116_v54, 16 }
 0x4f3   : > { %v9965_v41 = vmul.u32.u64.low %v9920_v4, %v3073_v25  ;;  %v9966_v10 = vmul.u32.u64.high %v9920_v4, %v3073_v25, %v9965_v41  ;;  %v11160_v18 = vmov 2102212464   ;;  %v2942_v31 = vshrl.u32 %v11157_v17, %v2941_v50  ;;  %5868 = vxpose.xlu0.b32.cont [3/4] (short) (narrow) %v9917_v36, 16 }
 0x4f4   : > { %v2948_v52 = vor.u32 %v2947_v14, %v2946_v33  ;;  %v2950_v0 = vshrl.u32 %v11160_v18, %v2941_v50  ;;  %v2952_v34 = vshll.u32 %v11160_v18, %v9928_v35  ;;  %v11161_v3 = vmov 920167782  }
 0x4f5   : > { %v2953_v1 = vshrl.u32 %v11161_v3, %v2941_v50  ;;  %v11162_v59 = vmov 1326507024   ;;  %v3085_v25 = vmul.u32 %v9920_v4, %v3069_v27  ;;  %v2955_v51 = vshll.u32 %v11161_v3, %v9928_v35 }
 0x4f6   : > { %v2956_v6 = vshrl.u32 %v11162_v59, %v2941_v50  ;;  %v2951_v60 = vor.u32 %v2950_v0, %v2949_v7  ;;  %vm2958_vm2 = vcmp.lt.s32.totalorder %v9922_v5, 1  ;;  %vm3087_vm3 = vc.u32 %v9962_v21, %v9965_v41  ;;  %6121 = vxpose.xlu1.b32.end [4/4] (short) (narrow) %v9887_v30, 16 }
 0x4f7   : > { %v3088_v54 = vadd.s32 1, %v9966_v10  ;;  %v2954_v23 = vor.u32 %v2953_v1, %v2952_v34  ;;  %vm2959_vm4 = vcmp.lt.s32.totalorder %v9922_v5, 2  ;;  %vm2960_vm5 = vcmp.lt.s32.totalorder %v9922_v5, 3  ;;  %5869 = vxpose.xlu0.b32.end [4/4] (short) (narrow) %v9887_v30, 16 }
 0x4f8   : > { %v2957_v33 = vor.u32 %v2956_v6, %v2955_v51  ;;  %vm2961_vm6 = vcmp.lt.s32.totalorder %v9922_v5, 4  ;;  %v2966_v35 = vsel %vm2958_vm2, %v2945_v20, %v2948_v52  ;;  %v2970_v27 = vsel %vm2958_vm2, %v2948_v52, %v2951_v60 }
 0x4f9   : > { %v3089_v36 = vsel %vm3087_vm3, %v3088_v54, %v9966_v10  ;;  %v2963_v4 = vsel %vm2961_vm6, %v2951_v60, 2102212464  ;;  %v2967_v50 = vsel %vm2961_vm6, %v2954_v23, 920167782  ;;  %v2962_v7 = vsel %vm2958_vm2, %v2942_v31, %v2945_v20 }
 0x4fa   : > { %v3090_v14 = vadd.s32 %v3089_v36, %v3085_v25  ;;  %v2968_v0 = vsel %vm2960_vm5, %v2951_v60, %v2967_v50  ;;  %v2971_v34 = vsel %vm2961_vm6, %v2957_v33, 1326507024  ;;  %v2964_v1 = vsel %vm2960_vm5, %v2948_v52, %v2963_v4  ;;  %6622 = vxpose.xlu1.b32.start [1/4] (short) (narrow) %v9891_v24, 16 }
 0x4fb   : > { %v2969_v6 = vsel %vm2959_vm4, %v2966_v35, %v2968_v0  ;;  %v2972_v51 = vsel %vm2960_vm5, %v2954_v23, %v2971_v34  ;;  %v3248_v10 = vadd.s32 1, %v9930_v45  ;;  %v2965_v45 = vsel %vm2959_vm4, %v2962_v7, %v2964_v1  ;;  %6370 = vxpose.xlu0.b32.start [1/4] (short) (narrow) %v9891_v24, 16 }
 0x4fc   : > { %v3091_v54 = vadd.s32 536870912, %v3090_v14  ;;  %v2973_v40 = vsel %vm2959_vm4, %v2970_v27, %v2972_v51  ;;  %v10003_v25 = vmul.u32.u64.low %v9924_v57, %v2969_v6  ;;  %v10004_v36 = vmul.u32.u64.high %v9924_v57, %v2969_v6, %v10003_v25 }
 0x4fd   : > { %v10009_v30 = vmul.u32.u64.low %v9924_v57, %v2973_v40  ;;  %v10010_v20 = vmul.u32.u64.high %v9924_v57, %v2973_v40, %v10009_v30  ;;  %vm3249_vm7 = vcmp.gt.s32.totalorder %v3248_v10, 0  ;;  %v11089_v35 = vand.u32 2147483647, %v9911_v2 }
 0x4fe   : > { %v10012_v52 = vshrl.u32 %v3091_v54, 30  ;;  %v3250_v31 = vsel %vm3249_vm7, %v3248_v10, 0  ;;  %v2984_v33 = vadd.s32 1, %v10004_v36  ;;  %6623 = vxpose.xlu1.b32.cont [2/4] (short) (narrow) %v9876_v15, 16  ;;  %v2981_v40 = vmul.u32 %v9924_v57, %v2965_v45 }
 0x4ff   : > { %v3252_v60 = vand.u32 31, %v3250_v31  ;;  %vm2983_vm8 = vc.u32 %v10010_v20, %v10003_v25  ;;  %6371 = vxpose.xlu0.b32.cont [2/4] (short) (narrow) %v9876_v15, 16  ;;  %v10031_v0 = vmul.f32 0.2617994, %v9904_v62  ;;  %v3245_v34 = vand.u32 8388607, %v11089_v35 }
 0x500   : > { %v3093_v23 = vshll.u32 %v10012_v52, 30  ;;  %v2985_v50 = vsel %vm2983_vm8, %v2984_v33, %v10004_v36  ;;  %v6621_v62 = vmul.f32 %v9045_v12, %v9880_v58  ;;  %vm2928_vm14 = vcmp.lt.s32.totalorder %v9897_v49, 0 }
 0x501   : > { %v3253_v4 = vsub.s32 32, %v3252_v60  ;;  %v2986_v24 = vadd.s32 %v2985_v50, %v2981_v40  ;;  %v3255_v27 = vshll.u32 %v11157_v17, %v3252_v60  ;;  %v3261_v51 = vshll.u32 %v11159_v38, %v3252_v60 }
 0x502   : > { %v10024_v5 = vsub.s32 %v3090_v14, %v3093_v23  ;;  %v3258_v14 = vshll.u32 %v11158_v9, %v3252_v60  ;;  %6624 = vxpose.xlu1.b32.cont [3/4] (short) (narrow) %v9882_v47, 16  ;;  %v6369_v23 = vmul.f32 %v9042_v11, %v9880_v58  ;;  %v3246_v40 = vor.u32 8388608, %v3245_v34 }
 0x503   : > { %v3256_v7 = vshrl.u32 %v11158_v9, %v3253_v4  ;;  %v3259_v1 = vshrl.u32 %v11159_v38, %v3253_v4  ;;  %v2987_v15 = vadd.s32 536870912, %v2986_v24  ;;  %v3262_v10 = vshrl.u32 %v11160_v18, %v3253_v4  ;;  %6372 = vxpose.xlu0.b32.cont [3/4] (short) (narrow) %v9882_v47, 16 }
 0x504   : > { %v3096_v57 = vsub.s32 0, %v10024_v5  ;;  %v3116_v58 = vsub.s32 4, %v10012_v52  ;;  %v10068_v35 = vshll.u32 %v3246_v40, 8 }
 0x505   : > { %v3257_v6 = vor.u32 %v3256_v7, %v3255_v27  ;;  %v10045_v36 = vshrl.u32 %v2987_v15, 30  ;;  %v3260_v30 = vor.u32 %v3259_v1, %v3258_v14  ;;  %v3263_v45 = vor.u32 %v3262_v10, %v3261_v51 }
 0x506   : > { %v7445_v54 = vmin.u32 %v3096_v57, %v10024_v5  ;;  %6625 = vxpose.xlu1.b32.end [4/4] (short) (narrow) %v6621_v62, 16  ;;  %v3264_v27 = vshll.u32 %v11160_v18, %v3252_v60  ;;  %v3265_v7 = vshrl.u32 %v11161_v3, %v3253_v4  ;;  %v3137_v57 = vand.u32 2139095040, %v10031_v0 }
 0x507   : > { %v2989_v50 = vshll.u32 %v10045_v36, 30  ;;  %v3267_v14 = vshll.u32 %v11161_v3, %v3252_v60  ;;  %v3268_v1 = vshrl.u32 %v11162_v59, %v3253_v4  ;;  %6373 = vxpose.xlu0.b32.end [4/4] (short) (narrow) %v6369_v23, 16  ;;  %v3251_v15 = vshrl.u32 %v3250_v31, 5 }
 0x508   : > { %v3098_v33 = vclz %v7445_v54  ;;  %v3266_v51 = vor.u32 %v3265_v7, %v3264_v27  ;;  %v11163_v10 = vand.u32 2147483647, %v9893_v63  ;;  %v3086_v54 = vadd.s32 %v9965_v41, %v9962_v21 }
 0x509   : > { %v10057_v34 = vsub.s32 %v2986_v24, %v2989_v50  ;;  %v3269_v60 = vor.u32 %v3268_v1, %v3267_v14  ;;  %v3138_v24 = vshrl.u32 %v3137_v57, 23  ;;  %v2982_v27 = vadd.s32 %v10003_v25, %v10010_v20 }
 0x50a   : > { %v7446_v47 = vadd.s32 4294967294, %v3098_v33  ;;  %vm10061_vm12 = vcmp.le.f32.partialorder %v11163_v10, 0.7853982  ;;  %v3254_v7 = vshrl.u32 %v11157_v17, %v3253_v4  ;;  %v3117_v21 = vsel %vm3032_vm11, %v3116_v58, %v10012_v52 }
 0x50b   : > { %v2992_v23 = vsub.s32 0, %v10057_v34  ;;  %vm3270_vm15 = vcmp.lt.s32.totalorder %v3251_v15, 1  ;;  %v11166_v10 = vand.u32 2147483647, %v9897_v49  ;;  %vm3271_vm2 = vcmp.lt.s32.totalorder %v3251_v15, 2 }
 0x50c   : > { %vm7447_vm13 = vcmp.lt.s32.totalorder %v7446_v47, 0  ;;  %v3274_v1 = vsel %vm3270_vm15, %v3254_v7, %v3257_v6  ;;  %vm3272_vm3 = vcmp.lt.s32.totalorder %v3251_v15, 3  ;;  %vm3273_vm4 = vcmp.lt.s32.totalorder %v3251_v15, 4 }
 0x50d   : > { %v3101_v33 = vsel %vm7447_vm13, 0, %v7446_v47  ;;  %v7441_v41 = vmin.u32 %v2992_v23, %v10057_v34  ;;  %v3012_v47 = vsub.s32 4, %v10045_v36  ;;  %vm10083_vm1 = vcmp.le.f32.partialorder %v11166_v10, 0.7853982  ;;  %v10098_v10 = vpop.permute.xlu1 %4507 }
 0x50e   : > { %v3102_v50 = vsub.s32 32, %v3101_v33  ;;  %v3106_v31 = vsub.s32 4294967266, %v3101_v33  ;;  %v3103_v40 = vshll.u32 %v10024_v5, %v3101_v33  ;;  %v3275_v58 = vsel %vm3273_vm4, %v3263_v45, 2102212464 }
 0x50f   : > { %v2994_v20 = vclz %v7441_v41  ;;  %v3278_v5 = vsel %vm3270_vm15, %v3257_v6, %v3260_v30  ;;  %v3276_v33 = vsel %vm3272_vm3, %v3260_v30, %v3275_v58  ;;  %v3279_v23 = vsel %vm3273_vm4, %v3266_v51, 920167782 }
 0x510   : > { %v3104_v57 = vshrl.u32 %v3086_v54, %v3102_v50  ;;  %v3107_v14 = vadd.s32 127, %v3106_v31  ;;  %v3282_v50 = vsel %vm3270_vm15, %v3260_v30, %v3263_v45  ;;  %v3119_v7 = vsel %vm10061_vm12, 0, %v3117_v21 }
 0x511   : > { %v7442_v54 = vadd.s32 4294967294, %v2994_v20  ;;  %v3277_v41 = vsel %vm3271_vm2, %v3274_v1, %v3276_v33  ;;  %v3283_v6 = vsel %vm3273_vm4, %v3269_v60, 1326507024  ;;  %v3013_v21 = vsel %vm2928_vm14, %v3012_v47, %v10045_v36 }
 0x512   : > { %v3105_v52 = vor.u32 %v3104_v57, %v3103_v40  ;;  %v3108_v4 = vshll.u32 %v3107_v14, 23  ;;  %v3280_v40 = vsel %vm3272_vm3, %v3263_v45, %v3279_v23  ;;  %v3284_v30 = vsel %vm3272_vm3, %v3266_v51, %v3283_v6 }
 0x513   : > { %vm7443_vm5 = vcmp.lt.s32.totalorder %v7442_v54, 0  ;;  %v3281_v14 = vsel %vm3271_vm2, %v3278_v5, %v3280_v40  ;;  %v3285_v45 = vsel %vm3271_vm2, %v3282_v50, %v3284_v30  ;;  %v3123_v15 = vadd.s32 3, %v3119_v7  ;;  %v10117_v40 = vpop.permute.xlu1 %4535 }
 0x514   : > { %v3109_v31 = vor.u32 4788187, %v3108_v4  ;;  %v3112_v57 = vcvt.s32.f32 %v3105_v52  ;;  %v2997_v58 = vsel %vm7443_vm5, 0, %v7442_v54  ;;  %v7448_v4 = vadd.s32 4294967169, %v3138_v24 }
 0x515   : > { %v2998_v12 = vsub.s32 32, %v2997_v58  ;;  %v3002_v11 = vsub.s32 4294967266, %v2997_v58  ;;  %v2999_v52 = vshll.u32 %v10057_v34, %v2997_v58  ;;  %v11092_v34 = vand.u32 2147483647, %v10031_v0 }
 0x516   : > { %v3110_v20 = vand.u32 2147483647, %v3109_v31  ;;  %v10107_v60 = vmul.u32.u64.low %v10068_v35, %v3285_v45  ;;  %v10108_v5 = vmul.u32.u64.high %v10068_v35, %v3285_v45, %v10107_v60  ;;  %v3015_v31 = vsel %vm10083_vm1, 0, %v3013_v21 }
 0x517   : > { %v3000_v33 = vshrl.u32 %v2982_v27, %v2998_v12  ;;  %v3003_v54 = vadd.s32 127, %v3002_v11  ;;  %v10111_v51 = vmul.u32.u64.low %v10068_v35, %v3281_v14  ;;  %v10112_v24 = vmul.u32.u64.high %v10068_v35, %v3281_v14, %v10111_v51 }
 0x518   : > { %v3113_v1 = vmul.f32 %v3112_v57, %v3110_v20  ;;  %v3144_v36 = vadd.s32 1, %v7448_v4  ;;  %v10119_v57 = vpop.permute.xlu0 %4512  ;;  %v3019_v6 = vadd.s32 3, %v3015_v31  ;;  %v3293_v58 = vmul.u32 %v10068_v35, %v3277_v41  ;;  %v10143_v35 = vpop.permute.xlu1 %4517 }
 0x519   : > { %v3001_v47 = vor.u32 %v3000_v33, %v2999_v52  ;;  %v3004_v50 = vshll.u32 %v3003_v54, 23  ;;  %11169 = vst [vmem:[#allocation65_spill] sm:$0xff] %v10119_v57  ;;  %v10124_v12 = vadd.s32 %v10111_v51, %v10108_v5  ;;  %vm3295_vm6 = vc.u32 %v10108_v5, %v10111_v51 }
 0x51a   : > { %v3114_v23 = vxor.u32 2147483648, %v3113_v1  ;;  %vm3145_vm7 = vcmp.gt.s32.totalorder %v3144_v36, 0  ;;  %v3296_v20 = vadd.s32 1, %v10112_v24  ;;  %v10137_v62 = vand.u32 8388607, %v11092_v34 }
 0x51b   : > { %v3005_v14 = vor.u32 4788187, %v3004_v50  ;;  %v3146_v30 = vsel %vm3145_vm7, %v3144_v36, 0  ;;  %v3008_v21 = vcvt.s32.f32 %v3001_v47  ;;  %v3124_v5 = vand.u32 3, %v3123_v15 }
 0x51c   : > { %v3115_v11 = vsel %vm3032_vm11, %v3114_v23, %v3113_v1  ;;  %v3297_v45 = vsel %vm3295_vm6, %v3296_v20, %v10112_v24  ;;  %v10133_v1 = vand.u32 3, %v3119_v7  ;;  %v3148_v60 = vand.u32 31, %v3146_v30  ;;  %v10145_v41 = vpop.permute.xlu0 %4540 }
 0x51d   : > { %v3118_v27 = vsel %vm10061_vm12, %v9893_v63, %v3115_v11  ;;  %v3006_v4 = vand.u32 2147483647, %v3005_v14  ;;  %v3298_v52 = vadd.s32 %v3297_v45, %v3293_v58  ;;  %v10139_v54 = vand.u32 3, %v3019_v6 }
 0x51e   : > { %8702 = vcosq.f32 %v3118_v27  ;;  %v10141_v51 = vand.u32 3, %v3015_v31  ;;  %v10147_v24 = vshrl.u32 %v3146_v30, 5  ;;  %v3149_v7 = vsub.s32 32, %v3148_v60 }
 0x51f   : > { %8704 = vsinq.f32 %v3118_v27  ;;  %v3009_v33 = vmul.f32 %v3008_v21, %v3006_v4  ;;  %v3299_v23 = vadd.s32 536870912, %v3298_v52  ;;  %v3151_v36 = vshll.u32 %v11157_v17, %v3148_v60 }
 0x520   : > { %v3154_v50 = vshll.u32 %v11158_v9, %v3148_v60  ;;  %v3157_v15 = vshll.u32 %v11159_v38, %v3148_v60  ;;  %v3160_v11 = vshll.u32 %v11160_v18, %v3148_v60  ;;  %vm3539_vm8 = vcmp.lt.s32.totalorder %v10133_v1, 2 }
 0x521   : > { %v3010_v47 = vxor.u32 2147483648, %v3009_v33  ;;  %v10154_v31 = vshrl.u32 %v3299_v23, 30  ;;  %v3152_v27 = vshrl.u32 %v11158_v9, %v3149_v7  ;;  %v3155_v14 = vshrl.u32 %v11159_v38, %v3149_v7  ;;  %v10183_v23 = vpop.permute.xlu0 %4592 }
 0x522   : > { %v10159_v6 = vshll.u32 %v11161_v3, %v3148_v60  ;;  %vm3122_vm11 = vweird.f32 %v9893_v63  ;;  %v3158_v58 = vshrl.u32 %v11160_v18, %v3149_v7  ;;  %v3161_v30 = vshrl.u32 %v11161_v3, %v3149_v7 }
 0x523   : > { %v3011_v20 = vsel %vm2928_vm14, %v3010_v47, %v3009_v33  ;;  %v10167_v4 = vshrl.u32 %v11162_v59, %v3149_v7  ;;  %v3301_v38 = vshll.u32 %v10154_v31, 30  ;;  %v3150_v21 = vshrl.u32 %v11157_v17, %v3149_v7  ;;  %v10181_v33 = vpop.permute.xlu1 %4597 }
 0x524   : > { %v3014_v9 = vsel %vm10083_vm1, %v9897_v49, %v3011_v20  ;;  %v3153_v45 = vor.u32 %v3152_v27, %v3151_v36  ;;  %vm3240_vm12 = vcmp.lt.s32.totalorder %v9911_v2, 0  ;;  %v10175_v60 = vor.u32 %v3155_v14, %v3154_v50 }
 0x525   : > { %8706 = vcosq.f32 %v3014_v9  ;;  %v10177_v18 = vor.u32 %v3158_v58, %v3157_v15  ;;  %v10179_v3 = vor.u32 %v3161_v30, %v3160_v11  ;;  %v10185_v25 = vsub.s32 %v3298_v52, %v3301_v38 }
 0x526   : > { %8708 = vsinq.f32 %v3014_v9  ;;  %vm3166_vm13 = vcmp.lt.s32.totalorder %v10147_v24, 1  ;;  %vm3540_vm14 = vcmp.eq.s32.totalorder %v10133_v1, 0  ;;  %vm3543_vm15 = vcmp.eq.s32.totalorder %v10133_v1, 2 }
 0x527   : > { %v3170_v47 = vsel %vm3166_vm13, %v3150_v21, %v3153_v45  ;;  %vm3125_vm1 = vcmp.lt.s32.totalorder %v3124_v5, 2  ;;  %vm3129_vm2 = vcmp.eq.s32.totalorder %v3124_v5, 2  ;;  %v3304_v52 = vsub.s32 0, %v10185_v25  ;;  %v10210_v21 = vpop.permute.xlu1 %4550 }
 0x528   : > { %v8703_v59 = vpop.eup %8702  ;;  %vm3126_vm3 = vcmp.eq.s32.totalorder %v3124_v5, 0  ;;  %v10198_v27 = vsel %vm3166_vm13, %v3153_v45, %v10175_v60  ;;  %vm3025_vm4 = vcmp.eq.s32.totalorder %v10139_v54, 2  ;;  %vm3440_vm5 = vcmp.eq.s32.totalorder %v10141_v51, 2  ;;  %11170 = vst [vmem:[#allocation66_spill] sm:$0xff] %v10210_v21  ;;  %v10212_v45 = vpop.permute.xlu0 %4545 }
 0x529   : > { %v8705_v7 = vpop.eup %8704  ;;  %v3130_v36 = vxor.u32 2147483648, %v8703_v59  ;;  %v7453_v58 = vmin.u32 %v3304_v52, %v10185_v25  ;;  %v3324_v30 = vsub.s32 4, %v10154_v31  ;;  %vm3022_vm6 = vcmp.eq.s32.totalorder %v10139_v54, 0  ;;  %11171 = vst [vmem:[#allocation67_spill] sm:$0xff] %v10212_v45 }
 0x52a   : > { %v3127_v50 = vxor.u32 2147483648, %v8705_v7  ;;  %vm3437_vm7 = vcmp.eq.s32.totalorder %v10141_v51, 0 }
 0x52b   : > { %v3131_v15 = vsel %vm3129_vm2, %v3130_v36, %v8705_v7  ;;  %v3545_v11 = vsel %vm3543_vm15, %v3130_v36, %v8705_v7  ;;  %vm3436_vm15 = vcmp.lt.s32.totalorder %v10141_v51, 2  ;;  %v3306_v7 = vclz %v7453_v58 }
 0x52c   : > { %v3128_v14 = vsel %vm3126_vm3, %v8703_v59, %v3127_v50  ;;  %v3542_v20 = vsel %vm3540_vm14, %v8703_v59, %v3127_v50  ;;  %vm3169_vm14 = vcmp.lt.s32.totalorder %v10147_v24, 4  ;;  %vm3168_vm2 = vcmp.lt.s32.totalorder %v10147_v24, 3 }
 0x52d   : > { %v3132_v9 = vsel %vm3125_vm1, %v3128_v14, %v3131_v15  ;;  %v3546_v5 = vsel %vm3539_vm8, %v3542_v20, %v3545_v11  ;;  %vm3021_vm8 = vcmp.lt.s32.totalorder %v10139_v54, 2  ;;  %v3171_v36 = vsel %vm3169_vm14, %v10177_v18, 2102212464 }
 0x52e   : > { %v10216_v59 = vsel %vm3122_vm11, nan, %v3132_v9  ;;  %v10220_v1 = vsel %vm3122_vm11, nan, %v3546_v5  ;;  %vm3167_vm11 = vcmp.lt.s32.totalorder %v10147_v24, 2  ;;  %vm3018_vm1 = vweird.f32 %v9897_v49 }
 0x52f   : > { %v3805_v50 = vmul.f32 %v9691_v19, %v10216_v59  ;;  %v3846_v52 = vmul.f32 %v10220_v1, %v10216_v59  ;;  %v3854_v63 = vmul.f32 %v10220_v1, %v10220_v1  ;;  %v3858_v15 = vmul.f32 %v10216_v59, %v10216_v59  ;;  %v8707_v19 = vpop.eup %8706 }
 0x530   : > { %v7454_v11 = vadd.s32 4294967294, %v3306_v7  ;;  %v10240_v14 = vsel %vm3240_vm12, %v3324_v30, %v10154_v31  ;;  %v3838_v58 = vmul.f32 %v9724_v42, %v10220_v1  ;;  %v3172_v5 = vsel %vm3168_vm2, %v10175_v60, %v3171_v36  ;;  %v8709_v34 = vpop.eup %8708 }
 0x531   : > { %v3809_v20 = vadd.f32 %v3805_v50, %v9650_v32  ;;  %v3850_v9 = vadd.f32 %v3846_v52, %v3846_v52  ;;  %v3862_v7 = vsub.f32 %v3854_v63, %v3858_v15  ;;  %v3026_v38 = vxor.u32 2147483648, %v8707_v19  ;;  %v10256_v50 = vpop.permute.xlu1 %4630  ;;  %v10258_v52 = vpop.permute.xlu0 %4625 }
 0x532   : > { %vm7455_vm3 = vcmp.lt.s32.totalorder %v7454_v11, 0  ;;  %v10251_v31 = vsel %vm3167_vm11, %v3170_v47, %v3172_v5  ;;  %v3023_v45 = vxor.u32 2147483648, %v8709_v34 }
 0x533   : > { %v3842_v30 = vadd.f32 %v3838_v58, %v3809_v20  ;;  %v3891_v17 = vmul.f32 %v9750_v16, %v3850_v9  ;;  %v3932_v32 = vmul.f32 %v3850_v9, %v10220_v1  ;;  %v3948_v42 = vmul.f32 %v3850_v9, %v10216_v59 }
 0x534   : > { %v3924_v36 = vmul.f32 %v9770_v28, %v3862_v7  ;;  %v3936_v63 = vmul.f32 %v3862_v7, %v10216_v59  ;;  %v3944_v15 = vmul.f32 %v3862_v7, %v10220_v1  ;;  %v3027_v20 = vsel %vm3025_vm4, %v3026_v38, %v8709_v34 }
 0x535   : > { %v3895_v47 = vadd.f32 %v3891_v17, %v3842_v30  ;;  %v3442_v16 = vsel %vm3440_vm5, %v3026_v38, %v8709_v34  ;;  %v10267_v58 = vsel %vm7455_vm3, 0, %v7454_v11  ;;  %v3024_v57 = vsel %vm3022_vm6, %v8707_v19, %v3023_v45  ;;  %v10292_v51 = vpop.permute.xlu1 %4607 }
 0x536   : > { %v3940_v9 = vadd.f32 %v3936_v63, %v3932_v32  ;;  %v3952_v5 = vsub.f32 %v3944_v15, %v3948_v42  ;;  %v3439_v28 = vsel %vm3437_vm7, %v8707_v19, %v3023_v45  ;;  %v3028_v17 = vsel %vm3021_vm8, %v3024_v57, %v3027_v20 }
 0x537   : > { %v3928_v21 = vadd.f32 %v3924_v36, %v3895_v47  ;;  %v3443_v7 = vsel %vm3436_vm15, %v3439_v28, %v3442_v16  ;;  %v3310_v30 = vsub.s32 32, %v10267_v58  ;;  %v10286_v57 = vsel %vm3018_vm1, nan, %v3028_v17 }
 0x538   : > { %v3981_v34 = vmul.f32 %v9778_v53, %v3940_v9  ;;  %v4014_v38 = vmul.f32 %v9786_v37, %v3952_v5  ;;  %v4022_v11 = vmul.f32 %v3940_v9, %v10220_v1  ;;  %v4026_v32 = vmul.f32 %v3952_v5, %v10216_v59  ;;  %v10294_v53 = vpop.permute.xlu0 %4602 }
 0x539   : > { %v4034_v42 = vmul.f32 %v3952_v5, %v10220_v1  ;;  %v4038_v45 = vmul.f32 %v3940_v9, %v10216_v59  ;;  %v10290_v54 = vsel %vm3018_vm1, nan, %v3443_v7  ;;  %v3804_v36 = vmul.f32 %v9680_v55, %v10286_v57 }
 0x53a   : > { %v3985_v37 = vadd.f32 %v3981_v34, %v3928_v21  ;;  %v4030_v19 = vadd.f32 %v4026_v32, %v4022_v11  ;;  %v3837_v63 = vmul.f32 %v9716_v61, %v10290_v54  ;;  %v3845_v47 = vmul.f32 %v10290_v54, %v10286_v57 }
 0x53b   : > { %v4042_v15 = vsub.f32 %v4034_v42, %v4038_v45  ;;  %v3853_v49 = vmul.f32 %v10290_v54, %v10290_v54  ;;  %v3857_v20 = vmul.f32 %v10286_v57, %v10286_v57  ;;  %v3808_v17 = vadd.f32 %v3804_v36, %v9628_v48 }
 0x53c   : > { %v4018_v16 = vadd.f32 %v4014_v38, %v3985_v37  ;;  %v4071_v21 = vmul.f32 %v9794_v39, %v4030_v19  ;;  %v4112_v9 = vmul.f32 %v4030_v19, %v10220_v1  ;;  %v4128_v55 = vmul.f32 %v4030_v19, %v10216_v59  ;;  %v10316_v37 = vpop.permute.xlu1 %4687 }
 0x53d   : > { %v4104_v5 = vmul.f32 %v9802_v56, %v4042_v15  ;;  %v4116_v61 = vmul.f32 %v4042_v15, %v10216_v59  ;;  %v4124_v28 = vmul.f32 %v4042_v15, %v10220_v1  ;;  %v3849_v34 = vadd.f32 %v3845_v47, %v3845_v47  ;;  %v10318_v56 = vpop.permute.xlu0 %4682 }
 0x53e   : > { %v4075_v7 = vadd.f32 %v4071_v21, %v4018_v16  ;;  %v3861_v11 = vsub.f32 %v3853_v49, %v3857_v20  ;;  %v3311_v38 = vshll.u32 %v10185_v25, %v10267_v58  ;;  %v3841_v42 = vadd.f32 %v3837_v63, %v3808_v17 }
 0x53f   : > { %v4120_v32 = vadd.f32 %v4116_v61, %v4112_v9  ;;  %v4132_v39 = vsub.f32 %v4124_v28, %v4128_v55  ;;  %v3312_v45 = vshrl.u32 %v10124_v12, %v3310_v30  ;;  %v3890_v15 = vmul.f32 %v9742_v46, %v3849_v34 }
 0x540   : > { %v4108_v19 = vadd.f32 %v4104_v5, %v4075_v7  ;;  %v3923_v48 = vmul.f32 %v9768_v22, %v3861_v11  ;;  %v3931_v36 = vmul.f32 %v3849_v34, %v10290_v54  ;;  %v3935_v16 = vmul.f32 %v3861_v11, %v10286_v57 }
 0x541   : > { %v4161_v47 = vmul.f32 %v9810_v44, %v4120_v32  ;;  %v4194_v25 = vmul.f32 %v9818_v13, %v4132_v39  ;;  %v4202_v49 = vmul.f32 %v4120_v32, %v10220_v1  ;;  %v4206_v63 = vmul.f32 %v4132_v39, %v10216_v59 }
 0x542   : > { %v4214_v12 = vmul.f32 %v4132_v39, %v10220_v1  ;;  %v4218_v30 = vmul.f32 %v4120_v32, %v10216_v59  ;;  %v3894_v20 = vadd.f32 %v3890_v15, %v3841_v42  ;;  %v3943_v22 = vmul.f32 %v3861_v11, %v10290_v54  ;;  %v10337_v32 = vpop.permute.xlu1 %4640  ;;  %v10339_v39 = vpop.permute.xlu0 %4635 }
 0x543   : > { %v4165_v46 = vadd.f32 %v4161_v47, %v4108_v19  ;;  %v4210_v21 = vadd.f32 %v4206_v63, %v4202_v49  ;;  %v3947_v9 = vmul.f32 %v3849_v34, %v10286_v57  ;;  %v3939_v13 = vadd.f32 %v3935_v16, %v3931_v36  ;;  %v11173_v16 = vld [vmem:[#allocation53_spill] sm:$0xff] }
 0x544   : > { %v4222_v44 = vsub.f32 %v4214_v12, %v4218_v30  ;;  %v3927_v55 = vadd.f32 %v3923_v48, %v3894_v20  ;;  %v10332_v5 = vor.u32 %v3312_v45, %v3311_v38  ;;  %v3314_v12 = vsub.s32 4294967266, %v10267_v58  ;;  %v11172_v30 = vld [vmem:[#allocation49_spill] sm:$0xff] }
 0x545   : > { %v4198_v61 = vadd.f32 %v4194_v25, %v4165_v46  ;;  %v4251_v28 = vmul.f32 %v9826_v8, %v4210_v21  ;;  %v4292_v17 = vmul.f32 %v4210_v21, %v10220_v1  ;;  %v4308_v7 = vmul.f32 %v4210_v21, %v10216_v59 }
 0x546   : > { %v4284_v11 = vmul.f32 %v9834_v26, %v4222_v44  ;;  %v4296_v34 = vmul.f32 %v4222_v44, %v10216_v59  ;;  %v4304_v42 = vmul.f32 %v4222_v44, %v10220_v1  ;;  %v3951_v19 = vsub.f32 %v3943_v22, %v3947_v9 }
 0x547   : > { %v4255_v38 = vadd.f32 %v4251_v28, %v4198_v61  ;;  %v3980_v45 = vmul.f32 %v9776_v29, %v3939_v13  ;;  %v4021_v8 = vmul.f32 %v3939_v13, %v10290_v54  ;;  %v4037_v15 = vmul.f32 %v3939_v13, %v10286_v57  ;;  %v10357_v13 = vpop.permute.xlu1 %4720 }
 0x548   : > { %v4300_v48 = vadd.f32 %v4296_v34, %v4292_v17  ;;  %v4312_v36 = vsub.f32 %v4304_v42, %v4308_v7  ;;  %v4013_v47 = vmul.f32 %v9784_v43, %v3951_v19  ;;  %v4025_v25 = vmul.f32 %v3951_v19, %v10286_v57 }
 0x549   : > { %v4288_v49 = vadd.f32 %v4284_v11, %v4255_v38  ;;  %v3984_v26 = vadd.f32 %v3980_v45, %v3927_v55  ;;  %v4033_v63 = vmul.f32 %v3951_v19, %v10290_v54  ;;  %v10359_v55 = vpop.permute.xlu0 %4715  ;;  %v3315_v17 = vadd.s32 127, %v3314_v12  ;;  %v11174_v11 = vld [vmem:[#allocation30_spill] sm:$0xff]  ;;  %v11175_v45 = vld [vmem:[#allocation57_spill] sm:$0xff] }
 0x54a   : > { %v4341_v20 = vmul.f32 %v11172_v30, %v4300_v48  ;;  %v4374_v29 = vmul.f32 %v11173_v16, %v4312_v36  ;;  %v4382_v46 = vmul.f32 %v4300_v48, %v10220_v1  ;;  %v4386_v21 = vmul.f32 %v4312_v36, %v10216_v59  ;;  %v11177_v12 = vld [vmem:[#allocation33_spill] sm:$0xff] }
 0x54b   : > { %v4394_v22 = vmul.f32 %v4312_v36, %v10220_v1  ;;  %v4398_v43 = vmul.f32 %v4300_v48, %v10216_v59  ;;  %v4017_v9 = vadd.f32 %v4013_v47, %v3984_v26  ;;  %v4029_v44 = vadd.f32 %v4025_v25, %v4021_v8  ;;  %v11176_v47 = vld [vmem:[#allocation61_spill] sm:$0xff] }
 0x54c   : > { %v4345_v61 = vadd.f32 %v4341_v20, %v4288_v49  ;;  %v4390_v58 = vadd.f32 %v4386_v21, %v4382_v46  ;;  %v4041_v28 = vsub.f32 %v4033_v63, %v4037_v15  ;;  %v3316_v21 = vshll.u32 %v3315_v17, 23 }
 0x54d   : > { %v4402_v7 = vsub.f32 %v4394_v22, %v4398_v43  ;;  %v4070_v34 = vmul.f32 %v11174_v11, %v4029_v44  ;;  %v4111_v42 = vmul.f32 %v4029_v44, %v10290_v54  ;;  %v4127_v19 = vmul.f32 %v4029_v44, %v10286_v57  ;;  %v10374_v43 = vpop.permute.xlu1 %4697  ;;  %v10376_v44 = vpop.permute.xlu0 %4692 }
 0x54e   : > { %v4378_v38 = vadd.f32 %v4374_v29, %v4345_v61  ;;  %v4431_v48 = vmul.f32 %v11175_v45, %v4390_v58  ;;  %v4472_v8 = vmul.f32 %v4390_v58, %v10220_v1  ;;  %v4488_v36 = vmul.f32 %v4390_v58, %v10216_v59 }
 0x54f   : > { %v4464_v25 = vmul.f32 %v11176_v47, %v4402_v7  ;;  %v4476_v49 = vmul.f32 %v4402_v7, %v10216_v59  ;;  %v4484_v15 = vmul.f32 %v4402_v7, %v10220_v1  ;;  %v4074_v26 = vadd.f32 %v4070_v34, %v4017_v9 }
 0x550   : > { %v4435_v63 = vadd.f32 %v4431_v48, %v4378_v38  ;;  %v4103_v30 = vmul.f32 %v11177_v12, %v4041_v28  ;;  %v4115_v20 = vmul.f32 %v4041_v28, %v10286_v57  ;;  %v4123_v16 = vmul.f32 %v4041_v28, %v10290_v54  ;;  %v11178_v48 = vld [vmem:[#allocation36_spill] sm:$0xff] }
 0x551   : > { %v4480_v29 = vadd.f32 %v4476_v49, %v4472_v8  ;;  %v4492_v46 = vsub.f32 %v4484_v15, %v4488_v36  ;;  %v3320_v22 = vcvt.s32.f32 %v10332_v5  ;;  %v11179_v36 = vld [vmem:[#allocation39_spill] sm:$0xff]  ;;  %vm3330_vm15 = vweird.f32 %v9911_v2 }
 0x552   : > { %v4468_v61 = vadd.f32 %v4464_v25, %v4435_v63  ;;  %v4107_v58 = vadd.f32 %v4103_v30, %v4074_v26  ;;  %v4119_v7 = vadd.f32 %v4115_v20, %v4111_v42  ;;  %v4131_v9 = vsub.f32 %v4123_v16, %v4127_v19  ;;  %v10393_v16 = vpop.permute.xlu1 %4730 }
 0x553   : > { %v4521_v11 = vmul.f32 %v10098_v10, %v4480_v29  ;;  %v4554_v34 = vmul.f32 %v10145_v41, %v4492_v46  ;;  %v4562_v38 = vmul.f32 %v4480_v29, %v10220_v1  ;;  %v4566_v28 = vmul.f32 %v4492_v46, %v10216_v59 }
 0x554   : > { %v4574_v17 = vmul.f32 %v4492_v46, %v10220_v1  ;;  %v4578_v45 = vmul.f32 %v4480_v29, %v10216_v59  ;;  %v4160_v8 = vmul.f32 %v11178_v48, %v4119_v7  ;;  %v4193_v47 = vmul.f32 %v11179_v36, %v4131_v9  ;;  %v10395_v29 = vpop.permute.xlu0 %4725 }
 0x555   : > { %v4525_v25 = vadd.f32 %v4521_v11, %v4468_v61  ;;  %v4570_v49 = vadd.f32 %v4566_v28, %v4562_v38  ;;  %v4201_v42 = vmul.f32 %v4119_v7, %v10290_v54  ;;  %v4205_v10 = vmul.f32 %v4131_v9, %v10286_v57 }
 0x556   : > { %v4582_v19 = vsub.f32 %v4574_v17, %v4578_v45  ;;  %v4164_v41 = vadd.f32 %v4160_v8, %v4107_v58  ;;  %v4213_v15 = vmul.f32 %v4131_v9, %v10290_v54  ;;  %v4217_v26 = vmul.f32 %v4119_v7, %v10286_v57 }
 0x557   : > { %v4558_v63 = vadd.f32 %v4554_v34, %v4525_v25  ;;  %v4611_v12 = vmul.f32 %v10181_v33, %v4570_v49  ;;  %v4652_v30 = vmul.f32 %v4570_v49, %v10220_v1  ;;  %v4668_v20 = vmul.f32 %v4570_v49, %v10216_v59 }
 0x558   : > { %v4644_v46 = vmul.f32 %v10256_v50, %v4582_v19  ;;  %v4656_v61 = vmul.f32 %v4582_v19, %v10216_v59  ;;  %v4664_v58 = vmul.f32 %v4582_v19, %v10220_v1  ;;  %v4197_v9 = vadd.f32 %v4193_v47, %v4164_v41  ;;  %v11180_v59 = vld [vmem:[#allocation42_spill] sm:$0xff]  ;;  %v11181_v1 = vld [vmem:[#allocation45_spill] sm:$0xff] }
 0x559   : > { %v4615_v11 = vadd.f32 %v4611_v12, %v4558_v63  ;;  %v4209_v7 = vadd.f32 %v4205_v10, %v4201_v42  ;;  %v4221_v34 = vsub.f32 %v4213_v15, %v4217_v26  ;;  %v3317_v38 = vor.u32 4788187, %v3316_v21  ;;  %v4882_v42 = vpop.trf.xlu1  ;;  %v5027_v10 = vpop.trf.xlu0 }
 0x55a   : > { %v4660_v33 = vadd.f32 %v4656_v61, %v4652_v30  ;;  %v4672_v28 = vsub.f32 %v4664_v58, %v4668_v20  ;;  %v3175_v17 = vsel %vm3169_vm14, %v10179_v3, 920167782  ;;  %v3178_v50 = vsel %vm3166_vm13, %v10175_v60, %v10177_v18  ;;  %8111 = vmatprep.mubr.msk.f32.mxu1 %vm751_vm0, %v5027_v10  ;;  %8100 = vmatprep.mubr.msk.f32.mxu0 %vm751_vm0, %v4882_v42  ;;  %v11183_v58 = vld [vmem:[#allocation48_spill] sm:$0xff] }
 0x55b   : > { %v4648_v45 = vadd.f32 %v4644_v46, %v4615_v11  ;;  %v4250_v48 = vmul.f32 %v11180_v59, %v4209_v7  ;;  %v4283_v8 = vmul.f32 %v11181_v1, %v4221_v34  ;;  %v4291_v36 = vmul.f32 %v4209_v7, %v10290_v54 }
 0x55c   : > { %v4701_v21 = vmul.f32 %v10316_v37, %v4660_v33  ;;  %v4734_v47 = vmul.f32 %v10357_v13, %v4672_v28  ;;  %v4295_v25 = vmul.f32 %v4221_v34, %v10286_v57  ;;  %v4303_v49 = vmul.f32 %v4221_v34, %v10290_v54  ;;  %v11185_v34 = vld [vmem:[#allocation52_spill] sm:$0xff] }
 0x55d   : > { %v4254_v19 = vadd.f32 %v4250_v48, %v4197_v9  ;;  %v4307_v60 = vmul.f32 %v4209_v7, %v10286_v57  ;;  %v3318_v41 = vand.u32 2147483647, %v3317_v38  ;;  %v3176_v15 = vsel %vm3168_vm2, %v10177_v18, %v3175_v17 }
 0x55e   : > { %v4705_v37 = vadd.f32 %v4701_v21, %v4648_v45  ;;  %v4299_v13 = vadd.f32 %v4295_v25, %v4291_v36  ;;  %v3177_v26 = vsel %vm3167_vm11, %v10198_v27, %v3176_v15  ;;  %v11182_v63 = vor.u32 %v10167_v4, %v10159_v6 }
 0x55f   : > { %v4287_v30 = vadd.f32 %v4283_v8, %v4254_v19  ;;  %v4311_v20 = vsub.f32 %v4303_v49, %v4307_v60  ;;  %v3321_v18 = vmul.f32 %v3320_v22, %v3318_v41  ;;  %v11184_v7 = vand.u32 2147483647, %v9911_v2 }
 0x560   : > { %v3179_v12 = vsel %vm3169_vm14, %v11182_v63, 1326507024  ;;  %v10433_v61 = vadd.f32 %v4734_v47, %v4705_v37  ;;  %v4340_v9 = vmul.f32 %v11183_v58, %v4299_v13  ;;  %v4381_v27 = vmul.f32 %v4299_v13, %v10290_v54  ;;  %v11187_v47 = vld [vmem:[#allocation56_spill] sm:$0xff] }
 0x561   : > { %v3180_v46 = vsel %vm3168_vm2, %v10179_v3, %v3179_v12  ;;  %v4397_v6 = vmul.f32 %v4299_v13, %v10286_v57  ;;  %v4385_v4 = vmul.f32 %v4311_v20, %v10286_v57  ;;  %v4393_v11 = vmul.f32 %v4311_v20, %v10290_v54  ;;  %v11189_v12 = vld [vmem:[#allocation64_spill] sm:$0xff] }
 0x562   : > { %vm3239_vm13 = vcmp.le.f32.partialorder %v11184_v7, 0.7853982  ;;  %v3322_v5 = vxor.u32 2147483648, %v3321_v18  ;;  %v4344_v22 = vadd.f32 %v4340_v9, %v4287_v30  ;;  %v4373_v38 = vmul.f32 %v11185_v34, %v4311_v20 }
 0x563   : > { %v3181_v3 = vsel %vm3167_vm11, %v3178_v50, %v3180_v46  ;;  %v11186_v33 = vor.u32 8388608, %v10137_v62  ;;  %v4389_v17 = vadd.f32 %v4385_v4, %v4381_v27  ;;  %v4401_v45 = vsub.f32 %v4393_v11, %v4397_v6 }
 0x564   : > { %v3323_v59 = vsel %vm3240_vm12, %v3322_v5, %v3321_v18  ;;  %v3327_v48 = vsel %vm3239_vm13, 0, %v10240_v14  ;;  %v4377_v1 = vadd.f32 %v4373_v38, %v4344_v22  ;;  %v11188_v14 = vld [vmem:[#allocation60_spill] sm:$0xff]  ;;  %vm3136_vm1 = vcmp.lt.s32.totalorder %v10031_v0, 0 }
 0x565   : > { %v3182_v28 = vshll.u32 %v11186_v33, 8  ;;  %v3326_v8 = vsel %vm3239_vm13, %v9911_v2, %v3323_v59  ;;  %v4430_v25 = vmul.f32 %v11187_v47, %v4389_v17  ;;  %v4471_v24 = vmul.f32 %v4389_v17, %v10290_v54 }
 0x566   : > { %v4475_v62 = vmul.f32 %v4401_v45, %v10286_v57  ;;  %v4483_v50 = vmul.f32 %v4401_v45, %v10290_v54  ;;  %v4487_v49 = vmul.f32 %v4389_v17, %v10286_v57  ;;  %8710 = vcosq.f32 %v3326_v8 }
 0x567   : > { %v10451_v36 = vmul.u32.u64.low %v3182_v28, %v3181_v3  ;;  %v10452_v21 = vmul.u32.u64.high %v3182_v28, %v3181_v3, %v10451_v36  ;;  %v3331_v42 = vadd.s32 3, %v3327_v48  ;;  %v4434_v10 = vadd.f32 %v4430_v25, %v4377_v1 }
 0x568   : > { %v4463_v19 = vmul.f32 %v11188_v14, %v4401_v45  ;;  %v4479_v60 = vadd.f32 %v4475_v62, %v4471_v24  ;;  %8712 = vsinq.f32 %v3326_v8  ;;  %v4491_v41 = vsub.f32 %v4483_v50, %v4487_v49 }
 0x569   : > { %v3744_v15 = vand.u32 3, %v3327_v48  ;;  %v10460_v37 = vmul.u32.u64.low %v3182_v28, %v3177_v26  ;;  %v10461_v13 = vmul.u32.u64.high %v3182_v28, %v3177_v26, %v10460_v37  ;;  %v3332_v4 = vand.u32 3, %v3331_v42  ;;  %v8782_v42 = vld [vmem:[%s8914_s27 + $0x8] sm:$0xff] }
 0x56a   : > { %v4467_v63 = vadd.f32 %v4463_v19, %v4434_v10  ;;  %v4520_v30 = vmul.f32 %v11189_v12, %v4479_v60  ;;  %v4561_v20 = vmul.f32 %v4479_v60, %v10290_v54  ;;  %v4577_v18 = vmul.f32 %v4479_v60, %v10286_v57 }
 0x56b   : > { %v4565_v46 = vmul.f32 %v4491_v41, %v10286_v57  ;;  %v4573_v58 = vmul.f32 %v4491_v41, %v10290_v54  ;;  %v10469_v9 = vadd.s32 %v10460_v37, %v10452_v21  ;;  %v4553_v6 = vmul.f32 %v10117_v40, %v4491_v41 }
 0x56c   : > { %v4524_v27 = vadd.f32 %v4520_v30, %v4467_v63  ;;  %vm3191_vm12 = vc.u32 %v10452_v21, %v10460_v37  ;;  %v3192_v7 = vadd.s32 1, %v10461_v13  ;;  %vm3745_vm4 = vcmp.lt.s32.totalorder %v3744_v15, 2  ;;  %v11190_v37 = vld [vmem:[#allocation19_spill] sm:$0xff] }
 0x56d   : > { %v4569_v26 = vadd.f32 %v4565_v46, %v4561_v20  ;;  %v4581_v11 = vsub.f32 %v4573_v58, %v4577_v18  ;;  %vm3746_vm5 = vcmp.eq.s32.totalorder %v3744_v15, 0  ;;  %v3189_v3 = vmul.u32 %v3182_v28, %v10251_v31  ;;  %v8783_v63 = vld [vmem:[%s8914_s27] sm:$0xff]  ;;  %v11191_v20 = vld [vmem:[#allocation17_spill] sm:$0xff] }
 0x56e   : > { %v4557_v5 = vadd.f32 %v4553_v6, %v4524_v27  ;;  %vm3333_vm6 = vcmp.lt.s32.totalorder %v3332_v4, 2  ;;  %v3193_v17 = vsel %vm3191_vm12, %v3192_v7, %v10461_v13  ;;  %vm3337_vm7 = vcmp.eq.s32.totalorder %v3332_v4, 2  ;;  %v11192_v46 = vld [vmem:[#allocation21_spill] sm:$0xff]  ;;  %v11193_v7 = vld [vmem:[#allocation23_spill] sm:$0xff] }
 0x56f   : > { %v4610_v22 = vmul.f32 %v10183_v23, %v4569_v26  ;;  %v4651_v34 = vmul.f32 %v4569_v26, %v10290_v54  ;;  %v4655_v38 = vmul.f32 %v4581_v11, %v10286_v57  ;;  %v4663_v40 = vmul.f32 %v4581_v11, %v10290_v54 }
 0x570   : > { %v4667_v33 = vmul.f32 %v4569_v26, %v10286_v57  ;;  %v8711_v45 = vpop.eup %8710  ;;  %v4643_v48 = vmul.f32 %v10258_v52, %v4581_v11  ;;  %v3194_v8 = vadd.s32 %v3193_v17, %v3189_v3  ;;  %vm3749_vm14 = vcmp.eq.s32.totalorder %v3744_v15, 2  ;;  %v11194_v17 = vld [vmem:[#allocation25_spill] sm:$0xff] }
 0x571   : > { %v4614_v59 = vadd.f32 %v4610_v22, %v4557_v5  ;;  %v4659_v1 = vadd.f32 %v4655_v38, %v4651_v34  ;;  %v3338_v21 = vxor.u32 2147483648, %v8711_v45  ;;  %vm3334_vm8 = vcmp.eq.s32.totalorder %v3332_v4, 0 }
 0x572   : > { %v8713_v23 = vpop.eup %8712  ;;  %v4671_v36 = vsub.f32 %v4663_v40, %v4667_v33  ;;  %v3195_v57 = vadd.s32 536870912, %v3194_v8  ;;  %v10489_v10 = vadd.f32 %v8782_v42, %v10433_v61  ;;  %v11197_v42 = vld [vmem:[#allocation32_spill] sm:$0xff] }
 0x573   : > { %v4647_v31 = vadd.f32 %v4643_v48, %v4614_v59  ;;  %v4700_v54 = vmul.f32 %v10318_v56, %v4659_v1  ;;  %v3335_v28 = vxor.u32 2147483648, %v8713_v23  ;;  %v3339_v25 = vsel %vm3337_vm7, %v3338_v21, %v8713_v23 }
 0x574   : > { %v4733_v47 = vmul.f32 %v10359_v55, %v4671_v36  ;;  %v3751_v24 = vsel %vm3749_vm14, %v3338_v21, %v8713_v23  ;;  %v10485_v49 = vshrl.u32 %v3195_v57, 30  ;;  %v11195_v23 = vld [vmem:[#allocation27_spill] sm:$0xff]  ;;  %vm3226_vm7 = vweird.f32 %v10031_v0 }
 0x575   : > { %v4704_v62 = vadd.f32 %v4700_v54, %v4647_v31  ;;  %v3336_v52 = vsel %vm3334_vm8, %v8711_v45, %v3335_v28  ;;  %v3748_v50 = vsel %vm3746_vm5, %v8711_v45, %v3335_v28 }
 0x576   : > { %v3340_v56 = vsel %vm3333_vm6, %v3336_v52, %v3339_v25  ;;  %v3752_v55 = vsel %vm3745_vm4, %v3748_v50, %v3751_v24  ;;  %v3197_v41 = vshll.u32 %v10485_v49, 30  ;;  %v11196_v25 = vld [vmem:[#allocation29_spill] sm:$0xff] }
 0x577   : > { %v4737_v14 = vadd.f32 %v4733_v47, %v4704_v62  ;;  %v10494_v19 = vsel %vm3330_vm15, nan, %v3340_v56  ;;  %v10496_v60 = vsel %vm3330_vm15, nan, %v3752_v55  ;;  %vm7202_vm15 = vcmask (!%p7633_p4), 23552  }
 0x578   : > { %v3807_v13 = vmul.f32 %v11190_v37, %v10494_v19  ;;  %v3848_v61 = vmul.f32 %v10496_v60, %v10494_v19  ;;  %v3856_v2 = vmul.f32 %v10496_v60, %v10496_v60  ;;  %v3860_v15 = vmul.f32 %v10494_v19, %v10494_v19 }
 0x579   : > { %v10506_v12 = vadd.f32 %v8783_v63, %v4737_v14  ;;  %v3198_v30 = vsub.s32 %v3194_v8, %v3197_v41  ;;  %v3840_v58 = vmul.f32 %v11192_v46, %v10496_v60 }
 0x57a   : > { %v3811_v18 = vadd.f32 %v3807_v13, %v11191_v20  ;;  %v3852_v27 = vadd.f32 %v3848_v61, %v3848_v61  ;;  %v3864_v6 = vsub.f32 %v3856_v2, %v3860_v15  ;;  %v11198_v2 = vld [vmem:[#allocation35_spill] sm:$0xff] }
 0x57b   : > { %v3200_v4 = vsub.s32 0, %v3198_v30  ;;  %v10515_v26 = vpack.c.bf16 %v10489_v10, %v10506_v12 }
 0x57c   : > { %v3844_v11 = vadd.f32 %v3840_v58, %v3811_v18  ;;  %v3893_v5 = vmul.f32 %v11193_v7, %v3852_v27  ;;  %v3934_v22 = vmul.f32 %v3852_v27, %v10496_v60  ;;  %v3950_v34 = vmul.f32 %v3852_v27, %v10494_v19 }
 0x57d   : > { %v3938_v38 = vmul.f32 %v3864_v6, %v10494_v19  ;;  %v3946_v3 = vmul.f32 %v3864_v6, %v10496_v60  ;;  %v7449_v40 = vmin.u32 %v3200_v4, %v3198_v30  ;;  %8417 = vmatprep.subr.bf16.mxu0 %v10515_v26  ;;  %v3926_v45 = vmul.f32 %v11194_v17, %v3864_v6  ;;  %v11200_v17 = vld [vmem:[#allocation41_spill] sm:$0xff] }
 0x57e   : > { %v3897_v33 = vadd.f32 %v3893_v5, %v3844_v11  ;;  %8425 = vmatprep.subr.bf16.mxu1 %v10515_v26  ;;  %8419 = vmatpush3.bf16.msra.mxu0 %v10515_v26  ;;  %v11199_v11 = vld [vmem:[#allocation38_spill] sm:$0xff] }
 0x57f   : > { %v3942_v59 = vadd.f32 %v3938_v38, %v3934_v22  ;;  %v3954_v48 = vsub.f32 %v3946_v3, %v3950_v34  ;;  %v3202_v1 = vclz %v7449_v40  ;;  %8427 = vmatpush3.bf16.msra.mxu1 %v10515_v26 }
 0x580   : > { %v3930_v8 = vadd.f32 %v3926_v45, %v3897_v33 }
 0x581   : > { %v3983_v36 = vmul.f32 %v11195_v23, %v3942_v59  ;;  %v4024_v21 = vmul.f32 %v3942_v59, %v10496_v60  ;;  %v4028_v31 = vmul.f32 %v3954_v48, %v10494_v19  ;;  %v4036_v54 = vmul.f32 %v3954_v48, %v10496_v60 }
 0x582   : > { %v4040_v28 = vmul.f32 %v3942_v59, %v10494_v19  ;;  %v7450_v57 = vadd.s32 4294967294, %v3202_v1  ;;  %v4016_v24 = vmul.f32 %v11196_v25, %v3954_v48  ;;  %v11201_v1 = vld [vmem:[#allocation44_spill] sm:$0xff] }
 0x583   : > { %v3987_v47 = vadd.f32 %v3983_v36, %v3930_v8  ;;  %v4032_v62 = vadd.f32 %v4028_v31, %v4024_v21 }
 0x584   : > { %v4044_v52 = vsub.f32 %v4036_v54, %v4040_v28  ;;  %vm7451_vm11 = vcmp.lt.s32.totalorder %v7450_v57, 0 }
 0x585   : > { %v4020_v50 = vadd.f32 %v4016_v24, %v3987_v47  ;;  %v4073_v56 = vmul.f32 %v11197_v42, %v4032_v62  ;;  %v4114_v55 = vmul.f32 %v4032_v62, %v10496_v60  ;;  %v4130_v14 = vmul.f32 %v4032_v62, %v10494_v19  ;;  %v11202_v47 = vld [vmem:[#allocation47_spill] sm:$0xff] }
 0x586   : > { %v4118_v41 = vmul.f32 %v4044_v52, %v10494_v19  ;;  %v4126_v37 = vmul.f32 %v4044_v52, %v10496_v60  ;;  %v3205_v13 = vsel %vm7451_vm11, 0, %v7450_v57  ;;  %v4106_v63 = vmul.f32 %v11198_v2, %v4044_v52 }
 0x587   : > { %v4077_v61 = vadd.f32 %v4073_v56, %v4020_v50  ;;  %v3206_v15 = vsub.s32 32, %v3205_v13  ;;  %v3210_v20 = vsub.s32 4294967266, %v3205_v13  ;;  %v3207_v27 = vshll.u32 %v3198_v30, %v3205_v13  ;;  %v11203_v56 = vld [vmem:[#allocation51_spill] sm:$0xff] }
 0x588   : > { %v4122_v18 = vadd.f32 %v4118_v41, %v4114_v55  ;;  %v4134_v46 = vsub.f32 %v4126_v37, %v4130_v14  ;;  %v3220_v42 = vsub.s32 4, %v10485_v49 }
 0x589   : > { %v4110_v58 = vadd.f32 %v4106_v63, %v4077_v61  ;;  %v3208_v6 = vshrl.u32 %v10469_v9, %v3206_v15  ;;  %v3211_v4 = vadd.s32 127, %v3210_v20  ;;  %v11204_v63 = vld [vmem:[#allocation55_spill] sm:$0xff] }
 0x58a   : > { %v4163_v7 = vmul.f32 %v11199_v11, %v4122_v18  ;;  %v4204_v5 = vmul.f32 %v4122_v18, %v10496_v60  ;;  %v4208_v22 = vmul.f32 %v4134_v46, %v10494_v19  ;;  %v4216_v34 = vmul.f32 %v4134_v46, %v10496_v60 }
 0x58b   : > { %v4220_v38 = vmul.f32 %v4122_v18, %v10494_v19  ;;  %v3209_v3 = vor.u32 %v3208_v6, %v3207_v27  ;;  %v3212_v40 = vshll.u32 %v3211_v4, 23  ;;  %v4196_v45 = vmul.f32 %v11200_v17, %v4134_v46  ;;  %v11206_v4 = vld [vmem:[#allocation59_spill] sm:$0xff] }
 0x58c   : > { %v4167_v33 = vadd.f32 %v4163_v7, %v4110_v58  ;;  %v4212_v59 = vadd.f32 %v4208_v22, %v4204_v5  ;;  %v11205_v46 = vand.u32 2147483647, %v10031_v0  ;;  %v3221_v27 = vsel %vm3136_vm1, %v3220_v42, %v10485_v49 }
 0x58d   : > { %v4224_v30 = vsub.f32 %v4216_v34, %v4220_v38  ;;  %v3213_v48 = vor.u32 4788187, %v3212_v40  ;;  %v3216_v28 = vcvt.s32.f32 %v3209_v3  ;;  %v11207_v40 = vld [vmem:[#allocation63_spill] sm:$0xff] }
 0x58e   : > { %v4200_v9 = vadd.f32 %v4196_v45, %v4167_v33  ;;  %v4253_v8 = vmul.f32 %v11201_v1, %v4212_v59  ;;  %v4294_v23 = vmul.f32 %v4212_v59, %v10496_v60  ;;  %v4310_v36 = vmul.f32 %v4212_v59, %v10494_v19 }
 0x58f   : > { %v4298_v21 = vmul.f32 %v4224_v30, %v10494_v19  ;;  %v4306_v31 = vmul.f32 %v4224_v30, %v10496_v60  ;;  %v3214_v54 = vand.u32 2147483647, %v3213_v48  ;;  %v4286_v25 = vmul.f32 %v11202_v47, %v4224_v30 }
 0x590   : > { %v4257_v57 = vadd.f32 %v4253_v8, %v4200_v9  ;;  %vm3135_vm2 = vcmp.le.f32.partialorder %v11205_v46, 0.7853982 }
 0x591   : > { %v4302_v24 = vadd.f32 %v4298_v21, %v4294_v23  ;;  %v4314_v62 = vsub.f32 %v4306_v31, %v4310_v36  ;;  %v3217_v52 = vmul.f32 %v3216_v28, %v3214_v54  ;;  %v3223_v49 = vsel %vm3135_vm2, 0, %v3221_v27  ;;  %v11208_v21 = vld [vmem:[#allocation66_spill] sm:$0xff] }
 0x592   : > { %v4290_v50 = vadd.f32 %v4286_v25, %v4257_v57  ;;  %v3227_v23 = vadd.s32 3, %v3223_v49  ;;  %v3641_v57 = vand.u32 3, %v3223_v49 }
 0x593   : > { %v4343_v55 = vmul.f32 %v11203_v56, %v4302_v24  ;;  %v4384_v14 = vmul.f32 %v4302_v24, %v10496_v60  ;;  %v4388_v41 = vmul.f32 %v4314_v62, %v10494_v19  ;;  %v4396_v37 = vmul.f32 %v4314_v62, %v10496_v60 }
 0x594   : > { %v4400_v13 = vmul.f32 %v4302_v24, %v10494_v19  ;;  %v3218_v61 = vxor.u32 2147483648, %v3217_v52  ;;  %v4376_v15 = vmul.f32 %v11204_v63, %v4314_v62  ;;  %vm3642_vm3 = vcmp.lt.s32.totalorder %v3641_v57, 2 }
 0x595   : > { %v4347_v2 = vadd.f32 %v4343_v55, %v4290_v50  ;;  %v4392_v20 = vadd.f32 %v4388_v41, %v4384_v14  ;;  %v3228_v50 = vand.u32 3, %v3227_v23  ;;  %vm3643_vm13 = vcmp.eq.s32.totalorder %v3641_v57, 0 }
 0x596   : > { %v4404_v18 = vsub.f32 %v4396_v37, %v4400_v13  ;;  %v3219_v58 = vsel %vm3136_vm1, %v3218_v61, %v3217_v52  ;;  %vm3646_vm4 = vcmp.eq.s32.totalorder %v3641_v57, 2 }
 0x597   : > { %v4380_v6 = vadd.f32 %v4376_v15, %v4347_v2  ;;  %v4433_v11 = vmul.f32 %v11206_v4, %v4392_v20  ;;  %v4474_v7 = vmul.f32 %v4392_v20, %v10496_v60  ;;  %v4490_v5 = vmul.f32 %v4392_v20, %v10494_v19 }
 0x598   : > { %v4478_v22 = vmul.f32 %v4404_v18, %v10494_v19  ;;  %v4486_v34 = vmul.f32 %v4404_v18, %v10496_v60  ;;  %v3222_v38 = vsel %vm3135_vm2, %v10031_v0, %v3219_v58  ;;  %v4466_v33 = vmul.f32 %v11207_v40, %v4404_v18 }
 0x599   : > { %v4437_v3 = vadd.f32 %v4433_v11, %v4380_v6  ;;  %8714 = vcosq.f32 %v3222_v38  ;;  %vm3233_vm12 = vcmp.eq.s32.totalorder %v3228_v50, 2  ;;  %vm3229_vm5 = vcmp.lt.s32.totalorder %v3228_v50, 2  ;;  %v11209_v6 = vld [vmem:[#allocation18_spill] sm:$0xff] }
 0x59a   : > { %v4482_v17 = vadd.f32 %v4478_v22, %v4474_v7  ;;  %v4494_v45 = vsub.f32 %v4486_v34, %v4490_v5  ;;  %8716 = vsinq.f32 %v3222_v38  ;;  %vm3230_vm6 = vcmp.eq.s32.totalorder %v3228_v50, 0  ;;  %v11210_v7 = vld [vmem:[#allocation16_spill] sm:$0xff] }
 0x59b   : > { %v4470_v59 = vadd.f32 %v4466_v33, %v4437_v3  ;;  %v11211_v22 = vld [vmem:[#allocation20_spill] sm:$0xff]  ;;  %v11212_v33 = vld [vmem:[#allocation22_spill] sm:$0xff] }
 0x59c   : > { %v4523_v30 = vmul.f32 %v10143_v35, %v4482_v17  ;;  %v4564_v48 = vmul.f32 %v4482_v17, %v10496_v60  ;;  %v4568_v9 = vmul.f32 %v4494_v45, %v10494_v19  ;;  %v4576_v1 = vmul.f32 %v4494_v45, %v10496_v60 }
 0x59d   : > { %v4580_v8 = vmul.f32 %v4482_v17, %v10494_v19  ;;  %v4556_v31 = vmul.f32 %v11208_v21, %v4494_v45  ;;  %v11214_v21 = vld [vmem:[#allocation26_spill] sm:$0xff] }
 0x59e   : > { %v4527_v36 = vadd.f32 %v4523_v30, %v4470_v59  ;;  %v4572_v54 = vadd.f32 %v4568_v9, %v4564_v48  ;;  %v11213_v9 = vld [vmem:[#allocation24_spill] sm:$0xff] }
 0x59f   : > { %v4584_v28 = vsub.f32 %v4576_v1, %v4580_v8 }
 0x5a0   : > { %v4560_v47 = vadd.f32 %v4556_v31, %v4527_v36  ;;  %v4613_v25 = vmul.f32 %v10292_v51, %v4572_v54  ;;  %v4654_v35 = vmul.f32 %v4572_v54, %v10496_v60  ;;  %v4670_v24 = vmul.f32 %v4572_v54, %v10494_v19 }
 0x5a1   : > { %v4658_v62 = vmul.f32 %v4584_v28, %v10494_v19  ;;  %v4666_v52 = vmul.f32 %v4584_v28, %v10496_v60  ;;  %v4646_v56 = vmul.f32 %v10337_v32, %v4584_v28 }
 0x5a2   : > { %v4617_v42 = vadd.f32 %v4613_v25, %v4560_v47 }
 0x5a3   : > { %v8715_v55 = vpop.eup %8714  ;;  %v4662_v14 = vadd.f32 %v4658_v62, %v4654_v35  ;;  %v4674_v41 = vsub.f32 %v4666_v52, %v4670_v24  ;;  %v11215_v35 = vld [vmem:[#allocation28_spill] sm:$0xff] }
 0x5a4   : > { %v8717_v37 = vpop.eup %8716  ;;  %v4650_v13 = vadd.f32 %v4646_v56, %v4617_v42  ;;  %v3234_v61 = vxor.u32 2147483648, %v8715_v55  ;;  %v11216_v42 = vld [vmem:[#allocation31_spill] sm:$0xff] }
 0x5a5   : > { %v4703_v51 = vmul.f32 %v10374_v43, %v4662_v14  ;;  %v3231_v2 = vxor.u32 2147483648, %v8717_v37  ;;  %v4736_v32 = vmul.f32 %v10393_v16, %v4674_v41 }
 0x5a6   : > { %v3235_v19 = vsel %vm3233_vm12, %v3234_v61, %v8717_v37  ;;  %v3648_v60 = vsel %vm3646_vm4, %v3234_v61, %v8717_v37  ;;  %v11217_v61 = vld [vmem:[#allocation34_spill] sm:$0xff] }
 0x5a7   : > { %v4707_v63 = vadd.f32 %v4703_v51, %v4650_v13  ;;  %v3232_v15 = vsel %vm3230_vm6, %v8715_v55, %v3231_v2  ;;  %v3645_v20 = vsel %vm3643_vm13, %v8715_v55, %v3231_v2 }
 0x5a8   : > { %v3236_v18 = vsel %vm3229_vm5, %v3232_v15, %v3235_v19  ;;  %v3649_v46 = vsel %vm3642_vm3, %v3645_v20, %v3648_v60 }
 0x5a9   : > { %v10586_v58 = vadd.f32 %v4736_v32, %v4707_v63  ;;  %v10588_v43 = vsel %vm3226_vm7, nan, %v3236_v18  ;;  %v10590_v27 = vsel %vm3226_vm7, nan, %v3649_v46  ;;  %v11218_v63 = vld [vmem:[#allocation37_spill] sm:$0xff] }
 0x5aa   : > { %v3806_v4 = vmul.f32 %v11209_v6, %v10588_v43  ;;  %v3847_v11 = vmul.f32 %v10590_v27, %v10588_v43  ;;  %v3855_v16 = vmul.f32 %v10590_v27, %v10590_v27  ;;  %v3859_v0 = vmul.f32 %v10588_v43, %v10588_v43 }
 0x5ab   : > { %v3839_v34 = vmul.f32 %v11211_v22, %v10590_v27 }
 0x5ac   : > { %v3810_v5 = vadd.f32 %v3806_v4, %v11210_v7  ;;  %v3851_v38 = vadd.f32 %v3847_v11, %v3847_v11  ;;  %v3863_v3 = vsub.f32 %v3855_v16, %v3859_v0  ;;  %v11219_v4 = vld [vmem:[#allocation40_spill] sm:$0xff] }
 0x5ae   : > { %v3843_v40 = vadd.f32 %v3839_v34, %v3810_v5  ;;  %v3892_v17 = vmul.f32 %v11212_v33, %v3851_v38  ;;  %v3933_v45 = vmul.f32 %v3851_v38, %v10590_v27  ;;  %v3949_v49 = vmul.f32 %v3851_v38, %v10588_v43  ;;  %v11220_v5 = vld [vmem:[#allocation43_spill] sm:$0xff] }
 0x5af   : > { %v3937_v59 = vmul.f32 %v3863_v3, %v10588_v43  ;;  %v3945_v30 = vmul.f32 %v3863_v3, %v10590_v27  ;;  %v3925_v1 = vmul.f32 %v11213_v9, %v3863_v3 }
 0x5b0   : > { %v3896_v48 = vadd.f32 %v3892_v17, %v3843_v40  ;;  %v11221_v17 = vld [vmem:[#allocation46_spill] sm:$0xff] }
 0x5b1   : > { %v3941_v8 = vadd.f32 %v3937_v59, %v3933_v45  ;;  %v3953_v23 = vsub.f32 %v3945_v30, %v3949_v49 }
 0x5b2   : > { %v3929_v36 = vadd.f32 %v3925_v1, %v3896_v48  ;;  %v11222_v48 = vld [vmem:[#allocation50_spill] sm:$0xff] }
 0x5b3   : > { %v3982_v31 = vmul.f32 %v11214_v21, %v3941_v8  ;;  %v4023_v54 = vmul.f32 %v3941_v8, %v10590_v27  ;;  %v4027_v28 = vmul.f32 %v3953_v23, %v10588_v43  ;;  %v4035_v57 = vmul.f32 %v3953_v23, %v10590_v27 }
 0x5b4   : > { %v4039_v47 = vmul.f32 %v3941_v8, %v10588_v43  ;;  %v4015_v24 = vmul.f32 %v11215_v35, %v3953_v23 }
 0x5b5   : > { %v3986_v25 = vadd.f32 %v3982_v31, %v3929_v36  ;;  %v4031_v62 = vadd.f32 %v4027_v28, %v4023_v54  ;;  %v11223_v31 = vld [vmem:[#allocation54_spill] sm:$0xff] }
 0x5b6   : > { %v4043_v52 = vsub.f32 %v4035_v57, %v4039_v47 }
 0x5b7   : > { %v4019_v50 = vadd.f32 %v4015_v24, %v3986_v25  ;;  %v4072_v56 = vmul.f32 %v11216_v42, %v4031_v62  ;;  %v4113_v55 = vmul.f32 %v4031_v62, %v10590_v27  ;;  %v4129_v14 = vmul.f32 %v4031_v62, %v10588_v43  ;;  %v11224_v25 = vld [vmem:[#allocation58_spill] sm:$0xff] }
 0x5b8   : > { %v4117_v41 = vmul.f32 %v4043_v52, %v10588_v43  ;;  %v4125_v37 = vmul.f32 %v4043_v52, %v10590_v27  ;;  %v4105_v51 = vmul.f32 %v11217_v61, %v4043_v52 }
 0x5b9   : > { %v4076_v13 = vadd.f32 %v4072_v56, %v4019_v50  ;;  %v11225_v56 = vld [vmem:[#allocation62_spill] sm:$0xff] }
 0x5ba   : > { %v4121_v2 = vadd.f32 %v4117_v41, %v4113_v55  ;;  %v4133_v19 = vsub.f32 %v4125_v37, %v4129_v14 }
 0x5bb   : > { %v4109_v60 = vadd.f32 %v4105_v51, %v4076_v13  ;;  %v11226_v13 = vld [vmem:[#allocation65_spill] sm:$0xff] }
 0x5bc   : > { %v4162_v32 = vmul.f32 %v11218_v63, %v4121_v2  ;;  %v4203_v15 = vmul.f32 %v4121_v2, %v10590_v27  ;;  %v4207_v20 = vmul.f32 %v4133_v19, %v10588_v43  ;;  %v4215_v18 = vmul.f32 %v4133_v19, %v10590_v27 }
 0x5bd   : > { %v4219_v46 = vmul.f32 %v4121_v2, %v10588_v43  ;;  %v4195_v11 = vmul.f32 %v11219_v4, %v4133_v19 }
 0x5be   : > { %v4166_v6 = vadd.f32 %v4162_v32, %v4109_v60  ;;  %v4211_v16 = vadd.f32 %v4207_v20, %v4203_v15  ;;  %v11227_v32 = vld [vmem:[#allocation67_spill] sm:$0xff] }
 0x5bf   : > { %v4223_v0 = vsub.f32 %v4215_v18, %v4219_v46 }
 0x5c0   : > { %v4199_v7 = vadd.f32 %v4195_v11, %v4166_v6  ;;  %v4252_v22 = vmul.f32 %v11220_v5, %v4211_v16  ;;  %v4293_v34 = vmul.f32 %v4211_v16, %v10590_v27  ;;  %v4309_v38 = vmul.f32 %v4211_v16, %v10588_v43 }
 0x5c1   : > { %v4297_v3 = vmul.f32 %v4223_v0, %v10588_v43  ;;  %v4305_v40 = vmul.f32 %v4223_v0, %v10590_v27  ;;  %v4285_v45 = vmul.f32 %v11221_v17, %v4223_v0 }
 0x5c2   : > { %v4256_v33 = vadd.f32 %v4252_v22, %v4199_v7 }
 0x5c3   : > { %v4301_v49 = vadd.f32 %v4297_v3, %v4293_v34  ;;  %v4313_v59 = vsub.f32 %v4305_v40, %v4309_v38 }
 0x5c4   : > { %v4289_v30 = vadd.f32 %v4285_v45, %v4256_v33  ;;  %v8784_v33 = vld [vmem:[%s8914_s27 + $0x18] sm:$0xff] }
 0x5c5   : > { %v4342_v9 = vmul.f32 %v11222_v48, %v4301_v49  ;;  %v4383_v1 = vmul.f32 %v4301_v49, %v10590_v27  ;;  %v4387_v8 = vmul.f32 %v4313_v59, %v10588_v43  ;;  %v4395_v23 = vmul.f32 %v4313_v59, %v10590_v27 }
 0x5c6   : > { %v4399_v36 = vmul.f32 %v4301_v49, %v10588_v43  ;;  %v4375_v54 = vmul.f32 %v11223_v31, %v4313_v59  ;;  %v10661_v17 = vadd.f32 %v8784_v33, %v10586_v58  ;;  %v8785_v49 = vld [vmem:[%s8914_s27 + $0x10] sm:$0xff] }
 0x5c7   : > { %v4346_v21 = vadd.f32 %v4342_v9, %v4289_v30  ;;  %v4391_v28 = vadd.f32 %v4387_v8, %v4383_v1 }
 0x5c8   : > { %v4403_v57 = vsub.f32 %v4395_v23, %v4399_v36 }
 0x5c9   : > { %v4379_v47 = vadd.f32 %v4375_v54, %v4346_v21  ;;  %v4432_v35 = vmul.f32 %v11224_v25, %v4391_v28  ;;  %v4473_v24 = vmul.f32 %v4391_v28, %v10590_v27  ;;  %v4489_v62 = vmul.f32 %v4391_v28, %v10588_v43 }
 0x5ca   : > { %v4477_v52 = vmul.f32 %v4403_v57, %v10588_v43  ;;  %v4485_v50 = vmul.f32 %v4403_v57, %v10590_v27  ;;  %v4465_v55 = vmul.f32 %v11225_v56, %v4403_v57 }
 0x5cb   : > { %v4436_v42 = vadd.f32 %v4432_v35, %v4379_v47 }
 0x5cc   : > { %v4481_v14 = vadd.f32 %v4477_v52, %v4473_v24  ;;  %v4493_v41 = vsub.f32 %v4485_v50, %v4489_v62 }
 0x5cd   : > { %v4469_v37 = vadd.f32 %v4465_v55, %v4436_v42 }
 0x5ce   : > { %v4522_v61 = vmul.f32 %v11226_v13, %v4481_v14  ;;  %v4563_v51 = vmul.f32 %v4481_v14, %v10590_v27  ;;  %v4567_v2 = vmul.f32 %v4493_v41, %v10588_v43  ;;  %v4575_v19 = vmul.f32 %v4493_v41, %v10590_v27 }
 0x5cf   : > { %v4579_v60 = vmul.f32 %v4481_v14, %v10588_v43  ;;  %v4555_v15 = vmul.f32 %v11227_v32, %v4493_v41 }
 0x5d0   : > { %v4526_v63 = vadd.f32 %v4522_v61, %v4469_v37  ;;  %v4571_v20 = vadd.f32 %v4567_v2, %v4563_v51 }
 0x5d1   : > { %v4583_v18 = vsub.f32 %v4575_v19, %v4579_v60 }
 0x5d2   : > { %v4559_v46 = vadd.f32 %v4555_v15, %v4526_v63  ;;  %v4612_v6 = vmul.f32 %v10294_v53, %v4571_v20  ;;  %v4653_v4 = vmul.f32 %v4571_v20, %v10590_v27  ;;  %v4669_v11 = vmul.f32 %v4571_v20, %v10588_v43 }
 0x5d3   : > { %v4657_v16 = vmul.f32 %v4583_v18, %v10588_v43  ;;  %v4665_v0 = vmul.f32 %v4583_v18, %v10590_v27  ;;  %v4645_v5 = vmul.f32 %v10339_v39, %v4583_v18  ;;  %v5028_v27 = vpop.trf.xlu0 }
 0x5d4   : > { %v4616_v7 = vadd.f32 %v4612_v6, %v4559_v46 }
 0x5d5   : > { %v4661_v22 = vadd.f32 %v4657_v16, %v4653_v4  ;;  %v4673_v34 = vsub.f32 %v4665_v0, %v4669_v11 }
 0x5d6   : > { %v4649_v38 = vadd.f32 %v4645_v5, %v4616_v7 }
 0x5d7   : > { %v4702_v3 = vmul.f32 %v10376_v44, %v4661_v22  ;;  %v4735_v53 = vmul.f32 %v10395_v29, %v4673_v34  ;;  %v4883_v44 = vpop.trf.xlu1  ;;  %v11228_v29 = vld [vmem:[#allocation3_spill] sm:$0xff]  ;;  %v5378_v58 = vpop.trf.xlu0 }
 0x5d8   : > { %v5148_v59 = vmul.f32 %v11228_v29, %v10506_v12 }
 0x5d9   : > { %v4706_v40 = vadd.f32 %v4702_v3, %v4649_v38 }
 0x5db   : > { %v4739_v45 = vadd.f32 %v4735_v53, %v4706_v40  ;;  %v5379_v30 = vpop.trf.xlu0  ;;  %v5630_v48 = vpop.trf.xlu1 }
 0x5dd   : > { %v10664_v43 = vadd.f32 %v8785_v49, %v4739_v45 }
 0x5df   : > { %v8420_v39 = vpack.c.bf16 %v10661_v17, %v10664_v43  ;;  %v5631_v9 = vpop.trf.xlu1  ;;  %v5882_v1 = vpop.trf.xlu0 }
 0x5e1   : > { %8421 = vmatprep.subr.bf16.mxu0 %v8420_v39  ;;  %8429 = vmatprep.subr.bf16.mxu1 %v8420_v39 }
 0x5e2   : > { %8423 = vmatpush3.bf16.msra.mxu0 %v8420_v39  ;;  %8431 = vmatpush3.bf16.msra.mxu1 %v8420_v39 }
 0x5e3   : > { %8445 = vmatprep.subr.bf16.mxu1 %v10515_v26  ;;  %v5883_v8 = vpop.trf.xlu0  ;;  %v6134_v23 = vpop.trf.xlu1 }
 0x5e5   : > { %8101 = vmatmul.mubr.msk.f32.vlgmr.msra.gmra.mrb[24].mxu0 %vm751_vm0, %v4883_v44  ;;  %8112 = vmatmul.mubr.msk.f32.vlgmr.msra.gmra.mrb[12].mxu1 %vm751_vm0, %v5028_v27 }
 0x5e6   : > { %8118 = vmatprep.mubr.msk.f32.mxu0 %vm1032_vm9, %v5148_v59  ;;  %8447 = vmatpush3.bf16.msra.mxu1 %v10515_v26 }
 0x5e7   : > { %8449 = vmatprep.subr.bf16.mxu1 %v8420_v39  ;;  %8142 = vmatprep.mubr.msk.f32.mxu1 %vm751_vm0, %v5378_v58  ;;  %v6135_v36 = vpop.trf.xlu1  ;;  %v6386_v21 = vpop.trf.xlu0 }
 0x5ea   : > { %8451 = vmatpush3.bf16.msra.mxu1 %v8420_v39 }
 0x5eb   : > { %8459 = vmatprep.subr.bf16.mxu1 %v10515_v26  ;;  %v6387_v31 = vpop.trf.xlu0  ;;  %v6638_v54 = vpop.trf.xlu1 }
 0x5ed   : > { %8143 = vmatmul.mubr.msk.f32.vlgmr.msra.gmra.mrb[14].mxu1 %vm751_vm0, %v5379_v30 }
 0x5ee   : > { %8461 = vmatpush3.bf16.msra.mxu1 %v10515_v26  ;;  %8163 = vmatprep.mubr.msk.f32.mxu1 %vm751_vm0, %v5630_v48 }
 0x5ef   : > { %8463 = vmatprep.subr.bf16.mxu1 %v8420_v39  ;;  %v6639_v28 = vpop.trf.xlu1 }
 0x5f2   : > { %8465 = vmatpush3.bf16.msra.mxu1 %v8420_v39 }
 0x5f3   : > { %8473 = vmatprep.subr.bf16.mxu1 %v10515_v26 }
 0x5f5   : > { %8164 = vmatmul.mubr.msk.f32.vlgmr.msra.gmra.mrb[16].mxu1 %vm751_vm0, %v5631_v9 }
 0x5f6   : > { %8475 = vmatpush3.bf16.msra.mxu1 %v10515_v26  ;;  %8184 = vmatprep.mubr.msk.f32.mxu1 %vm751_vm0, %v5882_v1 }
 0x5f7   : > { %8477 = vmatprep.subr.bf16.mxu1 %v8420_v39 }
 0x5fa   : > { %8479 = vmatpush3.bf16.msra.mxu1 %v8420_v39 }
 0x5fb   : > { %8487 = vmatprep.subr.bf16.mxu1 %v10515_v26 }
 0x5fd   : > { %8185 = vmatmul.mubr.msk.f32.vlgmr.msra.gmra.mrb[18].mxu1 %vm751_vm0, %v5883_v8 }
 0x5fe   : > { %8489 = vmatpush3.bf16.msra.mxu1 %v10515_v26  ;;  %8205 = vmatprep.mubr.msk.f32.mxu1 %vm751_vm0, %v6134_v23 }
 0x5ff   : > { %8491 = vmatprep.subr.bf16.mxu1 %v8420_v39 }
 0x602   : > { %8493 = vmatpush3.bf16.msra.mxu1 %v8420_v39 }
 0x603   : > { %8501 = vmatprep.subr.bf16.mxu1 %v10515_v26 }
 0x605   : > { %8206 = vmatmul.mubr.msk.f32.vlgmr.msra.gmra.mrb[20].mxu1 %vm751_vm0, %v6135_v36 }
 0x606   : > { %8503 = vmatpush3.bf16.msra.mxu1 %v10515_v26  ;;  %8226 = vmatprep.mubr.msk.f32.mxu1 %vm751_vm0, %v6386_v21 }
 0x607   : > { %8505 = vmatprep.subr.bf16.mxu1 %v8420_v39 }
 0x60a   : > { %8507 = vmatpush3.bf16.msra.mxu1 %v8420_v39 }
 0x60b   : > { %8515 = vmatprep.subr.bf16.mxu1 %v10515_v26 }
 0x60d   : > { %8227 = vmatmul.mubr.msk.f32.vlgmr.msra.gmra.mrb[22].mxu1 %vm751_vm0, %v6387_v31 }
 0x60e   : > { %8517 = vmatpush3.bf16.msra.mxu1 %v10515_v26  ;;  %8247 = vmatprep.mubr.msk.f32.mxu1 %vm751_vm0, %v6638_v54 }
 0x60f   : > { %8519 = vmatprep.subr.bf16.mxu1 %v8420_v39 }
 0x612   : > { %8521 = vmatpush3.bf16.msra.mxu1 %v8420_v39 }
 0x615   : > { %8248 = vmatmul.mubr.msk.f32.vlgmr.msra.gmra.mrb[24].mxu1 %vm751_vm0, %v6639_v28 }
 0x6b8   : > { %v8102_v57 = vpop.f32.mrb[24].mxu0  ;;  %v8113_v47 = vpop.f32.mrb[12].mxu1 }
 0x6b9   : > { %v4980_v25 = vmul.f32 2.0, %v8102_v57  ;;  %v4970_v35 = vpop.f32.mrb[25].mxu0  ;;  %v5115_v24 = vpop.f32.mrb[13].mxu1  ;;  %v5125_v42 = vmul.f32 2.0, %v8113_v47 }
 0x6ba   : > { %v10697_v62 = vmul.f32 2.0, %v4970_v35  ;;  %v5124_v52 = vmul.f32 2.0, %v5115_v24 }
 0x6bb   : > { %v4984_v50 = vsel %vm1032_vm9, %v4980_v25, -inf  ;;  %v5129_v14 = vsel %vm1032_vm9, %v5125_v42, -inf }
 0x6bc   : > { %4985 = vmax.xlane.f32.xlu1 %v4984_v50  ;;  %v4981_v26 = vsel %vm1032_vm9, %v10697_v62, -inf  ;;  %v5126_v56 = vsel %vm1032_vm9, %v5124_v52, -inf }
 0x6bd   : > { %4982 = vmax.xlane.f32.xlu0 %v4981_v26 }
 0x6c0   : > { %5127 = vmax.xlane.f32.xlu1 %v5126_v56  ;;  %v8144_v55 = vpop.f32.mrb[14].mxu1 }
 0x6c1   : > { %v10704_v41 = vmul.f32 2.0, %v8144_v55  ;;  %5130 = vmax.xlane.f32.xlu0 %v5129_v14  ;;  %v5466_v37 = vpop.f32.mrb[15].mxu1 }
 0x6c2   : > { %v5475_v13 = vmul.f32 2.0, %v5466_v37 }
 0x6c3   : > { %v5480_v61 = vsel %vm1032_vm9, %v10704_v41, -inf }
 0x6c4   : > { %v5477_v51 = vsel %vm1032_vm9, %v5475_v13, -inf }
 0x6c5   : > { %5481 = vmax.xlane.f32.xlu0 %v5480_v61  ;;  %5478 = vmax.xlane.f32.xlu1 %v5477_v51 }
 0x6c8   : > { %v8165_v2 = vpop.f32.mrb[16].mxu1 }
 0x6c9   : > { %v10709_v19 = vmul.f32 2.0, %v8165_v2  ;;  %v5718_v60 = vpop.f32.mrb[17].mxu1 }
 0x6ca   : > { %v10711_v63 = vmul.f32 2.0, %v5718_v60 }
 0x6cb   : > { %v5732_v32 = vsel %vm1032_vm9, %v10709_v19, -inf }
 0x6cc   : > { %5733 = vmax.xlane.f32.xlu0 %v5732_v32  ;;  %v5729_v15 = vsel %vm1032_vm9, %v10711_v63, -inf }
 0x6cd   : > { %5730 = vmax.xlane.f32.xlu1 %v5729_v15 }
 0x6d0   : > { %v8186_v20 = vpop.f32.mrb[18].mxu1 }
 0x6d1   : > { %v10717_v18 = vmul.f32 2.0, %v8186_v20  ;;  %v5970_v46 = vpop.f32.mrb[19].mxu1 }
 0x6d2   : > { %v10719_v6 = vmul.f32 2.0, %v5970_v46 }
 0x6d3   : > { %v5984_v4 = vsel %vm1032_vm9, %v10717_v18, -inf }
 0x6d4   : > { %5985 = vmax.xlane.f32.xlu0 %v5984_v4  ;;  %v5981_v11 = vsel %vm1032_vm9, %v10719_v6, -inf }
 0x6d5   : > { %5982 = vmax.xlane.f32.xlu1 %v5981_v11 }
 0x6d8   : > { %v8207_v16 = vpop.f32.mrb[20].mxu1 }
 0x6d9   : > { %v10725_v0 = vmul.f32 2.0, %v8207_v16  ;;  %v6222_v7 = vpop.f32.mrb[21].mxu1 }
 0x6da   : > { %v10727_v5 = vmul.f32 2.0, %v6222_v7 }
 0x6db   : > { %v6236_v22 = vsel %vm1032_vm9, %v10725_v0, -inf }
 0x6dc   : > { %6237 = vmax.xlane.f32.xlu0 %v6236_v22  ;;  %v6233_v34 = vsel %vm1032_vm9, %v10727_v5, -inf }
 0x6dd   : > { %6234 = vmax.xlane.f32.xlu1 %v6233_v34 }
 0x6e0   : > { %v8228_v38 = vpop.f32.mrb[22].mxu1 }
 0x6e1   : > { %v10733_v3 = vmul.f32 2.0, %v8228_v38  ;;  %v6474_v40 = vpop.f32.mrb[23].mxu1 }
 0x6e2   : > { %v10735_v53 = vmul.f32 2.0, %v6474_v40 }
 0x6e3   : > { %v6488_v33 = vsel %vm1032_vm9, %v10733_v3, -inf }
 0x6e4   : > { %6489 = vmax.xlane.f32.xlu0 %v6488_v33  ;;  %v6485_v45 = vsel %vm1032_vm9, %v10735_v53, -inf }
 0x6e5   : > { %6486 = vmax.xlane.f32.xlu1 %v6485_v45 }
 0x6e8   : > { %v10741_v49 = vpop.f32.mrb[24].mxu1 }
 0x6e9   : > { %v10743_v27 = vpop.f32.mrb[25].mxu1 }
 0x749   : > { %v4986_v39 = vpop.xlane.xlu1 %4985 }
 0x74a   : > { %v4988_v44 = vsub.f32 %v4980_v25, %v4986_v39  ;;  %v4983_v29 = vpop.xlane.xlu0 %4982 }
 0x74b   : > { %v4987_v58 = vsub.f32 %v10697_v62, %v4983_v29 }
 0x74c   : > { %v4991_v59 = vmul.f32 1.442695, %v4988_v44 }
 0x74d   : > { %v5128_v30 = vpop.xlane.xlu1 %5127  ;;  %v4989_v23 = vmul.f32 1.442695, %v4987_v58 }
 0x74e   : > { %8718 = vpow2.f32 %v4991_v59  ;;  %v5132_v48 = vsub.f32 %v5124_v52, %v5128_v30  ;;  %v5131_v9 = vpop.xlane.xlu0 %5130 }
 0x74f   : > { %v5133_v1 = vsub.f32 %v5125_v42, %v5131_v9 }
 0x750   : > { %v5134_v8 = vmul.f32 1.442695, %v5132_v48 }
 0x751   : > { %v5136_v36 = vmul.f32 1.442695, %v5133_v1 }
 0x752   : > { %8720 = vpow2.f32 %v5134_v8  ;;  %v5479_v21 = vpop.xlane.xlu1 %5478  ;;  %v5482_v31 = vpop.xlane.xlu0 %5481  ;;  %v10804_v8 = vmul.f32 2.0, %v10741_v49 }
 0x753   : > { %8722 = vpow2.f32 %v5136_v36  ;;  %v5483_v54 = vsub.f32 %v5475_v13, %v5479_v21  ;;  %v5484_v28 = vsub.f32 %v10704_v41, %v5482_v31 }
 0x754   : > { %8724 = vpow2.f32 %v4989_v23  ;;  %v10809_v23 = vmul.f32 2.0, %v10743_v27 }
 0x755   : > { %v5485_v57 = vmul.f32 1.442695, %v5483_v54  ;;  %v5487_v47 = vmul.f32 1.442695, %v5484_v28  ;;  %v6740_v54 = vsel %vm1032_vm9, %v10804_v8, -inf }
 0x756   : > { %v6737_v49 = vsel %vm1032_vm9, %v10809_v23, -inf }
 0x757   : > { %8726 = vpow2.f32 %v5485_v57 }
 0x758   : > { %v10747_v25 = vpop.eup %8718  ;;  %8728 = vpow2.f32 %v5487_v47 }
 0x759   : > { %v5734_v35 = vpop.xlane.xlu0 %5733  ;;  %v4996_v24 = vsel %vm1032_vm9, %v10747_v25, 0.0 }
 0x75a   : > { %v5736_v62 = vsub.f32 %v10709_v19, %v5734_v35  ;;  %v5731_v52 = vpop.xlane.xlu1 %5730  ;;  %4997 = vadd.xlane.f32.xlu0 %v4996_v24 }
 0x75b   : > { %v5735_v50 = vsub.f32 %v10711_v63, %v5731_v52 }
 0x75c   : > { %v10753_v42 = vpop.eup %8720  ;;  %v5739_v26 = vmul.f32 1.442695, %v5736_v62 }
 0x75d   : > { %v10755_v56 = vpop.eup %8722  ;;  %v5737_v55 = vmul.f32 1.442695, %v5735_v50  ;;  %v5138_v14 = vsel %vm1032_vm9, %v10753_v42, 0.0 }
 0x75e   : > { %8730 = vpow2.f32 %v5739_v26  ;;  %5139 = vadd.xlane.f32.xlu1 %v5138_v14  ;;  %v5141_v41 = vsel %vm1032_vm9, %v10755_v56, 0.0  ;;  %v10761_v37 = vpop.eup %8724 }
 0x75f   : > { %8732 = vpow2.f32 %v5737_v55  ;;  %5142 = vadd.xlane.f32.xlu0 %v5141_v41  ;;  %v4993_v60 = vsel %vm1032_vm9, %v10761_v37, 0.0 }
 0x761   : > { %v10763_v13 = vpop.eup %8726  ;;  %v5986_v61 = vpop.xlane.xlu0 %5985 }
 0x762   : > { %v5988_v51 = vsub.f32 %v10717_v18, %v5986_v61  ;;  %v5983_v2 = vpop.xlane.xlu1 %5982  ;;  %v5489_v19 = vsel %vm1032_vm9, %v10763_v13, 0.0  ;;  %v10770_v63 = vpop.eup %8728 }
 0x763   : > { %v5987_v32 = vsub.f32 %v10719_v6, %v5983_v2  ;;  %5490 = vadd.xlane.f32.xlu1 %v5489_v19  ;;  %4994 = vadd.xlane.f32.xlu0 %v4993_v60  ;;  %v5492_v46 = vsel %vm1032_vm9, %v10770_v63, 0.0 }
 0x764   : > { %v5991_v15 = vmul.f32 1.442695, %v5988_v51 }
 0x765   : > { %v5989_v20 = vmul.f32 1.442695, %v5987_v32 }
 0x766   : > { %8734 = vpow2.f32 %v5991_v15 }
 0x767   : > { %8736 = vpow2.f32 %v5989_v20  ;;  %5493 = vadd.xlane.f32.xlu0 %v5492_v46 }
 0x768   : > { %v10775_v18 = vpop.eup %8730 }
 0x769   : > { %v10777_v4 = vpop.eup %8732  ;;  %v6238_v11 = vpop.xlane.xlu0 %6237  ;;  %v5744_v16 = vsel %vm1032_vm9, %v10775_v18, 0.0 }
 0x76a   : > { %v6240_v6 = vsub.f32 %v10725_v0, %v6238_v11  ;;  %v6235_v7 = vpop.xlane.xlu1 %6234  ;;  %v5741_v22 = vsel %vm1032_vm9, %v10777_v4, 0.0  ;;  %v10833_v11 = vmul.f32 0.0, %v10489_v10 }
 0x76b   : > { %v6239_v34 = vsub.f32 %v10727_v5, %v6235_v7  ;;  %5742 = vadd.xlane.f32.xlu1 %v5741_v22  ;;  %5745 = vadd.xlane.f32.xlu0 %v5744_v16  ;;  %v11230_v22 = vld [vmem:[#allocation4_spill] sm:$0xff] }
 0x76c   : > { %v6243_v38 = vmul.f32 1.442695, %v6240_v6 }
 0x76d   : > { %v6241_v40 = vmul.f32 1.442695, %v6239_v34  ;;  %v5003_v34 = vmul.f32 %v11230_v22, %v10506_v12 }
 0x76e   : > { %8738 = vpow2.f32 %v6243_v38 }
 0x76f   : > { %8740 = vpow2.f32 %v6241_v40 }
 0x770   : > { %v10785_v33 = vpop.eup %8734 }
 0x771   : > { %v10787_v45 = vpop.eup %8736  ;;  %v6490_v39 = vpop.xlane.xlu0 %6489  ;;  %v5996_v0 = vsel %vm1032_vm9, %v10785_v33, 0.0 }
 0x772   : > { %v6492_v44 = vsub.f32 %v10733_v3, %v6490_v39  ;;  %v6487_v29 = vpop.xlane.xlu1 %6486  ;;  %5997 = vadd.xlane.f32.xlu0 %v5996_v0  ;;  %v5993_v5 = vsel %vm1032_vm9, %v10787_v45, 0.0 }
 0x773   : > { %v6491_v59 = vsub.f32 %v10735_v53, %v6487_v29  ;;  %5994 = vadd.xlane.f32.xlu1 %v5993_v5 }
 0x774   : > { %v6495_v58 = vmul.f32 1.442695, %v6492_v44 }
 0x775   : > { %v6493_v30 = vmul.f32 1.442695, %v6491_v59 }
 0x776   : > { %8742 = vpow2.f32 %v6495_v58 }
 0x777   : > { %8744 = vpow2.f32 %v6493_v30  ;;  %v11231_v30 = vld [vmem:[#allocation5_spill] sm:$0xff] }
 0x778   : > { %v10795_v48 = vpop.eup %8738 }
 0x779   : > { %v10797_v9 = vpop.eup %8740  ;;  %v6248_v1 = vsel %vm1032_vm9, %v10795_v48, 0.0 }
 0x77a   : > { %6249 = vadd.xlane.f32.xlu0 %v6248_v1  ;;  %v6245_v3 = vsel %vm1032_vm9, %v10797_v9, 0.0  ;;  %v5500_v1 = vmul.f32 %v11231_v30, %v10489_v10  ;;  %v7101_v30 = vld [vmem:[%s11058_s10] sm:$0xff] (!%p7633_p4) }
 0x77b   : > { %6246 = vadd.xlane.f32.xlu1 %v6245_v3 }
 0x780   : > { %v10806_v53 = vpop.eup %8742 }
 0x781   : > { %v10811_v36 = vpop.eup %8744  ;;  %v6500_v21 = vsel %vm1032_vm9, %v10806_v53, 0.0 }
 0x782   : > { %6501 = vadd.xlane.f32.xlu0 %v6500_v21  ;;  %v6497_v31 = vsel %vm1032_vm9, %v10811_v36, 0.0 }
 0x783   : > { %6498 = vadd.xlane.f32.xlu1 %v6497_v31 }
 0x786   : > { %6741 = vmax.xlane.f32.xlu0 %v6740_v54 }
 0x787   : > { %6738 = vmax.xlane.f32.xlu1 %v6737_v49 }
 0x7e7   : > { %v4998_v27 = vpop.xlane.xlu0 %4997 }
 0x7eb   : > { %v5140_v28 = vpop.xlane.xlu1 %5139 }
 0x7ec   : > { %8746 = vrcp.f32 %v5140_v28  ;;  %v5143_v57 = vpop.xlane.xlu0 %5142 }
 0x7ed   : > { %8748 = vrcp.f32 %v5143_v57 }
 0x7ee   : > { %8750 = vrcp.f32 %v4998_v27 }
 0x7f0   : > { %v4995_v47 = vpop.xlane.xlu0 %4994  ;;  %v5491_v35 = vpop.xlane.xlu1 %5490 }
 0x7f1   : > { %8752 = vrcp.f32 %v4995_v47 }
 0x7f2   : > { %8754 = vrcp.f32 %v5491_v35 }
 0x7f4   : > { %v5494_v24 = vpop.xlane.xlu0 %5493 }
 0x7f5   : > { %8756 = vrcp.f32 %v5494_v24 }
 0x7f6   : > { %v8747_v62 = vpop.eup %8746 }
 0x7f7   : > { %v8749_v52 = vpop.eup %8748  ;;  %v5146_v50 = vmul.f32 %v8747_v62, %v10753_v42 }
 0x7f8   : > { %v5743_v26 = vpop.xlane.xlu1 %5742  ;;  %v5746_v55 = vpop.xlane.xlu0 %5745  ;;  %v5147_v14 = vmul.f32 %v8749_v52, %v10755_v56 }
 0x7f9   : > { %v8751_v41 = vpop.eup %8750  ;;  %8758 = vrcp.f32 %v5743_v26 }
 0x7fa   : > { %v8432_v61 = vpack.c.bf16 %v5147_v14, %v5146_v50  ;;  %8760 = vrcp.f32 %v5746_v55  ;;  %v5002_v60 = vmul.f32 %v8751_v41, %v10747_v25  ;;  %v11233_v50 = vld [vmem:[#allocation7_spill] sm:$0xff] }
 0x7fb   : > { %v8753_v51 = vpop.eup %8752  ;;  %v6005_v26 = vmul.f32 %v11233_v50, %v10664_v43 }
 0x7fc   : > { %8434 = vmatprep.subr.msk.bf16.mxu0 %vm9397_vm10, %v8432_v61  ;;  %v5001_v19 = vmul.f32 %v8753_v51, %v10761_v37  ;;  %v8755_v42 = vpop.eup %8754  ;;  %v10837_v37 = vmul.f32 0.0, %v10664_v43 }
 0x7fd   : > { %8437 = vmatpush3.bf16.xpose.msk.msra.mxu0 %vm9397_vm10, %v8432_v61  ;;  %v5497_v16 = vmul.f32 %v8755_v42, %v10763_v13  ;;  %v10848_v13 = vmul.f32 0.0, %v10661_v17 }
 0x7fe   : > { %v8438_v20 = vpack.c.bf16 %v5002_v60, %v5001_v19 }
 0x7ff   : > { %v8757_v32 = vpop.eup %8756  ;;  %v5998_v15 = vpop.xlane.xlu0 %5997 }
 0x800   : > { %v5995_v56 = vpop.xlane.xlu1 %5994  ;;  %v5498_v46 = vmul.f32 %v8757_v32, %v10770_v63  ;;  %8440 = vmatprep.subr.msk.bf16.mxu0 %vm9397_vm10, %v8438_v20  ;;  %8762 = vrcp.f32 %v5998_v15 }
 0x801   : > { %8764 = vrcp.f32 %v5995_v56 }
 0x802   : > { %v8452_v6 = vpack.c.bf16 %v5498_v46, %v5497_v16  ;;  %v11237_v16 = vld [vmem:[#allocation12_spill] sm:$0xff] }
 0x803   : > { %v8759_v25 = vpop.eup %8758 }
 0x804   : > { %8119 = vmatmul.mubr.msk.f32.vlgmr.msra.gmra.mrb[26].mxu0 %vm1032_vm9, %v10833_v11  ;;  %v8761_v7 = vpop.eup %8760  ;;  %v5749_v40 = vmul.f32 %v8759_v25, %v10777_v4  ;;  %v10866_v4 = vmul.f32 0.0, %v10506_v12 }
 0x805   : > { %8121 = vmatprep.mubr.msk.f32.mxu0 %vm1032_vm9, %v10837_v37  ;;  %8443 = vmatpush3.bf16.xpose.msk.msra.mxu0 %vm9397_vm10, %v8438_v20  ;;  %v5750_v39 = vmul.f32 %v8761_v7, %v10775_v18  ;;  %v11236_v20 = vld [vmem:[#allocation10_spill] sm:$0xff] }
 0x806   : > { %8454 = vmatprep.subr.msk.bf16.mxu0 %vm9397_vm10, %v8452_v6  ;;  %v6762_v56 = vmul.f32 %v11236_v20, %v10661_v17 }
 0x807   : > { %v6250_v63 = vpop.xlane.xlu0 %6249  ;;  %v8466_v44 = vpack.c.bf16 %v5750_v39, %v5749_v40  ;;  %v6923_v40 = vld [vmem:[%s11055_s7] sm:$0xff] (!%p7633_p4)  ;;  %v6924_v39 = vld [vmem:[%s11055_s7 + $0x8] sm:$0xff] (!%p7633_p4) }
 0x808   : > { %v6247_v38 = vpop.xlane.xlu1 %6246  ;;  %8122 = vmatmul.mubr.msk.f32.gmra.mrb[28].mxu0 %vm1032_vm9, %v10848_v13  ;;  %8766 = vrcp.f32 %v6250_v63  ;;  %v11240_v63 = vld [vmem:[#allocation13_spill] sm:$0xff] }
 0x809   : > { %8128 = vmatprep.mubr.msk.f32.mxu0 %vm1032_vm9, %v5003_v34  ;;  %8768 = vrcp.f32 %v6247_v38 }
 0x80a   : > { %v8763_v0 = vpop.eup %8762 }
 0x80b   : > { %v8765_v29 = vpop.eup %8764  ;;  %v6002_v58 = vmul.f32 %v8763_v0, %v10785_v33  ;;  %v6925_v0 = vld [vmem:[%s11055_s7 + $0x10] sm:$0xff] (!%p7633_p4) }
 0x80c   : > { %8129 = vmatmul.mubr.msk.f32.vlgmr.msra.gmra.mrb[26].mxu0 %vm1032_vm9, %v10833_v11  ;;  %v6001_v59 = vmul.f32 %v8765_v29, %v10787_v45  ;;  %v6926_v29 = vld [vmem:[%s11055_s7 + $0x18] sm:$0xff] (!%p7633_p4) }
 0x80d   : > { %8131 = vmatprep.mubr.msk.f32.mxu0 %vm1032_vm9, %v10837_v37  ;;  %8457 = vmatpush3.bf16.xpose.msk.msra.mxu0 %vm9397_vm10, %v8452_v6  ;;  %v11238_v6 = vld [vmem:[#allocation11_spill] sm:$0xff] }
 0x80e   : > { %8468 = vmatprep.subr.msk.bf16.mxu0 %vm9397_vm10, %v8466_v44  ;;  %v8480_v54 = vpack.c.bf16 %v6002_v58, %v6001_v59 }
 0x80f   : > { %v6502_v18 = vpop.xlane.xlu0 %6501 }
 0x810   : > { %v6499_v5 = vpop.xlane.xlu1 %6498  ;;  %8132 = vmatmul.mubr.msk.f32.gmra.mrb[28].mxu0 %vm1032_vm9, %v10848_v13  ;;  %8770 = vrcp.f32 %v6502_v18 }
 0x811   : > { %8149 = vmatprep.mubr.msk.f32.mxu0 %vm1032_vm9, %v10866_v4  ;;  %8772 = vrcp.f32 %v6499_v5 }
 0x812   : > { %v8767_v21 = vpop.eup %8766 }
 0x813   : > { %v6742_v3 = vpop.xlane.xlu0 %6741  ;;  %v8769_v49 = vpop.eup %8768  ;;  %v6254_v28 = vmul.f32 %v8767_v21, %v10795_v48  ;;  %v7103_v21 = vld [vmem:[%s11058_s10 + $0x10] sm:$0xff] (!%p7633_p4) }
 0x814   : > { %v6744_v12 = vsub.f32 %v10804_v8, %v6742_v3  ;;  %v6739_v31 = vpop.xlane.xlu1 %6738  ;;  %8150 = vmatmul.mubr.msk.f32.vlgmr.msra.gmra.mrb[26].mxu0 %vm1032_vm9, %v5500_v1  ;;  %v6253_v8 = vmul.f32 %v8769_v49, %v10797_v9  ;;  %v7102_v1 = vld [vmem:[%s11058_s10 + $0x8] sm:$0xff] (!%p7633_p4) }
 0x815   : > { %v6743_v45 = vsub.f32 %v10809_v23, %v6739_v31  ;;  %8152 = vmatprep.mubr.msk.f32.mxu0 %vm1032_vm9, %v10837_v37  ;;  %8471 = vmatpush3.bf16.xpose.msk.msra.mxu0 %vm9397_vm10, %v8466_v44  ;;  %v11232_v23 = vld [vmem:[#allocation6_spill] sm:$0xff]  ;;  %v8528_v44 = vpack.c.bf16 (!%p7633_p4), %v6924_v39, %v6923_v40  ;;  %v8536_v3 = vpack.c.bf16 (!%p7633_p4), %v7102_v1, %v7101_v30 }
 0x816   : > { %v6747_v33 = vmul.f32 1.442695, %v6744_v12  ;;  %8482 = vmatprep.subr.msk.bf16.mxu0 %vm9397_vm10, %v8480_v54  ;;  %v5752_v57 = vmul.f32 %v11232_v23, %v10489_v10  ;;  %v8494_v47 = vpack.c.bf16 %v6254_v28, %v6253_v8  ;;  %v7104_v12 = vld [vmem:[%s11058_s10 + $0x18] sm:$0xff] (!%p7633_p4) }
 0x817   : > { %v6745_v27 = vmul.f32 1.442695, %v6743_v45  ;;  %8537 = vmatprep.subr.bf16.mxu1 (!%p7633_p4), %v8536_v3  ;;  %v8540_v31 = vpack.c.bf16 (!%p7633_p4), %v7104_v12, %v7103_v21 }
 0x818   : > { %8774 = vpow2.f32 %v6747_v33  ;;  %8153 = vmatmul.mubr.msk.f32.gmra.mrb[28].mxu0 %vm1032_vm9, %v10848_v13  ;;  %8539 = vmatpush3.bf16.msra.mxu1 (!%p7633_p4), %v8536_v3 }
 0x819   : > { %8776 = vpow2.f32 %v6745_v27  ;;  %8170 = vmatprep.mubr.msk.f32.mxu0 %vm1032_vm9, %v10866_v4  ;;  %8541 = vmatprep.subr.bf16.mxu1 (!%p7633_p4), %v8540_v31 }
 0x81a   : > { %v8771_v35 = vpop.eup %8770 }
 0x81b   : > { %v8773_v9 = vpop.eup %8772  ;;  %v6506_v48 = vmul.f32 %v8771_v35, %v10806_v53  ;;  %v11234_v53 = vld [vmem:[#allocation8_spill] sm:$0xff] }
 0x81c   : > { %8171 = vmatmul.mubr.msk.f32.vlgmr.msra.gmra.mrb[26].mxu0 %vm1032_vm9, %v5752_v57  ;;  %v6505_v10 = vmul.f32 %v8773_v9, %v10811_v36  ;;  %v6257_v36 = vmul.f32 %v11234_v53, %v10664_v43  ;;  %v11235_v43 = vld [vmem:[#allocation9_spill] sm:$0xff]  ;;  %8543 = vmatpush3.bf16.msra.mxu1 (!%p7633_p4), %v8540_v31 }
 0x81d   : > { %8173 = vmatprep.mubr.msk.f32.mxu0 %vm1032_vm9, %v10837_v37  ;;  %8485 = vmatpush3.bf16.xpose.msk.msra.mxu0 %vm9397_vm10, %v8480_v54  ;;  %v6510_v41 = vmul.f32 %v11235_v43, %v10661_v17 }
 0x81e   : > { %8496 = vmatprep.subr.msk.bf16.mxu0 %vm9397_vm10, %v8494_v47  ;;  %v8508_v14 = vpack.c.bf16 %v6506_v48, %v6505_v10 }
 0x820   : > { %8174 = vmatmul.mubr.msk.f32.gmra.mrb[28].mxu0 %vm1032_vm9, %v10848_v13 }
 0x821   : > { %8191 = vmatprep.mubr.msk.f32.mxu0 %vm1032_vm9, %v10866_v4 }
 0x822   : > { %v8775_v24 = vpop.eup %8774 }
 0x823   : > { %v8777_v62 = vpop.eup %8776  ;;  %v6752_v52 = vsel %vm1032_vm9, %v8775_v24, 0.0 }
 0x824   : > { %8192 = vmatmul.mubr.msk.f32.vlgmr.msra.gmra.mrb[26].mxu0 %vm1032_vm9, %v10833_v11  ;;  %6753 = vadd.xlane.f32.xlu0 %v6752_v52  ;;  %v6749_v55 = vsel %vm1032_vm9, %v8777_v62, 0.0 }
 0x825   : > { %6750 = vadd.xlane.f32.xlu1 %v6749_v55  ;;  %8194 = vmatprep.mubr.msk.f32.mxu0 %vm1032_vm9, %v6005_v26 }
 0x826   : > { %8499 = vmatpush3.bf16.xpose.msk.msra.mxu0 %vm9397_vm10, %v8494_v47 }
 0x827   : > { %8510 = vmatprep.subr.msk.bf16.mxu0 %vm9397_vm10, %v8508_v14 }
 0x828   : > { %8195 = vmatmul.mubr.msk.f32.gmra.mrb[28].mxu0 %vm1032_vm9, %v10848_v13 }
 0x829   : > { %8212 = vmatprep.mubr.msk.f32.mxu0 %vm1032_vm9, %v10866_v4 }
 0x82d   : > { %8213 = vmatmul.mubr.msk.f32.vlgmr.msra.gmra.mrb[26].mxu0 %vm1032_vm9, %v10833_v11 }
 0x82e   : > { %8215 = vmatprep.mubr.msk.f32.mxu0 %vm1032_vm9, %v6257_v36  ;;  %8513 = vmatpush3.bf16.xpose.msk.msra.mxu0 %vm9397_vm10, %v8508_v14 }
 0x831   : > { %8216 = vmatmul.mubr.msk.f32.gmra.mrb[28].mxu0 %vm1032_vm9, %v10848_v13 }
 0x832   : > { %8233 = vmatprep.mubr.msk.f32.mxu0 %vm1032_vm9, %v10866_v4 }
 0x835   : > { %8234 = vmatmul.mubr.msk.f32.vlgmr.msra.gmra.mrb[26].mxu0 %vm1032_vm9, %v10833_v11 }
 0x836   : > { %8236 = vmatprep.mubr.msk.f32.mxu0 %vm1032_vm9, %v10837_v37 }
 0x839   : > { %8237 = vmatmul.mubr.msk.f32.gmra.mrb[28].mxu0 %vm1032_vm9, %v6510_v41 }
 0x83a   : > { %8254 = vmatprep.mubr.msk.f32.mxu0 %vm1032_vm9, %v10866_v4  ;;  %v8532_v4 = vpack.c.bf16 (!%p7633_p4), %v6926_v29, %v6925_v0 }
 0x8b1   : > { %v6754_v61 = vpop.xlane.xlu0 %6753 }
 0x8b2   : > { %8778 = vrcp.f32 %v6754_v61  ;;  %v6751_v51 = vpop.xlane.xlu1 %6750 }
 0x8b3   : > { %8780 = vrcp.f32 %v6751_v51 }
 0x8bc   : > { %v8779_v19 = vpop.eup %8778 }
 0x8bd   : > { %v8781_v60 = vpop.eup %8780  ;;  %v6758_v42 = vmul.f32 %v8779_v19, %v8775_v24 }
 0x8be   : > { %v6757_v32 = vmul.f32 %v8781_v60, %v8777_v62 }
 0x8c0   : > { %v8522_v15 = vpack.c.bf16 %v6758_v42, %v6757_v32 }
 0x8c2   : > { %8524 = vmatprep.subr.msk.bf16.mxu0 %vm9397_vm10, %v8522_v15 }
 0x8c3   : > { %8527 = vmatpush3.bf16.xpose.msk.msra.mxu0 %vm9397_vm10, %v8522_v15 }
 0x8c4   : > { %8529 = vmatprep.subr.bf16.mxu0 (!%p7633_p4), %v8528_v44 }
 0x8ca   : > { %8255 = vmatmul.mubr.msk.f32.vlgmr.msra.gmra.mrb[26].mxu0 %vm1032_vm9, %v10833_v11 }
 0x8cb   : > { %8257 = vmatprep.mubr.msk.f32.mxu0 %vm1032_vm9, %v10837_v37  ;;  %v11239_v37 = vld [vmem:[#allocation15_spill] sm:$0xff]  ;;  %8531 = vmatpush3.bf16.msra.mxu0 (!%p7633_p4), %v8528_v44 }
 0x8cc   : > { %8533 = vmatprep.subr.bf16.mxu0 (!%p7633_p4), %v8532_v4 }
 0x8ce   : > { %8258 = vmatmul.mubr.msk.f32.gmra.mrb[28].mxu0 %vm1032_vm9, %v6762_v56 }
 0x8cf   : > { %8535 = vmatpush3.bf16.msra.mxu0 (!%p7633_p4), %v8532_v4 }
 0x99d   : > { %v8256_v46 = vpop.f32.mrb[26].mxu0 }
 0x99e   : > { %v6871_v2 = vadd.f32 %v8256_v46, %v11237_v16  ;;  %v6847_v25 = vpop.f32.mrb[27].mxu0 }
 0x99f   : > { %v6870_v11 = vadd.f32 %v6847_v25, %v11238_v6 }
 0x9a0   : > { %6875 = vst.msk [vmem:[%s465_s23 + $0x8] sm:$0xff] %vm1032_vm9, %v6871_v2 }
 0x9a1   : > { %6874 = vst.msk [vmem:[%s465_s23] sm:$0xff] %vm1032_vm9, %v6870_v11  ;;  %6878 = vxpose.xlu1.b32.start [1/4] (short) (narrow) %v6870_v11, 16  ;;  %v8259_v17 = vpop.f32.mrb[28].mxu0 }
 0x9a2   : > { %v6873_v7 = vadd.f32 %v8259_v17, %v11239_v37  ;;  %v6857_v13 = vpop.f32.mrb[29].mxu0 }
 0x9a3   : > { %v6872_v22 = vadd.f32 %v6857_v13, %v11240_v63 }
 0x9a4   : > { %6877 = vst.msk [vmem:[%s465_s23 + $0x18] sm:$0xff] %vm1032_vm9, %v6873_v7 }
 0x9a5   : > { %6876 = vst.msk [vmem:[%s465_s23 + $0x10] sm:$0xff] %vm1032_vm9, %v6872_v22  ;;  %6879 = vxpose.xlu1.b32.cont [2/4] (short) (narrow) %v6871_v2, 16 }
 0x9a9   : > { %6880 = vxpose.xlu1.b32.cont [3/4] (short) (narrow) %v6872_v22, 16 }
 0x9ad   : > { %6881 = vxpose.xlu1.b32.end [4/4] (short) (narrow) %v6873_v7, 16  ;;  %v7638_v7 = vld [vmem:[%s11056_s8] ss:$0 sm:$0xff] (!%p7633_p4) }
 0xa20   : > { %6917 = sbr.rel (%p7633_p4) target bundleno = 3177 (0xc69), region = 76 }
 0xa21   : > { %v6894_v34 = vpop.trf.xlu1 }
 0xa22   : > { %6912 = vst.msk [vmem:[%s6911_s22] sm:$0xff] %vm751_vm0, %v6894_v34 }
 0xa25   : > { %v6895_v38 = vpop.trf.xlu1 }
 0xa26   : > { %6913 = vst.msk [vmem:[%s6911_s22 + $0x8] sm:$0xff] %vm751_vm0, %v6895_v38  ;;  %v7639_v38 = vld [vmem:[%s11057_s9] ss:$0 sm:$0xff] (!%p7633_p4) }
 0xa2d   : > { %v6918_v18 = vld [vmem:[#allocation2] sm:$0xff]  ;;  %v6919_v5 = vld [vmem:[#allocation2 + $0x8] sm:$0xff]  ;;  %v6921_v59 = vld [vmem:[#allocation2 + $0x10] sm:$0xff] }
 0xa2e   : > { %8268 = vmatprep.mubr.msk.f32.mxu0 %vm751_vm0, %v6918_v18  ;;  %v6922_v58 = vld [vmem:[#allocation2 + $0x18] sm:$0xff] }
 0xa2f   : > { %8269 = vmatmul.mubr.msk.f32.vlgmr.msra.gmra.mrb[0].mxu0 %vm751_vm0, %v6919_v5 }
 0xa30   : > { %8271 = vmatprep.mubr.msk.f32.mxu0 %vm751_vm0, %v6921_v59 }
 0xa33   : > { %8272 = vmatmul.mubr.msk.f32.gmra.mrb[2].mxu0 %vm751_vm0, %v6922_v58 }
 0xb02   : > { %v8270_v54 = vpop.f32.mrb[0].mxu0 }
 0xb03   : > { %v7025_v49 = vsel %vm751_vm0, %v8270_v54, 0.0  ;;  %v7005_v45 = vpop.f32.mrb[1].mxu0 }
 0xb04   : > { %v7024_v33 = vsel %vm751_vm0, %v7005_v45, 0.0 }
 0xb05   : > { %v7026_v27 = vadd.f32 %v7025_v49, %v7024_v33 }
 0xb06   : > { %v8273_v8 = vpop.f32.mrb[2].mxu0 }
 0xb07   : > { %v7015_v28 = vpop.f32.mrb[3].mxu0  ;;  %v7029_v47 = vsel %vm751_vm0, %v8273_v8, 0.0 }
 0xb08   : > { %v7027_v23 = vsel %vm751_vm0, %v7015_v28, 0.0 }
 0xb09   : > { %v7028_v57 = vadd.f32 %v7027_v23, %v7026_v27 }
 0xb0b   : > { %v7030_v35 = vadd.f32 %v7029_v47, %v7028_v57 }
 0xb0d   : > { %v7031_v9 = vrot.slane %v7030_v35, 4 }
 0xb0f   : > { %v7032_v10 = vadd.f32 %v7031_v9, %v7030_v35 }
 0xb11   : > { %v7033_v48 = vrot.slane %v7032_v10, 2 }
 0xb13   : > { %v7034_v24 = vadd.f32 %v7033_v48, %v7032_v10 }
 0xb15   : > { %v7035_v62 = vrot.slane %v7034_v24, 1 }
 0xb17   : > { %v7036_v52 = vadd.f32 %v7035_v62, %v7034_v24 }
 0xb19   : > { %v7038_v50 = vmul.f32 0.03125, %v7036_v52 }
 0xb1b   : > { %v7039_v26 = vsub.f32 %v7005_v45, %v7038_v50  ;;  %v7040_v55 = vsub.f32 %v8270_v54, %v7038_v50  ;;  %v7041_v14 = vsub.f32 %v7015_v28, %v7038_v50  ;;  %v7042_v53 = vsub.f32 %v8273_v8, %v7038_v50 }
 0xb1d   : > { %v7043_v36 = vmul.f32 %v7039_v26, %v7039_v26  ;;  %v7044_v43 = vmul.f32 %v7040_v55, %v7040_v55  ;;  %v7045_v41 = vmul.f32 %v7041_v14, %v7041_v14  ;;  %v7046_v61 = vmul.f32 %v7042_v53, %v7042_v53 }
 0xb1f   : > { %v7047_v51 = vsel %vm751_vm0, %v7043_v36, 0.0  ;;  %v7048_v19 = vsel %vm751_vm0, %v7044_v43, 0.0  ;;  %v7050_v42 = vsel %vm751_vm0, %v7045_v41, 0.0  ;;  %v7052_v15 = vsel %vm751_vm0, %v7046_v61, 0.0 }
 0xb20   : > { %v7049_v60 = vadd.f32 %v7048_v19, %v7047_v51 }
 0xb22   : > { %v7051_v32 = vadd.f32 %v7050_v42, %v7049_v60 }
 0xb24   : > { %v7053_v20 = vadd.f32 %v7052_v15, %v7051_v32 }
 0xb26   : > { %v7054_v56 = vrot.slane %v7053_v20, 4 }
 0xb28   : > { %v7055_v46 = vadd.f32 %v7054_v56, %v7053_v20 }
 0xb2a   : > { %v7056_v16 = vrot.slane %v7055_v46, 2 }
 0xb2c   : > { %v7057_v2 = vadd.f32 %v7056_v16, %v7055_v46 }
 0xb2e   : > { %v7058_v25 = vrot.slane %v7057_v2, 1 }
 0xb30   : > { %v7059_v6 = vadd.f32 %v7058_v25, %v7057_v2 }
 0xb32   : > { %v7060_v11 = vmul.f32 0.03125, %v7059_v6 }
 0xb34   : > { %v7061_v17 = vadd.f32 1e-05, %v7060_v11 }
 0xb36   : > { %8786 = vrsqrt.f32 %v7061_v17 }
 0xb40   : > { %v8787_v37 = vpop.eup %8786 }
 0xb41   : > { %v7065_v13 = vmul.f32 %v8787_v37, %v7041_v14  ;;  %v7063_v63 = vmul.f32 %v8787_v37, %v7039_v26  ;;  %v7064_v22 = vmul.f32 %v8787_v37, %v7040_v55  ;;  %v7066_v34 = vmul.f32 %v8787_v37, %v7042_v53 }
 0xb43   : > { %v7076_v40 = vmul.f32 %v7638_v7, %v7065_v13  ;;  %v7074_v39 = vmul.f32 %v7638_v7, %v7063_v63  ;;  %v7075_v0 = vmul.f32 %v7638_v7, %v7064_v22  ;;  %v7077_v44 = vmul.f32 %v7638_v7, %v7066_v34  ;;  %v7644_v7 = vld [vmem:[%s11059_s11] ss:$0 sm:$0xff] }
 0xb45   : > { %v7085_v29 = vadd.f32 %v7639_v38, %v7074_v39  ;;  %v7086_v18 = vadd.f32 %v7639_v38, %v7075_v0  ;;  %v7087_v4 = vadd.f32 %v7639_v38, %v7076_v40  ;;  %v7088_v5 = vadd.f32 %v7639_v38, %v7077_v44  ;;  %v7645_v38 = vld [vmem:[%s11060_s12] ss:$0 sm:$0xff] }
 0xb47   : > { %vm7089_vm9 = vcmp.gt.f32.partialorder %v7085_v29, 0.0  ;;  %v7093_v59 = vmul.f32 0.2, %v7085_v29  ;;  %vm7090_vm10 = vcmp.gt.f32.partialorder %v7086_v18, 0.0  ;;  %v7094_v58 = vmul.f32 0.2, %v7086_v18 }
 0xb48   : > { %vm7091_vm14 = vcmp.gt.f32.partialorder %v7087_v4, 0.0  ;;  %v7095_v30 = vmul.f32 0.2, %v7087_v4  ;;  %v7096_v21 = vmul.f32 0.2, %v7088_v5  ;;  %vm7092_vm8 = vcmp.gt.f32.partialorder %v7088_v5, 0.0 }
 0xb49   : > { %v7097_v1 = vsel %vm7089_vm9, %v7085_v29, %v7093_v59  ;;  %v7098_v3 = vsel %vm7090_vm10, %v7086_v18, %v7094_v58 }
 0xb4a   : > { %8282 = vmatprep.mubr.msk.f32.mxu1 %vm751_vm0, %v7097_v1  ;;  %v7099_v12 = vsel %vm7091_vm14, %v7087_v4, %v7095_v30  ;;  %v7100_v31 = vsel %vm7092_vm8, %v7088_v5, %v7096_v21 }
 0xb4b   : > { %8283 = vmatmul.mubr.msk.f32.vlgmr.msra.gmra.mrb[0].mxu1 %vm751_vm0, %v7098_v3 }
 0xb4c   : > { %8285 = vmatprep.mubr.msk.f32.mxu1 %vm751_vm0, %v7099_v12 }
 0xb4f   : > { %8286 = vmatmul.mubr.msk.f32.gmra.mrb[2].mxu1 %vm751_vm0, %v7100_v31 }
 0xc1e   : > { %v8284_v54 = vpop.f32.mrb[0].mxu1 }
 0xc1f   : > { %v7204_v49 = vsel %vm7202_vm15, %v8284_v54, 0.0  ;;  %v7183_v45 = vpop.f32.mrb[1].mxu1 }
 0xc20   : > { %v7203_v33 = vsel %vm7202_vm15, %v7183_v45, 0.0 }
 0xc21   : > { %v7205_v27 = vadd.f32 %v7204_v49, %v7203_v33 }
 0xc22   : > { %v8287_v8 = vpop.f32.mrb[2].mxu1 }
 0xc23   : > { %v7193_v28 = vpop.f32.mrb[3].mxu1  ;;  %v7208_v47 = vsel %vm7202_vm15, %v8287_v8, 0.0 }
 0xc24   : > { %v7206_v23 = vsel %vm7202_vm15, %v7193_v28, 0.0 }
 0xc25   : > { %v7207_v57 = vadd.f32 %v7206_v23, %v7205_v27 }
 0xc27   : > { %v7209_v35 = vadd.f32 %v7208_v47, %v7207_v57 }
 0xc29   : > { %v7210_v9 = vrot.slane %v7209_v35, 4 }
 0xc2b   : > { %v7211_v10 = vadd.f32 %v7210_v9, %v7209_v35 }
 0xc2d   : > { %v7212_v48 = vrot.slane %v7211_v10, 2 }
 0xc2f   : > { %v7213_v24 = vadd.f32 %v7212_v48, %v7211_v10 }
 0xc31   : > { %v7214_v62 = vrot.slane %v7213_v24, 1 }
 0xc33   : > { %v7215_v52 = vadd.f32 %v7214_v62, %v7213_v24 }
 0xc35   : > { %v7216_v50 = vmul.f32 0.03125, %v7215_v52 }
 0xc37   : > { %v7217_v26 = vsub.f32 %v7183_v45, %v7216_v50  ;;  %v7218_v55 = vsub.f32 %v8284_v54, %v7216_v50  ;;  %v7219_v14 = vsub.f32 %v7193_v28, %v7216_v50  ;;  %v7220_v53 = vsub.f32 %v8287_v8, %v7216_v50 }
 0xc39   : > { %v7221_v36 = vmul.f32 %v7217_v26, %v7217_v26  ;;  %v7222_v43 = vmul.f32 %v7218_v55, %v7218_v55  ;;  %v7223_v41 = vmul.f32 %v7219_v14, %v7219_v14  ;;  %v7224_v61 = vmul.f32 %v7220_v53, %v7220_v53 }
 0xc3b   : > { %v7225_v51 = vsel %vm7202_vm15, %v7221_v36, 0.0  ;;  %v7226_v19 = vsel %vm7202_vm15, %v7222_v43, 0.0  ;;  %v7228_v42 = vsel %vm7202_vm15, %v7223_v41, 0.0  ;;  %v7230_v15 = vsel %vm7202_vm15, %v7224_v61, 0.0 }
 0xc3c   : > { %v7227_v60 = vadd.f32 %v7226_v19, %v7225_v51 }
 0xc3e   : > { %v7229_v32 = vadd.f32 %v7228_v42, %v7227_v60 }
 0xc40   : > { %v7231_v20 = vadd.f32 %v7230_v15, %v7229_v32 }
 0xc42   : > { %v7232_v56 = vrot.slane %v7231_v20, 4 }
 0xc44   : > { %v7233_v46 = vadd.f32 %v7232_v56, %v7231_v20 }
 0xc46   : > { %v7234_v16 = vrot.slane %v7233_v46, 2 }
 0xc48   : > { %v7235_v2 = vadd.f32 %v7234_v16, %v7233_v46 }
 0xc4a   : > { %v7236_v25 = vrot.slane %v7235_v2, 1 }
 0xc4c   : > { %v7237_v6 = vadd.f32 %v7236_v25, %v7235_v2 }
 0xc4e   : > { %v7238_v11 = vmul.f32 0.03125, %v7237_v6 }
 0xc50   : > { %v7239_v17 = vadd.f32 1e-05, %v7238_v11 }
 0xc52   : > { %8788 = vrsqrt.f32 %v7239_v17 }
 0xc5c   : > { %v8789_v37 = vpop.eup %8788 }
 0xc5d   : > { %v7241_v13 = vmul.f32 %v8789_v37, %v7217_v26  ;;  %v7242_v63 = vmul.f32 %v8789_v37, %v7218_v55  ;;  %v7243_v22 = vmul.f32 %v8789_v37, %v7219_v14  ;;  %v7244_v34 = vmul.f32 %v8789_v37, %v7220_v53 }
 0xc5f   : > { %v7252_v40 = vmul.f32 %v7644_v7, %v7241_v13  ;;  %v7253_v39 = vmul.f32 %v7644_v7, %v7242_v63  ;;  %v7254_v0 = vmul.f32 %v7644_v7, %v7243_v22  ;;  %v7255_v44 = vmul.f32 %v7644_v7, %v7244_v34 }
 0xc61   : > { %v7263_v29 = vadd.f32 %v7645_v38, %v7252_v40  ;;  %v7264_v18 = vadd.f32 %v7645_v38, %v7253_v39  ;;  %v7265_v4 = vadd.f32 %v7645_v38, %v7254_v0  ;;  %v7266_v5 = vadd.f32 %v7645_v38, %v7255_v44 }
 0xc63   : > { %vm7267_vm0 = vcmp.gt.f32.partialorder %v7263_v29, 0.0  ;;  %vm7268_vm11 = vcmp.gt.f32.partialorder %v7264_v18, 0.0  ;;  %vm7269_vm1 = vcmp.gt.f32.partialorder %v7265_v4, 0.0  ;;  %vm7270_vm2 = vcmp.gt.f32.partialorder %v7266_v5, 0.0 }
 0xc64   : > { %v7271_v59 = vmul.f32 0.2, %v7263_v29  ;;  %v7272_v58 = vmul.f32 0.2, %v7264_v18  ;;  %v7273_v30 = vmul.f32 0.2, %v7265_v4 }
 0xc65   : > { %v7274_v1 = vmul.f32 0.2, %v7266_v5 }
 0xc66   : > { %v7275_v3 = vsel %vm7267_vm0, %v7263_v29, %v7271_v59  ;;  %v7276_v21 = vsel %vm7268_vm11, %v7264_v18, %v7272_v58  ;;  %v7277_v12 = vsel %vm7269_vm1, %v7265_v4, %v7273_v30 }
 0xc67   : > { %v7278_v31 = vsel %vm7270_vm2, %v7266_v5, %v7274_v1  ;;  %7279 = vst.msk [vmem:[%s11062_s14] sm:$0xff] %vm7202_vm15, %v7275_v3  ;;  %7280 = vst.msk [vmem:[%s11062_s14 + $0x8] sm:$0xff] %vm7202_vm15, %v7276_v21 }
 0xc68   : > { %7646 = vst.msk [vmem:[%s11062_s14 + $0x10] sm:$0xff] %vm7202_vm15, %v7277_v12  ;;  %7647 = vst.msk [vmem:[%s11062_s14 + $0x18] sm:$0xff] %vm7202_vm15, %v7278_v31 }
 0xc69 PF: > { %s25_s29 = sadd.s32 1, %s8796_s29  }
 0xc6a   : > { %p22_p5 = scmp.ge.s32.totalorder %s25_s29, 4  }
 0xc6c   :  { %24 = sbr.rel (!%p22_p5) target bundleno = 1 (0x1), region = 140 }

</bundles_post_ra>
